<compile_context>
chip_gen: v6e
topology: v6e:2x2x1
jax: 0.10.0
libtpu: 0.0.40
codegen_flags: <defaults>
</compile_context>

<pallas_src>
import jax
import jax.numpy as jnp
from jax.experimental import pallas as pl
from jax.experimental.pallas import tpu as pltpu


def _pick_time_block(T, max_tt=32):
    """Largest divisor of T that is <= max_tt (timesteps per grid step)."""
    tt = min(T, max_tt)
    while T % tt:
        tt -= 1
    return tt


def lstm_recurrence_kernel(pre_ref, whh_ref, h0_ref, c0_ref,
                           hs_ref, hN_ref, cN_ref,
                           h_sc, c_sc):
    """One grid step runs TT timesteps of the LSTM recurrence.

    pre_ref : (B, TT, 4H)  precomputed x @ W_ih^T + (b_ih + b_hh), this block
    whh_ref : (H, 4H)      recurrent weight (pre-transposed)
    hs_ref  : (B, TT, H)   per-step hidden states (batch-major, no transpose)
    hN/cN   : (B, H)       final state.  Constant index_map keeps the block
                           resident across the grid; HBM writeback happens
                           once after the last iteration, so the value written
                           under the final pl.when is the only one that lands.
    """
    tb = pl.program_id(0)
    H = h_sc.shape[-1]
    TT = pre_ref.shape[1]

    @pl.when(tb == 0)
    def _():
        h_sc[...] = h0_ref[...]
        c_sc[...] = c0_ref[...]

    whh = whh_ref[...]                  # hoisted out of the unrolled loop
    h = h_sc[...]
    c = c_sc[...]

    # Fully unrolled static loop (TT is small & static): equivalent to
    # lax.fori_loop(..., unroll=True) but with purely static ref indexing.
    for s in range(TT):
        gates = pre_ref[:, s, :] + jnp.dot(
            h, whh, preferred_element_type=jnp.float32)        # (B, 4H)
        # Two full-vreg EUP passes; gate order is PyTorch's [i, f, g, o].
        sig = jax.nn.sigmoid(gates)
        tnh = jnp.tanh(gates)
        i_g = sig[:, 0 * H:1 * H]
        f_g = sig[:, 1 * H:2 * H]
        g_g = tnh[:, 2 * H:3 * H]
        o_g = sig[:, 3 * H:4 * H]
        c = f_g * c + i_g * g_g
        h = o_g * jnp.tanh(c)
        hs_ref[:, s, :] = h

    h_sc[...] = h
    c_sc[...] = c

    @pl.when(tb == pl.num_programs(0) - 1)
    def _():
        hN_ref[...] = h
        cN_ref[...] = c


def char_lstm_forward(input_ids, hidden, params):
    """input_ids: (B, T) int32; hidden: (h0, c0) each (n_layers=1, B, H)."""
    embed_tbl = params["embed"]                        # (V, H)
    w_ih = params["w_ih"]                              # (4H, H) PyTorch layout
    w_hh = params["w_hh"]                              # (4H, H)
    bias = params["b_ih"] + params["b_hh"]             # (4H,)
    w_fc = params["w_fc"]                              # (V, H)
    b_fc = params["b_fc"]                              # (V,)

    B, T = input_ids.shape
    V, H = embed_tbl.shape
    TT = _pick_time_block(T)
    B_pad = -(-B // 8) * 8                             # full 8-sublane tiles

    h0 = hidden[0][0]                                  # (B, H)
    c0 = hidden[1][0]                                  # (B, H)

    # ---- hoisted, time-independent work: one big input-projection matmul ----
    embedded = jnp.take(embed_tbl, input_ids, axis=0)            # (B, T, H)
    pre = embedded.reshape(B * T, H) @ w_ih.T + bias             # (B*T, 4H)
    pre = pre.reshape(B, T, 4 * H)

    pad = B_pad - B
    if pad:
        pre = jnp.pad(pre, ((0, pad), (0, 0), (0, 0)))
        h0 = jnp.pad(h0, ((0, pad), (0, 0)))
        c0 = jnp.pad(c0, ((0, pad), (0, 0)))

    whh_k = w_hh.T                                               # (H, 4H)

    hs, h_n, c_n = pl.pallas_call(
        lstm_recurrence_kernel,
        out_shape=(
            jax.ShapeDtypeStruct((B_pad, T, H), jnp.float32),    # hidden states
            jax.ShapeDtypeStruct((B_pad, H), jnp.float32),       # h_N
            jax.ShapeDtypeStruct((B_pad, H), jnp.float32),       # c_N
        ),
        grid_spec=pltpu.PrefetchScalarGridSpec(
            num_scalar_prefetch=0,
            grid=(T // TT,),
            in_specs=[
                pl.BlockSpec((B_pad, TT, 4 * H), lambda t: (0, t, 0)),  # pre
                pl.BlockSpec((H, 4 * H), lambda t: (0, 0)),             # W_hh^T
                pl.BlockSpec((B_pad, H), lambda t: (0, 0)),             # h0
                pl.BlockSpec((B_pad, H), lambda t: (0, 0)),             # c0
            ],
            out_specs=[
                pl.BlockSpec((B_pad, TT, H), lambda t: (0, t, 0)),      # h_t
                pl.BlockSpec((B_pad, H), lambda t: (0, 0)),             # h_N
                pl.BlockSpec((B_pad, H), lambda t: (0, 0)),             # c_N
            ],
            scratch_shapes=[
                pltpu.VMEM((B_pad, H), jnp.float32),                    # h carry
                pltpu.VMEM((B_pad, H), jnp.float32),                    # c carry
            ],
        ),
        # Recurrence over time blocks is inherently sequential.
        # TODO(synk): with a real (large) batch, add a leading "parallel"
        # batch-block grid axis so v7x's second TensorCore is used.
        compiler_params=pltpu.CompilerParams(
            dimension_semantics=("arbitrary",)),
    )(pre, whh_k, h0, c0)

    hs = hs[:B]                                                  # (B, T, H)
    h_n = h_n[:B]
    c_n = c_n[:B]

    # ---- hoisted FC projection: one lane-dense matmul over all timesteps ----
    logits = hs.reshape(B * T, H) @ w_fc.T + b_fc                # (B*T, V)
    return logits, (h_n[None, :, :], c_n[None, :, :])


def reference_forward(input_ids, hidden, params):
    """Pure-JAX reference replicating PyTorch semantics (for validation)."""
    embed_tbl = params["embed"]
    H = embed_tbl.shape[1]
    w_ih, w_hh = params["w_ih"], params["w_hh"]
    b = params["b_ih"] + params["b_hh"]
    w_fc, b_fc = params["w_fc"], params["b_fc"]

    emb = jnp.take(embed_tbl, input_ids, axis=0)        # (B, T, H)
    h, c = hidden[0][0], hidden[1][0]

    def step(carry, x_t):
        h, c = carry
        gates = x_t @ w_ih.T + h @ w_hh.T + b
        i = jax.nn.sigmoid(gates[:, 0 * H:1 * H])
        f = jax.nn.sigmoid(gates[:, 1 * H:2 * H])
        g = jnp.tanh(gates[:, 2 * H:3 * H])
        o = jax.nn.sigmoid(gates[:, 3 * H:4 * H])
        c_new = f * c + i * g
        h_new = o * jnp.tanh(c_new)
        return (h_new, c_new), h_new

    (h_n, c_n), hs = jax.lax.scan(step, (h, c), jnp.transpose(emb, (1, 0, 2)))
    out = jnp.transpose(hs, (1, 0, 2))                   # (B, T, H)
    logits = out.reshape(-1, H) @ w_fc.T + b_fc
    return logits, (h_n[None], c_n[None])


if __name__ == "__main__":
    vocab_size = 32
    hidden_dim = 32
    n_layers = 1
    batch = 2
    seq = 8

    key = jax.random.PRNGKey(0)
    ks = jax.random.split(key, 8)
    scale = 1.0 / jnp.sqrt(hidden_dim)
    params = {
        "embed": jax.random.normal(ks[0], (vocab_size, hidden_dim), jnp.float32),
        "w_ih": jax.random.uniform(ks[1], (4 * hidden_dim, hidden_dim),
                                   jnp.float32, -scale, scale),
        "w_hh": jax.random.uniform(ks[2], (4 * hidden_dim, hidden_dim),
                                   jnp.float32, -scale, scale),
        "b_ih": jax.random.uniform(ks[3], (4 * hidden_dim,),
                                   jnp.float32, -scale, scale),
        "b_hh": jax.random.uniform(ks[4], (4 * hidden_dim,),
                                   jnp.float32, -scale, scale),
        "w_fc": jax.random.uniform(ks[5], (vocab_size, hidden_dim),
                                   jnp.float32, -scale, scale),
        "b_fc": jax.random.uniform(ks[6], (vocab_size,),
                                   jnp.float32, -scale, scale),
    }

    input_ids = jax.random.randint(ks[7], (batch, seq), 0, vocab_size, jnp.int32)
    hidden = (jnp.zeros((n_layers, batch, hidden_dim), jnp.float32),
              jnp.zeros((n_layers, batch, hidden_dim), jnp.float32))

    logits, (h_n, c_n) = char_lstm_forward(input_ids, hidden, params)
    jax.block_until_ready((logits, h_n, c_n))

    ref_logits, (ref_h, ref_c) = reference_forward(input_ids, hidden, params)
    assert logits.shape == (batch * seq, vocab_size)
    assert h_n.shape == (n_layers, batch, hidden_dim)
    assert c_n.shape == (n_layers, batch, hidden_dim)
    assert jnp.allclose(logits, ref_logits, atol=1e-4, rtol=1e-4)
    assert jnp.allclose(h_n, ref_h, atol=1e-4, rtol=1e-4)
    assert jnp.allclose(c_n, ref_c, atol=1e-4, rtol=1e-4)

    print("KERNEL_OK")
</pallas_src>

<mosaic_0001>
module attributes {stable_mosaic.version = 11 : i64} {
  func.func @lstm_recurrence_kernel(%arg0: i32, %arg1: memref<8x8x128xf32, #tpu.memory_space<vmem>>, %arg2: memref<32x128xf32, #tpu.memory_space<vmem>>, %arg3: memref<8x32xf32, #tpu.memory_space<vmem>>, %arg4: memref<8x32xf32, #tpu.memory_space<vmem>>, %arg5: memref<8x8x32xf32, #tpu.memory_space<vmem>>, %arg6: memref<8x32xf32, #tpu.memory_space<vmem>>, %arg7: memref<8x32xf32, #tpu.memory_space<vmem>>, %arg8: memref<8x32xf32, #tpu.memory_space<vmem>>, %arg9: memref<8x32xf32, #tpu.memory_space<vmem>>) attributes {dimension_semantics = [#tpu.dimension_semantics<arbitrary>], iteration_bounds = array<i64: 1>, scalar_prefetch = 0 : i64, scratch_operands = 2 : i64, tpu.core_type = #tpu.core_type<tc>, window_params = [{transform_indices = @transform_0, window_bounds = array<i64: 8, 8, 128>}, {pipeline_mode = #tpu.pipeline_mode<synchronous>, transform_indices = @transform_1, window_bounds = array<i64: 32, 128>}, {pipeline_mode = #tpu.pipeline_mode<synchronous>, transform_indices = @transform_2, window_bounds = array<i64: 8, 32>}, {pipeline_mode = #tpu.pipeline_mode<synchronous>, transform_indices = @transform_3, window_bounds = array<i64: 8, 32>}, {transform_indices = @transform_4, window_bounds = array<i64: 8, 8, 32>}, {pipeline_mode = #tpu.pipeline_mode<synchronous>, transform_indices = @transform_5, window_bounds = array<i64: 8, 32>}, {pipeline_mode = #tpu.pipeline_mode<synchronous>, transform_indices = @transform_6, window_bounds = array<i64: 8, 32>}]} {
    %c0_i32 = arith.constant 0 : i32
    %0 = arith.cmpi eq, %arg0, %c0_i32 : i32
    %1 = arith.extui %0 : i1 to i32
    %c0_i32_0 = arith.constant 0 : i32
    %2 = arith.cmpi ne, %1, %c0_i32_0 : i32
    scf.if %2 {
      %c0_68 = arith.constant 0 : index
      %c0_69 = arith.constant 0 : index
      %187 = vector.load %arg3[%c0_68, %c0_69] : memref<8x32xf32, #tpu.memory_space<vmem>>, vector<8x32xf32>
      %c0_70 = arith.constant 0 : index
      %c0_71 = arith.constant 0 : index
      %188 = vector.load %arg8[%c0_70, %c0_71] : memref<8x32xf32, #tpu.memory_space<vmem>>, vector<8x32xf32>
      tpu.vector_store %arg8[%c0_70, %c0_71], %187 {strides = array<i32>} : memref<8x32xf32, #tpu.memory_space<vmem>>, vector<8x32xf32>,
      %c0_72 = arith.constant 0 : index
      %c0_73 = arith.constant 0 : index
      %189 = vector.load %arg4[%c0_72, %c0_73] : memref<8x32xf32, #tpu.memory_space<vmem>>, vector<8x32xf32>
      %c0_74 = arith.constant 0 : index
      %c0_75 = arith.constant 0 : index
      %190 = vector.load %arg9[%c0_74, %c0_75] : memref<8x32xf32, #tpu.memory_space<vmem>>, vector<8x32xf32>
      tpu.vector_store %arg9[%c0_74, %c0_75], %189 {strides = array<i32>} : memref<8x32xf32, #tpu.memory_space<vmem>>, vector<8x32xf32>,
    } else {
    }
    %c0 = arith.constant 0 : index
    %c0_1 = arith.constant 0 : index
    %3 = vector.load %arg2[%c0, %c0_1] : memref<32x128xf32, #tpu.memory_space<vmem>>, vector<32x128xf32>
    %c0_2 = arith.constant 0 : index
    %c0_3 = arith.constant 0 : index
    %4 = vector.load %arg8[%c0_2, %c0_3] : memref<8x32xf32, #tpu.memory_space<vmem>>, vector<8x32xf32>
    %c0_4 = arith.constant 0 : index
    %c0_5 = arith.constant 0 : index
    %5 = vector.load %arg9[%c0_4, %c0_5] : memref<8x32xf32, #tpu.memory_space<vmem>>, vector<8x32xf32>
    %c0_6 = arith.constant 0 : index
    %c0_7 = arith.constant 0 : index
    %c0_8 = arith.constant 0 : index
    %6 = vector.load %arg1[%c0_6, %c0_7, %c0_8] : memref<8x8x128xf32, #tpu.memory_space<vmem>>, vector<8x1x128xf32>
    %7 = vector.shape_cast %6 : vector<8x1x128xf32> to vector<8x128xf32>
    %cst = arith.constant dense<0.000000e+00> : vector<8x128xf32>
    %8 = tpu.matmul %4, %3, %cst {dimension_numbers = #tpu.dot_dimension_numbers<[1], [0], [0], [1], [0, 0, 1, 1], [], []>} : vector<8x32xf32>, vector<32x128xf32>, vector<8x128xf32> -> vector<8x128xf32>
    %9 = arith.addf %7, %8 : vector<8x128xf32>
    %10 = arith.negf %9 : vector<8x128xf32>
    %11 = math.exp %10 : vector<8x128xf32>
    %cst_9 = arith.constant 1.000000e+00 : f32
    %12 = vector.broadcast %cst_9 : f32 to vector<8x128xf32>
    %13 = arith.addf %12, %11 : vector<8x128xf32>
    %14 = arith.divf %12, %13 : vector<8x128xf32>
    %15 = math.tanh %9 : vector<8x128xf32>
    %16 = vector.extract_strided_slice %14 {offsets = [0, 0], sizes = [8, 32], strides = [1, 1]} : vector<8x128xf32> to vector<8x32xf32>
    %17 = vector.extract_strided_slice %14 {offsets = [0, 32], sizes = [8, 32], strides = [1, 1]} : vector<8x128xf32> to vector<8x32xf32>
    %18 = vector.extract_strided_slice %15 {offsets = [0, 64], sizes = [8, 32], strides = [1, 1]} : vector<8x128xf32> to vector<8x32xf32>
    %19 = vector.extract_strided_slice %14 {offsets = [0, 96], sizes = [8, 32], strides = [1, 1]} : vector<8x128xf32> to vector<8x32xf32>
    %20 = arith.mulf %17, %5 : vector<8x32xf32>
    %21 = arith.mulf %16, %18 : vector<8x32xf32>
    %22 = arith.addf %20, %21 : vector<8x32xf32>
    %23 = math.tanh %22 : vector<8x32xf32>
    %24 = arith.mulf %19, %23 : vector<8x32xf32>
    %c0_10 = arith.constant 0 : index
    %c0_11 = arith.constant 0 : index
    %c0_12 = arith.constant 0 : index
    %25 = vector.load %arg5[%c0_10, %c0_11, %c0_12] : memref<8x8x32xf32, #tpu.memory_space<vmem>>, vector<8x1x32xf32>
    %26 = vector.shape_cast %25 : vector<8x1x32xf32> to vector<8x32xf32>
    %27 = vector.shape_cast %24 : vector<8x32xf32> to vector<8x1x32xf32>
    tpu.vector_store %arg5[%c0_10, %c0_11, %c0_12], %27 {strides = array<i32>} : memref<8x8x32xf32, #tpu.memory_space<vmem>>, vector<8x1x32xf32>,
    %c0_13 = arith.constant 0 : index
    %c1 = arith.constant 1 : index
    %c0_14 = arith.constant 0 : index
    %28 = vector.load %arg1[%c0_13, %c1, %c0_14] : memref<8x8x128xf32, #tpu.memory_space<vmem>>, vector<8x1x128xf32>
    %29 = vector.shape_cast %28 : vector<8x1x128xf32> to vector<8x128xf32>
    %cst_15 = arith.constant dense<0.000000e+00> : vector<8x128xf32>
    %30 = tpu.matmul %24, %3, %cst_15 {dimension_numbers = #tpu.dot_dimension_numbers<[1], [0], [0], [1], [0, 0, 1, 1], [], []>} : vector<8x32xf32>, vector<32x128xf32>, vector<8x128xf32> -> vector<8x128xf32>
    %31 = arith.addf %29, %30 : vector<8x128xf32>
    %32 = arith.negf %31 : vector<8x128xf32>
    %33 = math.exp %32 : vector<8x128xf32>
    %cst_16 = arith.constant 1.000000e+00 : f32
    %34 = vector.broadcast %cst_16 : f32 to vector<8x128xf32>
    %35 = arith.addf %34, %33 : vector<8x128xf32>
    %36 = arith.divf %34, %35 : vector<8x128xf32>
    %37 = math.tanh %31 : vector<8x128xf32>
    %38 = vector.extract_strided_slice %36 {offsets = [0, 0], sizes = [8, 32], strides = [1, 1]} : vector<8x128xf32> to vector<8x32xf32>
    %39 = vector.extract_strided_slice %36 {offsets = [0, 32], sizes = [8, 32], strides = [1, 1]} : vector<8x128xf32> to vector<8x32xf32>
    %40 = vector.extract_strided_slice %37 {offsets = [0, 64], sizes = [8, 32], strides = [1, 1]} : vector<8x128xf32> to vector<8x32xf32>
    %41 = vector.extract_strided_slice %36 {offsets = [0, 96], sizes = [8, 32], strides = [1, 1]} : vector<8x128xf32> to vector<8x32xf32>
    %42 = arith.mulf %39, %22 : vector<8x32xf32>
    %43 = arith.mulf %38, %40 : vector<8x32xf32>
    %44 = arith.addf %42, %43 : vector<8x32xf32>
    %45 = math.tanh %44 : vector<8x32xf32>
    %46 = arith.mulf %41, %45 : vector<8x32xf32>
    %c0_17 = arith.constant 0 : index
    %c1_18 = arith.constant 1 : index
    %c0_19 = arith.constant 0 : index
    %47 = vector.load %arg5[%c0_17, %c1_18, %c0_19] : memref<8x8x32xf32, #tpu.memory_space<vmem>>, vector<8x1x32xf32>
    %48 = vector.shape_cast %47 : vector<8x1x32xf32> to vector<8x32xf32>
    %49 = vector.shape_cast %46 : vector<8x32xf32> to vector<8x1x32xf32>
    tpu.vector_store %arg5[%c0_17, %c1_18, %c0_19], %49 {strides = array<i32>} : memref<8x8x32xf32, #tpu.memory_space<vmem>>, vector<8x1x32xf32>,
    %c0_20 = arith.constant 0 : index
    %c2 = arith.constant 2 : index
    %c0_21 = arith.constant 0 : index
    %50 = vector.load %arg1[%c0_20, %c2, %c0_21] : memref<8x8x128xf32, #tpu.memory_space<vmem>>, vector<8x1x128xf32>
    %51 = vector.shape_cast %50 : vector<8x1x128xf32> to vector<8x128xf32>
    %cst_22 = arith.constant dense<0.000000e+00> : vector<8x128xf32>
    %52 = tpu.matmul %46, %3, %cst_22 {dimension_numbers = #tpu.dot_dimension_numbers<[1], [0], [0], [1], [0, 0, 1, 1], [], []>} : vector<8x32xf32>, vector<32x128xf32>, vector<8x128xf32> -> vector<8x128xf32>
    %53 = arith.addf %51, %52 : vector<8x128xf32>
    %54 = arith.negf %53 : vector<8x128xf32>
    %55 = math.exp %54 : vector<8x128xf32>
    %cst_23 = arith.constant 1.000000e+00 : f32
    %56 = vector.broadcast %cst_23 : f32 to vector<8x128xf32>
    %57 = arith.addf %56, %55 : vector<8x128xf32>
    %58 = arith.divf %56, %57 : vector<8x128xf32>
    %59 = math.tanh %53 : vector<8x128xf32>
    %60 = vector.extract_strided_slice %58 {offsets = [0, 0], sizes = [8, 32], strides = [1, 1]} : vector<8x128xf32> to vector<8x32xf32>
    %61 = vector.extract_strided_slice %58 {offsets = [0, 32], sizes = [8, 32], strides = [1, 1]} : vector<8x128xf32> to vector<8x32xf32>
    %62 = vector.extract_strided_slice %59 {offsets = [0, 64], sizes = [8, 32], strides = [1, 1]} : vector<8x128xf32> to vector<8x32xf32>
    %63 = vector.extract_strided_slice %58 {offsets = [0, 96], sizes = [8, 32], strides = [1, 1]} : vector<8x128xf32> to vector<8x32xf32>
    %64 = arith.mulf %61, %44 : vector<8x32xf32>
    %65 = arith.mulf %60, %62 : vector<8x32xf32>
    %66 = arith.addf %64, %65 : vector<8x32xf32>
    %67 = math.tanh %66 : vector<8x32xf32>
    %68 = arith.mulf %63, %67 : vector<8x32xf32>
    %c0_24 = arith.constant 0 : index
    %c2_25 = arith.constant 2 : index
    %c0_26 = arith.constant 0 : index
    %69 = vector.load %arg5[%c0_24, %c2_25, %c0_26] : memref<8x8x32xf32, #tpu.memory_space<vmem>>, vector<8x1x32xf32>
    %70 = vector.shape_cast %69 : vector<8x1x32xf32> to vector<8x32xf32>
    %71 = vector.shape_cast %68 : vector<8x32xf32> to vector<8x1x32xf32>
    tpu.vector_store %arg5[%c0_24, %c2_25, %c0_26], %71 {strides = array<i32>} : memref<8x8x32xf32, #tpu.memory_space<vmem>>, vector<8x1x32xf32>,
    %c0_27 = arith.constant 0 : index
    %c3 = arith.constant 3 : index
    %c0_28 = arith.constant 0 : index
    %72 = vector.load %arg1[%c0_27, %c3, %c0_28] : memref<8x8x128xf32, #tpu.memory_space<vmem>>, vector<8x1x128xf32>
    %73 = vector.shape_cast %72 : vector<8x1x128xf32> to vector<8x128xf32>
    %cst_29 = arith.constant dense<0.000000e+00> : vector<8x128xf32>
    %74 = tpu.matmul %68, %3, %cst_29 {dimension_numbers = #tpu.dot_dimension_numbers<[1], [0], [0], [1], [0, 0, 1, 1], [], []>} : vector<8x32xf32>, vector<32x128xf32>, vector<8x128xf32> -> vector<8x128xf32>
    %75 = arith.addf %73, %74 : vector<8x128xf32>
    %76 = arith.negf %75 : vector<8x128xf32>
    %77 = math.exp %76 : vector<8x128xf32>
    %cst_30 = arith.constant 1.000000e+00 : f32
    %78 = vector.broadcast %cst_30 : f32 to vector<8x128xf32>
    %79 = arith.addf %78, %77 : vector<8x128xf32>
    %80 = arith.divf %78, %79 : vector<8x128xf32>
    %81 = math.tanh %75 : vector<8x128xf32>
    %82 = vector.extract_strided_slice %80 {offsets = [0, 0], sizes = [8, 32], strides = [1, 1]} : vector<8x128xf32> to vector<8x32xf32>
    %83 = vector.extract_strided_slice %80 {offsets = [0, 32], sizes = [8, 32], strides = [1, 1]} : vector<8x128xf32> to vector<8x32xf32>
    %84 = vector.extract_strided_slice %81 {offsets = [0, 64], sizes = [8, 32], strides = [1, 1]} : vector<8x128xf32> to vector<8x32xf32>
    %85 = vector.extract_strided_slice %80 {offsets = [0, 96], sizes = [8, 32], strides = [1, 1]} : vector<8x128xf32> to vector<8x32xf32>
    %86 = arith.mulf %83, %66 : vector<8x32xf32>
    %87 = arith.mulf %82, %84 : vector<8x32xf32>
    %88 = arith.addf %86, %87 : vector<8x32xf32>
    %89 = math.tanh %88 : vector<8x32xf32>
    %90 = arith.mulf %85, %89 : vector<8x32xf32>
    %c0_31 = arith.constant 0 : index
    %c3_32 = arith.constant 3 : index
    %c0_33 = arith.constant 0 : index
    %91 = vector.load %arg5[%c0_31, %c3_32, %c0_33] : memref<8x8x32xf32, #tpu.memory_space<vmem>>, vector<8x1x32xf32>
    %92 = vector.shape_cast %91 : vector<8x1x32xf32> to vector<8x32xf32>
    %93 = vector.shape_cast %90 : vector<8x32xf32> to vector<8x1x32xf32>
    tpu.vector_store %arg5[%c0_31, %c3_32, %c0_33], %93 {strides = array<i32>} : memref<8x8x32xf32, #tpu.memory_space<vmem>>, vector<8x1x32xf32>,
    %c0_34 = arith.constant 0 : index
    %c4 = arith.constant 4 : index
    %c0_35 = arith.constant 0 : index
    %94 = vector.load %arg1[%c0_34, %c4, %c0_35] : memref<8x8x128xf32, #tpu.memory_space<vmem>>, vector<8x1x128xf32>
    %95 = vector.shape_cast %94 : vector<8x1x128xf32> to vector<8x128xf32>
    %cst_36 = arith.constant dense<0.000000e+00> : vector<8x128xf32>
    %96 = tpu.matmul %90, %3, %cst_36 {dimension_numbers = #tpu.dot_dimension_numbers<[1], [0], [0], [1], [0, 0, 1, 1], [], []>} : vector<8x32xf32>, vector<32x128xf32>, vector<8x128xf32> -> vector<8x128xf32>
    %97 = arith.addf %95, %96 : vector<8x128xf32>
    %98 = arith.negf %97 : vector<8x128xf32>
    %99 = math.exp %98 : vector<8x128xf32>
    %cst_37 = arith.constant 1.000000e+00 : f32
    %100 = vector.broadcast %cst_37 : f32 to vector<8x128xf32>
    %101 = arith.addf %100, %99 : vector<8x128xf32>
    %102 = arith.divf %100, %101 : vector<8x128xf32>
    %103 = math.tanh %97 : vector<8x128xf32>
    %104 = vector.extract_strided_slice %102 {offsets = [0, 0], sizes = [8, 32], strides = [1, 1]} : vector<8x128xf32> to vector<8x32xf32>
    %105 = vector.extract_strided_slice %102 {offsets = [0, 32], sizes = [8, 32], strides = [1, 1]} : vector<8x128xf32> to vector<8x32xf32>
    %106 = vector.extract_strided_slice %103 {offsets = [0, 64], sizes = [8, 32], strides = [1, 1]} : vector<8x128xf32> to vector<8x32xf32>
    %107 = vector.extract_strided_slice %102 {offsets = [0, 96], sizes = [8, 32], strides = [1, 1]} : vector<8x128xf32> to vector<8x32xf32>
    %108 = arith.mulf %105, %88 : vector<8x32xf32>
    %109 = arith.mulf %104, %106 : vector<8x32xf32>
    %110 = arith.addf %108, %109 : vector<8x32xf32>
    %111 = math.tanh %110 : vector<8x32xf32>
    %112 = arith.mulf %107, %111 : vector<8x32xf32>
    %c0_38 = arith.constant 0 : index
    %c4_39 = arith.constant 4 : index
    %c0_40 = arith.constant 0 : index
    %113 = vector.load %arg5[%c0_38, %c4_39, %c0_40] : memref<8x8x32xf32, #tpu.memory_space<vmem>>, vector<8x1x32xf32>
    %114 = vector.shape_cast %113 : vector<8x1x32xf32> to vector<8x32xf32>
    %115 = vector.shape_cast %112 : vector<8x32xf32> to vector<8x1x32xf32>
    tpu.vector_store %arg5[%c0_38, %c4_39, %c0_40], %115 {strides = array<i32>} : memref<8x8x32xf32, #tpu.memory_space<vmem>>, vector<8x1x32xf32>,
    %c0_41 = arith.constant 0 : index
    %c5 = arith.constant 5 : index
    %c0_42 = arith.constant 0 : index
    %116 = vector.load %arg1[%c0_41, %c5, %c0_42] : memref<8x8x128xf32, #tpu.memory_space<vmem>>, vector<8x1x128xf32>
    %117 = vector.shape_cast %116 : vector<8x1x128xf32> to vector<8x128xf32>
    %cst_43 = arith.constant dense<0.000000e+00> : vector<8x128xf32>
    %118 = tpu.matmul %112, %3, %cst_43 {dimension_numbers = #tpu.dot_dimension_numbers<[1], [0], [0], [1], [0, 0, 1, 1], [], []>} : vector<8x32xf32>, vector<32x128xf32>, vector<8x128xf32> -> vector<8x128xf32>
    %119 = arith.addf %117, %118 : vector<8x128xf32>
    %120 = arith.negf %119 : vector<8x128xf32>
    %121 = math.exp %120 : vector<8x128xf32>
    %cst_44 = arith.constant 1.000000e+00 : f32
    %122 = vector.broadcast %cst_44 : f32 to vector<8x128xf32>
    %123 = arith.addf %122, %121 : vector<8x128xf32>
    %124 = arith.divf %122, %123 : vector<8x128xf32>
    %125 = math.tanh %119 : vector<8x128xf32>
    %126 = vector.extract_strided_slice %124 {offsets = [0, 0], sizes = [8, 32], strides = [1, 1]} : vector<8x128xf32> to vector<8x32xf32>
    %127 = vector.extract_strided_slice %124 {offsets = [0, 32], sizes = [8, 32], strides = [1, 1]} : vector<8x128xf32> to vector<8x32xf32>
    %128 = vector.extract_strided_slice %125 {offsets = [0, 64], sizes = [8, 32], strides = [1, 1]} : vector<8x128xf32> to vector<8x32xf32>
    %129 = vector.extract_strided_slice %124 {offsets = [0, 96], sizes = [8, 32], strides = [1, 1]} : vector<8x128xf32> to vector<8x32xf32>
    %130 = arith.mulf %127, %110 : vector<8x32xf32>
    %131 = arith.mulf %126, %128 : vector<8x32xf32>
    %132 = arith.addf %130, %131 : vector<8x32xf32>
    %133 = math.tanh %132 : vector<8x32xf32>
    %134 = arith.mulf %129, %133 : vector<8x32xf32>
    %c0_45 = arith.constant 0 : index
    %c5_46 = arith.constant 5 : index
    %c0_47 = arith.constant 0 : index
    %135 = vector.load %arg5[%c0_45, %c5_46, %c0_47] : memref<8x8x32xf32, #tpu.memory_space<vmem>>, vector<8x1x32xf32>
    %136 = vector.shape_cast %135 : vector<8x1x32xf32> to vector<8x32xf32>
    %137 = vector.shape_cast %134 : vector<8x32xf32> to vector<8x1x32xf32>
    tpu.vector_store %arg5[%c0_45, %c5_46, %c0_47], %137 {strides = array<i32>} : memref<8x8x32xf32, #tpu.memory_space<vmem>>, vector<8x1x32xf32>,
    %c0_48 = arith.constant 0 : index
    %c6 = arith.constant 6 : index
    %c0_49 = arith.constant 0 : index
    %138 = vector.load %arg1[%c0_48, %c6, %c0_49] : memref<8x8x128xf32, #tpu.memory_space<vmem>>, vector<8x1x128xf32>
    %139 = vector.shape_cast %138 : vector<8x1x128xf32> to vector<8x128xf32>
    %cst_50 = arith.constant dense<0.000000e+00> : vector<8x128xf32>
    %140 = tpu.matmul %134, %3, %cst_50 {dimension_numbers = #tpu.dot_dimension_numbers<[1], [0], [0], [1], [0, 0, 1, 1], [], []>} : vector<8x32xf32>, vector<32x128xf32>, vector<8x128xf32> -> vector<8x128xf32>
    %141 = arith.addf %139, %140 : vector<8x128xf32>
    %142 = arith.negf %141 : vector<8x128xf32>
    %143 = math.exp %142 : vector<8x128xf32>
    %cst_51 = arith.constant 1.000000e+00 : f32
    %144 = vector.broadcast %cst_51 : f32 to vector<8x128xf32>
    %145 = arith.addf %144, %143 : vector<8x128xf32>
    %146 = arith.divf %144, %145 : vector<8x128xf32>
    %147 = math.tanh %141 : vector<8x128xf32>
    %148 = vector.extract_strided_slice %146 {offsets = [0, 0], sizes = [8, 32], strides = [1, 1]} : vector<8x128xf32> to vector<8x32xf32>
    %149 = vector.extract_strided_slice %146 {offsets = [0, 32], sizes = [8, 32], strides = [1, 1]} : vector<8x128xf32> to vector<8x32xf32>
    %150 = vector.extract_strided_slice %147 {offsets = [0, 64], sizes = [8, 32], strides = [1, 1]} : vector<8x128xf32> to vector<8x32xf32>
    %151 = vector.extract_strided_slice %146 {offsets = [0, 96], sizes = [8, 32], strides = [1, 1]} : vector<8x128xf32> to vector<8x32xf32>
    %152 = arith.mulf %149, %132 : vector<8x32xf32>
    %153 = arith.mulf %148, %150 : vector<8x32xf32>
    %154 = arith.addf %152, %153 : vector<8x32xf32>
    %155 = math.tanh %154 : vector<8x32xf32>
    %156 = arith.mulf %151, %155 : vector<8x32xf32>
    %c0_52 = arith.constant 0 : index
    %c6_53 = arith.constant 6 : index
    %c0_54 = arith.constant 0 : index
    %157 = vector.load %arg5[%c0_52, %c6_53, %c0_54] : memref<8x8x32xf32, #tpu.memory_space<vmem>>, vector<8x1x32xf32>
    %158 = vector.shape_cast %157 : vector<8x1x32xf32> to vector<8x32xf32>
    %159 = vector.shape_cast %156 : vector<8x32xf32> to vector<8x1x32xf32>
    tpu.vector_store %arg5[%c0_52, %c6_53, %c0_54], %159 {strides = array<i32>} : memref<8x8x32xf32, #tpu.memory_space<vmem>>, vector<8x1x32xf32>,
    %c0_55 = arith.constant 0 : index
    %c7 = arith.constant 7 : index
    %c0_56 = arith.constant 0 : index
    %160 = vector.load %arg1[%c0_55, %c7, %c0_56] : memref<8x8x128xf32, #tpu.memory_space<vmem>>, vector<8x1x128xf32>
    %161 = vector.shape_cast %160 : vector<8x1x128xf32> to vector<8x128xf32>
    %cst_57 = arith.constant dense<0.000000e+00> : vector<8x128xf32>
    %162 = tpu.matmul %156, %3, %cst_57 {dimension_numbers = #tpu.dot_dimension_numbers<[1], [0], [0], [1], [0, 0, 1, 1], [], []>} : vector<8x32xf32>, vector<32x128xf32>, vector<8x128xf32> -> vector<8x128xf32>
    %163 = arith.addf %161, %162 : vector<8x128xf32>
    %164 = arith.negf %163 : vector<8x128xf32>
    %165 = math.exp %164 : vector<8x128xf32>
    %cst_58 = arith.constant 1.000000e+00 : f32
    %166 = vector.broadcast %cst_58 : f32 to vector<8x128xf32>
    %167 = arith.addf %166, %165 : vector<8x128xf32>
    %168 = arith.divf %166, %167 : vector<8x128xf32>
    %169 = math.tanh %163 : vector<8x128xf32>
    %170 = vector.extract_strided_slice %168 {offsets = [0, 0], sizes = [8, 32], strides = [1, 1]} : vector<8x128xf32> to vector<8x32xf32>
    %171 = vector.extract_strided_slice %168 {offsets = [0, 32], sizes = [8, 32], strides = [1, 1]} : vector<8x128xf32> to vector<8x32xf32>
    %172 = vector.extract_strided_slice %169 {offsets = [0, 64], sizes = [8, 32], strides = [1, 1]} : vector<8x128xf32> to vector<8x32xf32>
    %173 = vector.extract_strided_slice %168 {offsets = [0, 96], sizes = [8, 32], strides = [1, 1]} : vector<8x128xf32> to vector<8x32xf32>
    %174 = arith.mulf %171, %154 : vector<8x32xf32>
    %175 = arith.mulf %170, %172 : vector<8x32xf32>
    %176 = arith.addf %174, %175 : vector<8x32xf32>
    %177 = math.tanh %176 : vector<8x32xf32>
    %178 = arith.mulf %173, %177 : vector<8x32xf32>
    %c0_59 = arith.constant 0 : index
    %c7_60 = arith.constant 7 : index
    %c0_61 = arith.constant 0 : index
    %179 = vector.load %arg5[%c0_59, %c7_60, %c0_61] : memref<8x8x32xf32, #tpu.memory_space<vmem>>, vector<8x1x32xf32>
    %180 = vector.shape_cast %179 : vector<8x1x32xf32> to vector<8x32xf32>
    %181 = vector.shape_cast %178 : vector<8x32xf32> to vector<8x1x32xf32>
    tpu.vector_store %arg5[%c0_59, %c7_60, %c0_61], %181 {strides = array<i32>} : memref<8x8x32xf32, #tpu.memory_space<vmem>>, vector<8x1x32xf32>,
    %c0_62 = arith.constant 0 : index
    %c0_63 = arith.constant 0 : index
    %182 = vector.load %arg8[%c0_62, %c0_63] : memref<8x32xf32, #tpu.memory_space<vmem>>, vector<8x32xf32>
    tpu.vector_store %arg8[%c0_62, %c0_63], %178 {strides = array<i32>} : memref<8x32xf32, #tpu.memory_space<vmem>>, vector<8x32xf32>,
    %c0_64 = arith.constant 0 : index
    %c0_65 = arith.constant 0 : index
    %183 = vector.load %arg9[%c0_64, %c0_65] : memref<8x32xf32, #tpu.memory_space<vmem>>, vector<8x32xf32>
    tpu.vector_store %arg9[%c0_64, %c0_65], %176 {strides = array<i32>} : memref<8x32xf32, #tpu.memory_space<vmem>>, vector<8x32xf32>,
    %c0_i32_66 = arith.constant 0 : i32
    %184 = arith.cmpi eq, %arg0, %c0_i32_66 : i32
    %185 = arith.extui %184 : i1 to i32
    %c0_i32_67 = arith.constant 0 : i32
    %186 = arith.cmpi ne, %185, %c0_i32_67 : i32
    scf.if %186 {
      %c0_68 = arith.constant 0 : index
      %c0_69 = arith.constant 0 : index
      %187 = vector.load %arg6[%c0_68, %c0_69] : memref<8x32xf32, #tpu.memory_space<vmem>>, vector<8x32xf32>
      tpu.vector_store %arg6[%c0_68, %c0_69], %178 {strides = array<i32>} : memref<8x32xf32, #tpu.memory_space<vmem>>, vector<8x32xf32>,
      %c0_70 = arith.constant 0 : index
      %c0_71 = arith.constant 0 : index
      %188 = vector.load %arg7[%c0_70, %c0_71] : memref<8x32xf32, #tpu.memory_space<vmem>>, vector<8x32xf32>
      tpu.vector_store %arg7[%c0_70, %c0_71], %176 {strides = array<i32>} : memref<8x32xf32, #tpu.memory_space<vmem>>, vector<8x32xf32>,
    } else {
    }
    return
  }
  func.func @transform_0(%arg0: i32) -> (i32, i32, i32) {
    %c0_i32 = arith.constant 0 : i32
    %c0_i32_0 = arith.constant 0 : i32
    %c0_i32_1 = arith.constant 0 : i32
    return %c0_i32, %arg0, %c0_i32_0 : i32, i32, i32
  }
  func.func @transform_1(%arg0: i32) -> (i32, i32) {
    %c0_i32 = arith.constant 0 : i32
    %c0_i32_0 = arith.constant 0 : i32
    %c0_i32_1 = arith.constant 0 : i32
    return %c0_i32, %c0_i32_0 : i32, i32
  }
  func.func @transform_2(%arg0: i32) -> (i32, i32) {
    %c0_i32 = arith.constant 0 : i32
    %c0_i32_0 = arith.constant 0 : i32
    %c0_i32_1 = arith.constant 0 : i32
    return %c0_i32, %c0_i32_0 : i32, i32
  }
  func.func @transform_3(%arg0: i32) -> (i32, i32) {
    %c0_i32 = arith.constant 0 : i32
    %c0_i32_0 = arith.constant 0 : i32
    %c0_i32_1 = arith.constant 0 : i32
    return %c0_i32, %c0_i32_0 : i32, i32
  }
  func.func @transform_4(%arg0: i32) -> (i32, i32, i32) {
    %c0_i32 = arith.constant 0 : i32
    %c0_i32_0 = arith.constant 0 : i32
    %c0_i32_1 = arith.constant 0 : i32
    return %c0_i32, %arg0, %c0_i32_0 : i32, i32, i32
  }
  func.func @transform_5(%arg0: i32) -> (i32, i32) {
    %c0_i32 = arith.constant 0 : i32
    %c0_i32_0 = arith.constant 0 : i32
    %c0_i32_1 = arith.constant 0 : i32
    return %c0_i32, %c0_i32_0 : i32, i32
  }
  func.func @transform_6(%arg0: i32) -> (i32, i32) {
    %c0_i32 = arith.constant 0 : i32
    %c0_i32_0 = arith.constant 0 : i32
    %c0_i32_1 = arith.constant 0 : i32
    return %c0_i32, %c0_i32_0 : i32, i32
  }
}

</mosaic_0001>

<bundles_post_ra>
// kernel: tpu_custom_call.1
= control target key start
LH: loop header
LB: loop body
LE: loop exit
PB: predicated region body
PF: predicated region fallthrough
CT: control target
= control target key end

     0   :  { %12 = vsyncpa [#allocation5], 0  ;;  %s5279_s0 = inlined_call_operand.hbm [shape: f32[8,8,128], index: 0, kind: input, shape index: {}]   ;;  %s5280_s1 = inlined_call_operand.hbm [shape: f32[32,128], index: 1, kind: input, shape index: {}]   ;;  %s5281_s2 = inlined_call_operand.hbm [shape: f32[8,32], index: 2, kind: input, shape index: {}]   ;;  %s5282_s3 = inlined_call_operand.hbm [shape: f32[8,32], index: 3, kind: input, shape index: {}]   ;;  %s5283_s4 = inlined_call_operand.hbm [shape: f32[8,8,32], index: 4, kind: output, shape index: {0}]   ;;  %s5284_s5 = inlined_call_operand.hbm [shape: f32[8,32], index: 5, kind: output, shape index: {1}]   ;;  %s5285_s6 = inlined_call_operand.hbm [shape: f32[8,32], index: 6, kind: output, shape index: {2}]  }
   0x1   :  { %13 = vsyncpa [#allocation8], 0 }
   0x2   :  { %14 = vsyncpa [#allocation11], 0 }
   0x3   :  { %15 = vsyncpa [#allocation6], 0 }
   0x4   :  { %16 = vsyncpa [#allocation14], 0  ;;  %s3905_s21 = smov [#allocation7]   ;;  %s3906_s23 = smov [#allocation4]  }
   0x5   :  { %s34_s22 = sshll.u32 %s3905_s21, 4  ;;  %s22_s24 = sshll.u32 %s3906_s23, 4  ;;  %s35_s22 = int_to_ptr.vmem [resolvable:$true] %s34_s22  ;;  %s23_s24 = int_to_ptr.vmem [resolvable:$true] %s22_s24 }
   0x6   :  { %s3763_s25 = scalar_lea.vmem %s35_s22, 512  ;;  %p3768_p1 = scmp.lt.s32.totalorder %s35_s22, %s35_s22 }
   0x7   :  { %p3764_p0 = scmp.ne.s32.totalorder %s35_s22, %s3763_s25  ;;  %p3769_p2 = scmp.lt.s32.totalorder %s3763_s25, %s3763_s25 }
   0x9   :  { %p3770_p3 = por %p3769_p2, %p3768_p1 }
   0xb   :  { %p3771_p4 = pnand %p3770_p3, %p3764_p0 }
   0xd   :  { %3774 = shalt.err (!%p3771_p4)
}
   0xe   :  { %s3907_s26 = smov 128   ;;  %s3908_s27 = smov 8  }
   0xf   :  { %40 = dma.hbm_to_vmem [thread:$0]  %s5280_s1, 512, %s35_s22, [#allocation8], %s3907_s26, %s3907_s26, %s3908_s27  }
  0x10   :  { %s3783_s30 = scalar_lea.vmem %s23_s24, 1024  ;;  %p3788_p6 = scmp.lt.s32.totalorder %s23_s24, %s23_s24 }
  0x11   :  { %p3784_p5 = scmp.ne.s32.totalorder %s23_s24, %s3783_s30  ;;  %p3789_p7 = scmp.lt.s32.totalorder %s3783_s30, %s3783_s30 }
  0x13   :  { %p3790_p8 = por %p3789_p7, %p3788_p6 }
  0x15   :  { %p3791_p9 = pnand %p3790_p8, %p3784_p5 }
  0x17   :  { %3794 = shalt.err (!%p3791_p9)
}
  0x18   :  { %28 = dma.hbm_to_vmem [thread:$0]  %s5279_s0, 1024, %s23_s24, [#allocation5], %s3907_s26, %s3907_s26, %s3908_s27  }
  0x19   :  { %s3909_s9 = smov [#allocation9]   ;;  %s3910_s11 = smov [#allocation10]  }
  0x1a   :  { %s47_s10 = sshll.u32 %s3909_s9, 4  ;;  %s57_s12 = sshll.u32 %s3910_s11, 4  ;;  %s48_s10 = int_to_ptr.vmem [resolvable:$true] %s47_s10  ;;  %s58_s12 = int_to_ptr.vmem [resolvable:$true] %s57_s12 }
  0x1b   :  { %s3803_s1 = scalar_lea.vmem %s48_s10, 128  ;;  %p3808_p11 = scmp.lt.s32.totalorder %s48_s10, %s48_s10 }
  0x1c   :  { %p3804_p10 = scmp.ne.s32.totalorder %s48_s10, %s3803_s1  ;;  %p3809_p12 = scmp.lt.s32.totalorder %s3803_s1, %s3803_s1 }
  0x1e   :  { %p3810_p13 = por %p3809_p12, %p3808_p11 }
  0x20   :  { %p3811_p0 = pnand %p3810_p13, %p3804_p10 }
  0x22   :  { %3814 = shalt.err (!%p3811_p0)
}
  0x23   :  { %50 = dma.hbm_to_vmem [thread:$0]  %s5281_s2, 128, %s48_s10, [#allocation8]  }
  0x24   :  { %s3823_s15 = scalar_lea.vmem %s58_s12, 128  ;;  %p3828_p2 = scmp.lt.s32.totalorder %s58_s12, %s58_s12 }
  0x25   :  { %p3824_p1 = scmp.ne.s32.totalorder %s58_s12, %s3823_s15  ;;  %p3829_p3 = scmp.lt.s32.totalorder %s3823_s15, %s3823_s15 }
  0x27   :  { %p3830_p4 = por %p3829_p3, %p3828_p2 }
  0x29   :  { %p3831_p5 = pnand %p3830_p4, %p3824_p1 }
  0x2b   :  { %3834 = shalt.err (!%p3831_p5)
}
  0x2c   :  { %60 = dma.hbm_to_vmem [thread:$0]  %s5282_s3, 128, %s58_s12, [#allocation11]  }
  0x2d   :  { %3895 = dma.done.wait [#allocation5], 1024  }
  0x2e   :  { %3896 = vsyncadd [#allocation5], 4294966272 }
  0x2f   :  { %3897 = dma.done.wait [#allocation8], 640  }
  0x30   :  { %3898 = vsyncadd [#allocation8], 4294966656 }
  0x31   :  { %3899 = dma.done.wait [#allocation11], 128  }
  0x32   :  { %3900 = vsyncadd [#allocation11], 4294967168  ;;  %v5286_v0 = vmov 0.0   ;;  %vm3912_vm0 = vmmov 0   ;;  %vm78_vm1 = vcmask 261120   ;;  %v3978_v1 = vld [vmem:[#allocation7 + $0x18] sm:$0xff] }
  0x33   :  { %3137 = vmatprep.subr.mxu0 %v5286_v0  ;;  %3145 = vmatprep.mubr.msk.f32.mxu0 %vm3912_vm0, %v5286_v0  ;;  %v3980_v2 = vld [vmem:[#allocation7 + $0x10] sm:$0xff]  ;;  %v77_v3 = vld [vmem:[#allocation9] sm:$0xff]  ;;  %v3985_v4 = vld [vmem:[#allocation7 + $0x8] sm:$0xff]  ;;  %s3913_s2 = smov 64   ;;  %s3914_s3 = smov 32   ;;  %vm468_vm2 = vcmask 1041409  }
  0x34   :  { %3148 = vmatprep.subr.mxu1 %v5286_v0  ;;  %3156 = vmatprep.mubr.msk.f32.mxu1 %vm3912_vm0, %v5286_v0  ;;  %79 = vst.msk [vmem:[#allocation2] sm:$0xff] %vm78_vm1, %v77_v3  ;;  %v3992_v5 = vld [vmem:[#allocation7] sm:$0xff]  ;;  %v80_v7 = vld [vmem:[#allocation10] sm:$0xff]  ;;  %v91_v10 = vld [vmem:[#allocation4 + $0x18] sm:$0x1]  ;;  %vm471_vm3 = vcmask 1042434  }
  0x35   :  { %3138 = vmatpush3.msra.mxu0 %v3978_v1  ;;  %3149 = vmatpush3.msra.mxu1 %v3978_v1  ;;  %81 = vst.msk [vmem:[#allocation3] sm:$0xff] %vm78_vm1, %v80_v7  ;;  %v88_v8 = vld [vmem:[#allocation4] sm:$0x1]  ;;  %v93_v16 = vld [vmem:[#allocation4 + $0x28] sm:$0x1]  ;;  %vm474_vm4 = vcmask 1043459  }
  0x36   :  { %3139 = vmatprep.subr.mxu0 %v5286_v0  ;;  %3150 = vmatprep.subr.mxu1 %v5286_v0  ;;  %v95_v18 = vld [vmem:[#allocation4 + $0x38] sm:$0x1]  ;;  %v89_v21 = vld [vmem:[#allocation4 + $0x8] sm:$0x1]  ;;  %v90_v25 = vld [vmem:[#allocation4 + $0x10] sm:$0x1] }
  0x37   :  { %3140 = vmatpush3.msra.mxu0 %v3980_v2  ;;  %3151 = vmatpush3.msra.mxu1 %v3980_v2  ;;  %v92_v29 = vld [vmem:[#allocation4 + $0x20] sm:$0x1]  ;;  %v94_v33 = vld [vmem:[#allocation4 + $0x30] sm:$0x1]  ;;  %vm477_vm5 = vcmask 1044484   ;;  %vm480_vm6 = vcmask 1045509  }
  0x38   :  { %3141 = vmatprep.subr.mxu0 %v5286_v0  ;;  %3152 = vmatprep.subr.mxu1 %v5286_v0  ;;  %vm483_vm7 = vcmask 1046534   ;;  %vm486_vm8 = vcmask 1047559   ;;  %vm450_vm9 = vcmask 253952   ;;  %s3915_s17 = smov 96   ;;  %s3916_s18 = smov [#allocation13]  }
  0x39   :  { %3142 = vmatpush3.msra.mxu0 %v3985_v4  ;;  %3153 = vmatpush3.msra.mxu1 %v3985_v4  ;;  %s2997_s19 = sshll.u32 %s3916_s18, 4  ;;  %s3917_s20 = smov [#allocation15]   ;;  %s2998_s19 = int_to_ptr.vmem [resolvable:$true] %s2997_s19 }
  0x3a   :  { %3143 = vmatprep.subr.mxu0 %v5286_v0  ;;  %3154 = vmatprep.subr.mxu1 %v5286_v0  ;;  %s3007_s21 = sshll.u32 %s3917_s20, 4  ;;  %s3918_s22 = smov [#allocation12]   ;;  %s3008_s21 = int_to_ptr.vmem [resolvable:$true] %s3007_s21 }
  0x3b   :  { %3144 = vmatpush3.msra.mxu0 %v3992_v5  ;;  %3155 = vmatpush3.msra.mxu1 %v3992_v5  ;;  %v86_v6 = vld [vmem:[#allocation2] sm:$0xff]  ;;  %s2984_s23 = sshll.u32 %s3918_s22, 4  ;;  %s3835_s24 = scalar_lea.vmem %s2998_s19, 128  ;;  %s5259_s23 = int_to_ptr.vmem [resolvable:$true] %s2984_s23 }
  0x3c   :  { %3159 = vmatprep.subr.mxu0 %v5286_v0  ;;  %3170 = vmatprep.subr.mxu1 %v5286_v0  ;;  %v87_v36 = vld [vmem:[#allocation3] sm:$0xff]  ;;  %p3836_p6 = scmp.ne.s32.totalorder %s2998_s19, %s3835_s24  ;;  %p3840_p7 = scmp.lt.s32.totalorder %s2998_s19, %s2998_s19 }
  0x3d   :  { %3146 = vmatmul.mubr.msk.f32.vlgmr.msra.gmra.mxu0 %vm78_vm1, %v86_v6  ;;  %v252_v39 = vrot.slane %v87_v36, 2  ;;  %v253_v41 = vrot.slane %v87_v36, 3  ;;  %v254_v43 = vrot.slane %v87_v36, 4  ;;  %v251_v45 = vrot.slane %v87_v36, 1  ;;  %p3841_p8 = scmp.lt.s32.totalorder %s3835_s24, %s3835_s24 }
  0x3e   :  { %3160 = vmatpush3.msra.mxu0 %v3978_v1  ;;  %3167 = vmatprep.mubr.msk.f32.mxu0 %vm3912_vm0, %v5286_v0  ;;  %v255_v46 = vrot.slane %v87_v36, 5  ;;  %v256_v47 = vrot.slane %v87_v36, 6  ;;  %v257_v48 = vrot.slane %v87_v36, 7 }
  0x3f   :  { %3161 = vmatprep.subr.mxu0 %v5286_v0  ;;  %p3842_p9 = por %p3841_p8, %p3840_p7 }
  0x40   :  { %3162 = vmatpush3.msra.mxu0 %v3980_v2 }
  0x41   :  { %3163 = vmatprep.subr.mxu0 %v5286_v0  ;;  %p3843_p10 = pnand %p3842_p9, %p3836_p6 }
  0x42   :  { %3164 = vmatpush3.msra.mxu0 %v3985_v4 }
  0x43   :  { %3165 = vmatprep.subr.mxu0 %v5286_v0 }
  0x44   :  { %3166 = vmatpush3.msra.mxu0 %v3992_v5 }
  0x45   :  { %3181 = vmatprep.subr.mxu0 %v5286_v0 }
  0xfd   :  { %v166_v9 = vpop.f32.mrf.mxu0 }
  0xfe   :  { %v173_v11 = vrot.slane %v166_v9, 3  ;;  %v186_v13 = vadd.f32 %v166_v9, %v88_v8  ;;  %v175_v15 = vrot.slane %v166_v9, 5  ;;  %v177_v17 = vrot.slane %v166_v9, 7 }
  0xff   :  { %v3147_v12 = vpop.f32.mrf.mxu0  ;;  %v171_v20 = vrot.slane %v166_v9, 1  ;;  %v172_v23 = vrot.slane %v166_v9, 2  ;;  %v174_v27 = vrot.slane %v166_v9, 4  ;;  %v176_v31 = vrot.slane %v166_v9, 6 }
 0x100   :  { %v189_v14 = vadd.f32 %v173_v11, %v91_v10  ;;  %3239 = vtanh.f32 %v186_v13  ;;  %v4015_v19 = vadd.f32 %v175_v15, %v93_v16  ;;  %v4017_v22 = vadd.f32 %v177_v17, %v95_v18 }
 0x101   :  { %v187_v24 = vadd.f32 %v171_v20, %v89_v21  ;;  %v188_v28 = vadd.f32 %v172_v23, %v90_v25  ;;  %v190_v32 = vadd.f32 %v174_v27, %v92_v29  ;;  %v192_v34 = vadd.f32 %v176_v31, %v94_v33 }
 0x102   :  { %3241 = vtanh.f32 %v189_v14  ;;  %v3026_v49 = vmul.f32 -1.442695, %v186_v13  ;;  %v3029_v50 = vmul.f32 -1.442695, %v189_v14  ;;  %v3031_v58 = vmul.f32 -1.442695, %v4015_v19 }
 0x103   :  { %3243 = vtanh.f32 %v4015_v19  ;;  %v3027_v51 = vmul.f32 -1.442695, %v187_v24  ;;  %v3028_v53 = vmul.f32 -1.442695, %v188_v28  ;;  %v3030_v56 = vmul.f32 -1.442695, %v190_v32 }
 0x104   :  { %3245 = vtanh.f32 %v4017_v22  ;;  %v3032_v59 = vmul.f32 -1.442695, %v192_v34  ;;  %v3033_v60 = vmul.f32 -1.442695, %v4017_v22 }
 0x105   :  { %3247 = vtanh.f32 %v187_v24 }
 0x106   :  { %3249 = vtanh.f32 %v188_v28 }
 0x107   :  { %3251 = vtanh.f32 %v190_v32 }
 0x108   :  { %3253 = vtanh.f32 %v192_v34 }
 0x109   :  { %3255 = vpow2.f32 %v3026_v49 }
 0x10a   :  { %3257 = vpow2.f32 %v3029_v50 }
 0x10b   :  { %3259 = vpow2.f32 %v3027_v51 }
 0x10c   :  { %3261 = vpow2.f32 %v3028_v53 }
 0x10d   :  { %v3240_v26 = vpop.eup %3239 }
 0x10e   :  { %298 = vrot.lane.b32.xlu1 %v3240_v26, %s3913_s2 }
 0x10f   :  { %v3242_v30 = vpop.eup %3241 }
 0x110   :  { %v3244_v35 = vpop.eup %3243 }
 0x111   :  { %v3246_v37 = vpop.eup %3245 }
 0x112   :  { %304 = vrot.lane.b32.xlu1 %v3242_v30, %s3913_s2  ;;  %v3248_v38 = vpop.eup %3247 }
 0x113   :  { %300 = vrot.lane.b32.xlu0 %v3248_v38, %s3913_s2  ;;  %v3250_v40 = vpop.eup %3249 }
 0x114   :  { %v3252_v42 = vpop.eup %3251 }
 0x115   :  { %v3254_v44 = vpop.eup %3253 }
 0x116   :  { %308 = vrot.lane.b32.xlu1 %v3244_v35, %s3913_s2  ;;  %v3256_v52 = vpop.eup %3255 }
 0x117   :  { %302 = vrot.lane.b32.xlu0 %v3250_v40, %s3913_s2  ;;  %v218_v54 = vadd.f32 1.0, %v3256_v52  ;;  %v3258_v55 = vpop.eup %3257 }
 0x118   :  { %v221_v57 = vadd.f32 1.0, %v3258_v55  ;;  %v3260_v61 = vpop.eup %3259 }
 0x119   :  { %3263 = vrcp.f32 %v218_v54  ;;  %v219_v62 = vadd.f32 1.0, %v3260_v61  ;;  %v3262_v63 = vpop.eup %3261 }
 0x11a   :  { %312 = vrot.lane.b32.xlu1 %v3246_v37, %s3913_s2  ;;  %3265 = vpow2.f32 %v3030_v56  ;;  %v220_v7 = vadd.f32 1.0, %v3262_v63 }
 0x11b   :  { %306 = vrot.lane.b32.xlu0 %v3252_v42, %s3913_s2  ;;  %3267 = vrcp.f32 %v221_v57 }
 0x11c   :  { %3269 = vpow2.f32 %v3031_v58 }
 0x11d   :  { %3271 = vpow2.f32 %v3032_v59 }
 0x11e   :  { %262 = vrot.lane.b32.xlu1 %v252_v39, %s3914_s3  ;;  %3273 = vpow2.f32 %v3033_v60 }
 0x11f   :  { %310 = vrot.lane.b32.xlu0 %v3254_v44, %s3913_s2  ;;  %3275 = vrcp.f32 %v219_v62 }
 0x120   :  { %3277 = vrcp.f32 %v220_v7 }
 0x122   :  { %264 = vrot.lane.b32.xlu1 %v253_v41, %s3914_s3 }
 0x123   :  { %260 = vrot.lane.b32.xlu0 %v251_v45, %s3914_s3 }
 0x126   :  { %266 = vrot.lane.b32.xlu1 %v254_v43, %s3914_s3  ;;  %v4039_v3 = vpop.eup %3263 }
 0x127   :  { %258 = vrot.lane.b32.xlu0 %v87_v36, %s3914_s3  ;;  %v3266_v9 = vpop.eup %3265 }
 0x128   :  { %v4043_v10 = vpop.eup %3267  ;;  %v222_v13 = vadd.f32 1.0, %v3266_v9 }
 0x129   :  { %v3270_v12 = vpop.eup %3269 }
 0x12a   :  { %268 = vrot.lane.b32.xlu1 %v255_v46, %s3914_s3  ;;  %v3272_v15 = vpop.eup %3271  ;;  %v223_v16 = vadd.f32 1.0, %v3270_v12  ;;  %3279 = vrcp.f32 %v222_v13 }
 0x12b   :  { %270 = vrot.lane.b32.xlu0 %v256_v47, %s3914_s3  ;;  %v224_v17 = vadd.f32 1.0, %v3272_v15  ;;  %v3274_v18 = vpop.eup %3273 }
 0x12c   :  { %3281 = vrcp.f32 %v223_v16  ;;  %v225_v19 = vadd.f32 1.0, %v3274_v18  ;;  %v4047_v20 = vpop.eup %3275 }
 0x12d   :  { %3283 = vrcp.f32 %v224_v17  ;;  %v4051_v23 = vpop.eup %3277 }
 0x12e   :  { %3285 = vrcp.f32 %v225_v19 }
 0x12f   :  { %272 = vrot.lane.b32.xlu0 %v257_v48, %s3914_s3 }
 0x137   :  { %v4055_v26 = vpop.eup %3279 }
 0x139   :  { %v4058_v30 = vpop.eup %3281 }
 0x13a   :  { %v4061_v31 = vpop.eup %3283 }
 0x13b   :  { %v4067_v36 = vpop.eup %3285 }
 0x180   :  { %v299_v6 = vpop.permute.xlu1 %298 }
 0x181   :  { %v322_v8 = vmul.f32 %v4039_v3, %v299_v6 }
 0x183   :  { %338 = vrot.lane.b32.xlu0 %v322_v8, %s3914_s3 }
 0x184   :  { %v305_v11 = vpop.permute.xlu1 %304 }
 0x185   :  { %v325_v14 = vmul.f32 %v4043_v10, %v305_v11  ;;  %v301_v21 = vpop.permute.xlu0 %300 }
 0x186   :  { %v323_v22 = vmul.f32 %v4047_v20, %v301_v21 }
 0x187   :  { %344 = vrot.lane.b32.xlu1 %v325_v14, %s3914_s3 }
 0x188   :  { %340 = vrot.lane.b32.xlu0 %v323_v22, %s3914_s3  ;;  %v309_v27 = vpop.permute.xlu1 %308 }
 0x189   :  { %v303_v24 = vpop.permute.xlu0 %302  ;;  %v327_v33 = vmul.f32 %v4058_v30, %v309_v27 }
 0x18a   :  { %v324_v25 = vmul.f32 %v4051_v23, %v303_v24 }
 0x18c   :  { %342 = vrot.lane.b32.xlu0 %v324_v25, %s3914_s3  ;;  %v313_v35 = vpop.permute.xlu1 %312 }
 0x18d   :  { %v307_v28 = vpop.permute.xlu0 %306  ;;  %v329_v37 = vmul.f32 %v4067_v36, %v313_v35 }
 0x18e   :  { %v326_v29 = vmul.f32 %v4055_v26, %v307_v28 }
 0x190   :  { %346 = vrot.lane.b32.xlu1 %v326_v29, %s3914_s3  ;;  %v263_v41 = vpop.permute.xlu1 %262 }
 0x191   :  { %v311_v32 = vpop.permute.xlu0 %310  ;;  %v284_v53 = vmul.f32 %v4051_v23, %v263_v41 }
 0x192   :  { %v328_v34 = vmul.f32 %v4061_v31, %v311_v32 }
 0x194   :  { %348 = vrot.lane.b32.xlu1 %v327_v33, %s3914_s3  ;;  %350 = vrot.lane.b32.xlu0 %v328_v34, %s3914_s3  ;;  %v265_v45 = vpop.permute.xlu1 %264 }
 0x195   :  { %v261_v38 = vpop.permute.xlu0 %260  ;;  %v285_v55 = vmul.f32 %v4043_v10, %v265_v45 }
 0x196   :  { %v283_v48 = vmul.f32 %v4047_v20, %v261_v38 }
 0x198   :  { %352 = vrot.lane.b32.xlu1 %v329_v37, %s3914_s3  ;;  %v267_v47 = vpop.permute.xlu1 %266 }
 0x199   :  { %v259_v39 = vpop.permute.xlu0 %258  ;;  %v286_v59 = vmul.f32 %v4055_v26, %v267_v47 }
 0x19a   :  { %v282_v43 = vmul.f32 %v4039_v3, %v259_v39 }
 0x19c   :  { %v269_v49 = vpop.permute.xlu1 %268 }
 0x19d   :  { %v271_v40 = vpop.permute.xlu0 %270  ;;  %v287_v63 = vmul.f32 %v4058_v30, %v269_v49 }
 0x19e   :  { %v288_v62 = vmul.f32 %v4061_v31, %v271_v40 }
 0x1a1   :  { %v273_v42 = vpop.permute.xlu0 %272 }
 0x1a2   :  { %v289_v11 = vmul.f32 %v4067_v36, %v273_v42 }
 0x1f5   :  { %v339_v44 = vpop.permute.xlu0 %338 }
 0x1f6   :  { %v4072_v46 = vadd.f32 %v339_v44, %v282_v43 }
 0x1f8   :  { %3287 = vtanh.f32 %v4072_v46 }
 0x1f9   :  { %v345_v54 = vpop.permute.xlu1 %344 }
 0x1fa   :  { %v341_v50 = vpop.permute.xlu0 %340  ;;  %v4084_v58 = vadd.f32 %v345_v54, %v285_v55 }
 0x1fb   :  { %v4076_v51 = vadd.f32 %v341_v50, %v283_v48 }
 0x1fd   :  { %3289 = vtanh.f32 %v4076_v51 }
 0x1fe   :  { %v343_v56 = vpop.permute.xlu0 %342 }
 0x1ff   :  { %v4082_v57 = vadd.f32 %v343_v56, %v284_v53 }
 0x201   :  { %3291 = vtanh.f32 %v4082_v57 }
 0x202   :  { %v347_v60 = vpop.permute.xlu1 %346  ;;  %3293 = vtanh.f32 %v4084_v58 }
 0x203   :  { %v4088_v61 = vadd.f32 %v347_v60, %v286_v59  ;;  %v460_v59 = vld [vmem:[#allocation4 + $0x9] sm:$0x1] }
 0x205   :  { %v3288_v52 = vpop.eup %3287  ;;  %3295 = vtanh.f32 %v4088_v61 }
 0x206   :  { %386 = vrot.lane.b32.xlu0 %v3288_v52, %s3913_s2  ;;  %v349_v6 = vpop.permute.xlu1 %348  ;;  %v351_v7 = vpop.permute.xlu0 %350 }
 0x207   :  { %v4094_v8 = vadd.f32 %v349_v6, %v287_v63  ;;  %v4096_v9 = vadd.f32 %v351_v7, %v288_v62  ;;  %v461_v62 = vld [vmem:[#allocation4 + $0x11] sm:$0x1]  ;;  %v463_v7 = vld [vmem:[#allocation4 + $0x21] sm:$0x1] }
 0x209   :  { %3297 = vtanh.f32 %v4094_v8 }
 0x20a   :  { %v3290_v12 = vpop.eup %3289  ;;  %3299 = vtanh.f32 %v4096_v9  ;;  %v353_v13 = vpop.permute.xlu1 %352 }
 0x20b   :  { %v4101_v14 = vadd.f32 %v353_v13, %v289_v11  ;;  %388 = vrot.lane.b32.xlu0 %v3290_v12, %s3913_s2  ;;  %v462_v13 = vld [vmem:[#allocation4 + $0x19] sm:$0x1] }
 0x20d   :  { %3301 = vtanh.f32 %v4101_v14 }
 0x20e   :  { %v3292_v15 = vpop.eup %3291 }
 0x20f   :  { %390 = vrot.lane.b32.xlu1 %v3292_v15, %s3913_s2  ;;  %v3294_v16 = vpop.eup %3293 }
 0x212   :  { %v3296_v17 = vpop.eup %3295 }
 0x213   :  { %394 = vrot.lane.b32.xlu0 %v3296_v17, %s3913_s2  ;;  %392 = vrot.lane.b32.xlu1 %v3294_v16, %s3913_s2  ;;  %v465_v17 = vld [vmem:[#allocation4 + $0x31] sm:$0x1] }
 0x216   :  { %v3298_v18 = vpop.eup %3297 }
 0x217   :  { %v3300_v19 = vpop.eup %3299  ;;  %396 = vrot.lane.b32.xlu1 %v3298_v18, %s3913_s2 }
 0x218   :  { %398 = vrot.lane.b32.xlu0 %v3300_v19, %s3913_s2 }
 0x21a   :  { %v3302_v21 = vpop.eup %3301 }
 0x21b   :  { %400 = vrot.lane.b32.xlu1 %v3302_v21, %s3913_s2  ;;  %v464_v21 = vld [vmem:[#allocation4 + $0x29] sm:$0x1] }
 0x278   :  { %v387_v22 = vpop.permute.xlu0 %386 }
 0x279   :  { %v4120_v35 = vmul.f32 %v4039_v3, %v387_v22 }
 0x27d   :  { %v389_v24 = vpop.permute.xlu0 %388 }
 0x27e   :  { %v4112_v25 = vmul.f32 %v4047_v20, %v389_v24 }
 0x280   :  { %v467_v29 = vrot.slane %v4112_v25, 7 }
 0x281   :  { %v391_v27 = vpop.permute.xlu1 %390 }
 0x282   :  { %v4115_v28 = vmul.f32 %v4051_v23, %v391_v27  ;;  %v469_v23 = vsel %vm468_vm2, %v467_v29, %v4120_v35 }
 0x284   :  { %v470_v32 = vrot.slane %v4115_v28, 6 }
 0x285   :  { %v395_v33 = vpop.permute.xlu0 %394  ;;  %v393_v34 = vpop.permute.xlu1 %392 }
 0x286   :  { %v4123_v37 = vmul.f32 %v4043_v10, %v393_v34  ;;  %v4126_v20 = vmul.f32 %v4055_v26, %v395_v33  ;;  %v472_v39 = vsel %vm471_vm3, %v470_v32, %v469_v23  ;;  %v466_v32 = vld [vmem:[#allocation4 + $0x39] sm:$0x1] }
 0x288   :  { %v473_v38 = vrot.slane %v4123_v37, 5  ;;  %v476_v10 = vrot.slane %v4126_v20, 4 }
 0x289   :  { %v397_v40 = vpop.permute.xlu1 %396 }
 0x28a   :  { %v475_v41 = vsel %vm474_vm4, %v473_v38, %v472_v39  ;;  %v399_v3 = vpop.permute.xlu0 %398  ;;  %v4134_v42 = vmul.f32 %v4058_v30, %v397_v40 }
 0x28b   :  { %v4138_v26 = vmul.f32 %v4061_v31, %v399_v3  ;;  %v478_v45 = vsel %vm477_vm5, %v476_v10, %v475_v41 }
 0x28c   :  { %v479_v43 = vrot.slane %v4134_v42, 3 }
 0x28d   :  { %v401_v44 = vpop.permute.xlu1 %400  ;;  %v482_v30 = vrot.slane %v4138_v26, 2 }
 0x28e   :  { %v4143_v47 = vmul.f32 %v4067_v36, %v401_v44  ;;  %v481_v48 = vsel %vm480_vm6, %v479_v43, %v478_v45  ;;  %v459_v36 = vld [vmem:[#allocation4 + $0x1] sm:$0x1] }
 0x28f   :  { %v484_v31 = vsel %vm483_vm7, %v482_v30, %v481_v48 }
 0x290   :  { %v485_v49 = vrot.slane %v4143_v47, 1 }
 0x292   :  { %v487_v50 = vsel %vm486_vm8, %v485_v49, %v484_v31 }
 0x293   :  { %488 = vrot.lane.b32.xlu0 %v487_v50, %s3914_s3 }
 0x305   :  { %v489_v52 = vpop.permute.xlu0 %488 }
 0x306   :  { %3157 = vmatmul.mubr.msk.f32.vlgmr.msra.gmra.mxu1 %vm78_vm1, %v489_v52 }
 0x307   :  { %3171 = vmatpush3.msra.mxu1 %v3978_v1  ;;  %3178 = vmatprep.mubr.msk.f32.mxu1 %vm3912_vm0, %v5286_v0 }
 0x308   :  { %3172 = vmatprep.subr.mxu1 %v5286_v0 }
 0x309   :  { %3173 = vmatpush3.msra.mxu1 %v3980_v2 }
 0x30a   :  { %3174 = vmatprep.subr.mxu1 %v5286_v0 }
 0x30b   :  { %3175 = vmatpush3.msra.mxu1 %v3985_v4 }
 0x30c   :  { %3176 = vmatprep.subr.mxu1 %v5286_v0 }
 0x30d   :  { %3177 = vmatpush3.msra.mxu1 %v3992_v5 }
 0x30e   :  { %3192 = vmatprep.subr.mxu1 %v5286_v0 }
 0x3c6   :  { %v558_v53 = vpop.f32.mrf.mxu1 }
 0x3c7   :  { %v578_v54 = vadd.f32 %v558_v53, %v459_v36  ;;  %v563_v56 = vrot.slane %v558_v53, 1  ;;  %v564_v60 = vrot.slane %v558_v53, 2  ;;  %v566_v63 = vrot.slane %v558_v53, 4 }
 0x3c8   :  { %v3158_v55 = vpop.f32.mrf.mxu1  ;;  %v565_v11 = vrot.slane %v558_v53, 3  ;;  %v568_v15 = vrot.slane %v558_v53, 6  ;;  %v567_v18 = vrot.slane %v558_v53, 5  ;;  %v569_v27 = vrot.slane %v558_v53, 7 }
 0x3c9   :  { %3303 = vtanh.f32 %v578_v54  ;;  %v579_v6 = vadd.f32 %v563_v56, %v460_v59  ;;  %v580_v12 = vadd.f32 %v564_v60, %v461_v62  ;;  %v582_v16 = vadd.f32 %v566_v63, %v463_v7 }
 0x3ca   :  { %v581_v19 = vadd.f32 %v565_v11, %v462_v13  ;;  %v584_v24 = vadd.f32 %v568_v15, %v465_v17  ;;  %v583_v29 = vadd.f32 %v567_v18, %v464_v21  ;;  %v585_v33 = vadd.f32 %v569_v27, %v466_v32 }
 0x3cb   :  { %3305 = vtanh.f32 %v579_v6  ;;  %v3035_v10 = vmul.f32 -1.442695, %v578_v54  ;;  %v3036_v43 = vmul.f32 -1.442695, %v579_v6  ;;  %v3037_v44 = vmul.f32 -1.442695, %v580_v12 }
 0x3cc   :  { %3307 = vtanh.f32 %v580_v12  ;;  %v3039_v45 = vmul.f32 -1.442695, %v582_v16  ;;  %v3038_v48 = vmul.f32 -1.442695, %v581_v19  ;;  %v3041_v49 = vmul.f32 -1.442695, %v584_v24 }
 0x3cd   :  { %3309 = vtanh.f32 %v582_v16  ;;  %v3040_v31 = vmul.f32 -1.442695, %v583_v29  ;;  %v3042_v52 = vmul.f32 -1.442695, %v585_v33 }
 0x3ce   :  { %3311 = vtanh.f32 %v581_v19 }
 0x3cf   :  { %3313 = vtanh.f32 %v584_v24 }
 0x3d0   :  { %3315 = vtanh.f32 %v583_v29 }
 0x3d1   :  { %3317 = vtanh.f32 %v585_v33 }
 0x3d2   :  { %3319 = vpow2.f32 %v3035_v10 }
 0x3d3   :  { %3321 = vpow2.f32 %v3036_v43 }
 0x3d4   :  { %3323 = vpow2.f32 %v3037_v44 }
 0x3d5   :  { %3325 = vpow2.f32 %v3039_v45 }
 0x3d6   :  { %v3304_v22 = vpop.eup %3303  ;;  %3327 = vpow2.f32 %v3038_v48 }
 0x3d7   :  { %658 = vrot.lane.b32.xlu1 %v3304_v22, %s3913_s2  ;;  %3329 = vpow2.f32 %v3041_v49 }
 0x3d8   :  { %v3306_v34 = vpop.eup %3305  ;;  %3331 = vpow2.f32 %v3040_v31 }
 0x3d9   :  { %v3308_v23 = vpop.eup %3307 }
 0x3da   :  { %662 = vrot.lane.b32.xlu0 %v3308_v23, %s3913_s2  ;;  %v3310_v38 = vpop.eup %3309 }
 0x3db   :  { %660 = vrot.lane.b32.xlu1 %v3306_v34, %s3913_s2  ;;  %v3312_v39 = vpop.eup %3311 }
 0x3dc   :  { %v3314_v40 = vpop.eup %3313 }
 0x3dd   :  { %v3316_v41 = vpop.eup %3315 }
 0x3de   :  { %664 = vrot.lane.b32.xlu0 %v3312_v39, %s3913_s2  ;;  %v3318_v3 = vpop.eup %3317 }
 0x3df   :  { %666 = vrot.lane.b32.xlu1 %v3310_v38, %s3913_s2  ;;  %v3320_v30 = vpop.eup %3319 }
 0x3e0   :  { %v610_v50 = vadd.f32 1.0, %v3320_v30  ;;  %v3322_v36 = vpop.eup %3321 }
 0x3e1   :  { %v3324_v53 = vpop.eup %3323  ;;  %v611_v54 = vadd.f32 1.0, %v3322_v36 }
 0x3e2   :  { %668 = vrot.lane.b32.xlu0 %v3316_v41, %s3913_s2  ;;  %3333 = vrcp.f32 %v610_v50  ;;  %v3326_v55 = vpop.eup %3325  ;;  %v612_v56 = vadd.f32 1.0, %v3324_v53 }
 0x3e3   :  { %670 = vrot.lane.b32.xlu1 %v3314_v40, %s3913_s2  ;;  %3335 = vpow2.f32 %v3042_v52  ;;  %v3328_v59 = vpop.eup %3327  ;;  %v614_v60 = vadd.f32 1.0, %v3326_v55 }
 0x3e4   :  { %3337 = vrcp.f32 %v611_v54  ;;  %v3330_v62 = vpop.eup %3329  ;;  %v613_v63 = vadd.f32 1.0, %v3328_v59 }
 0x3e5   :  { %3339 = vrcp.f32 %v612_v56  ;;  %v3332_v6 = vpop.eup %3331  ;;  %v616_v11 = vadd.f32 1.0, %v3330_v62 }
 0x3e6   :  { %672 = vrot.lane.b32.xlu0 %v3318_v3, %s3913_s2  ;;  %3341 = vrcp.f32 %v614_v60  ;;  %v615_v13 = vadd.f32 1.0, %v3332_v6 }
 0x3e7   :  { %3343 = vrcp.f32 %v613_v63 }
 0x3e8   :  { %3345 = vrcp.f32 %v616_v11 }
 0x3e9   :  { %3347 = vrcp.f32 %v615_v13 }
 0x3ef   :  { %v4170_v7 = vpop.eup %3333 }
 0x3f0   :  { %v3336_v16 = vpop.eup %3335  ;;  %v642_v30 = vmul.f32 %v4170_v7, %v4072_v46 }
 0x3f1   :  { %v617_v17 = vadd.f32 1.0, %v3336_v16  ;;  %v4174_v18 = vpop.eup %3337 }
 0x3f2   :  { %v4176_v21 = vpop.eup %3339  ;;  %v643_v50 = vmul.f32 %v4174_v18, %v4076_v51 }
 0x3f3   :  { %3349 = vrcp.f32 %v617_v17  ;;  %v4181_v29 = vpop.eup %3341  ;;  %v644_v52 = vmul.f32 %v4176_v21, %v4082_v57 }
 0x3f4   :  { %v4184_v33 = vpop.eup %3343  ;;  %v646_v46 = vmul.f32 %v4181_v29, %v4088_v61 }
 0x3f5   :  { %v4189_v39 = vpop.eup %3345  ;;  %v645_v56 = vmul.f32 %v4184_v33, %v4084_v58 }
 0x3f6   :  { %v4192_v41 = vpop.eup %3347  ;;  %v648_v63 = vmul.f32 %v4189_v39, %v4096_v9 }
 0x3f7   :  { %v647_v61 = vmul.f32 %v4192_v41, %v4094_v8 }
 0x400   :  { %v4198_v44 = vpop.eup %3349 }
 0x401   :  { %v649_v9 = vmul.f32 %v4198_v44, %v4101_v14 }
 0x449   :  { %v659_v12 = vpop.permute.xlu1 %658 }
 0x44a   :  { %v682_v15 = vmul.f32 %v4170_v7, %v659_v12 }
 0x44c   :  { %698 = vrot.lane.b32.xlu1 %v682_v15, %s3914_s3  ;;  %v663_v22 = vpop.permute.xlu0 %662 }
 0x44d   :  { %v661_v19 = vpop.permute.xlu1 %660  ;;  %v684_v27 = vmul.f32 %v4176_v21, %v663_v22 }
 0x44e   :  { %v683_v24 = vmul.f32 %v4174_v18, %v661_v19 }
 0x44f   :  { %702 = vrot.lane.b32.xlu0 %v684_v27, %s3914_s3 }
 0x450   :  { %700 = vrot.lane.b32.xlu1 %v683_v24, %s3914_s3  ;;  %v665_v34 = vpop.permute.xlu0 %664 }
 0x451   :  { %v667_v32 = vpop.permute.xlu1 %666  ;;  %v685_v38 = vmul.f32 %v4184_v33, %v665_v34 }
 0x452   :  { %v686_v23 = vmul.f32 %v4181_v29, %v667_v32 }
 0x453   :  { %704 = vrot.lane.b32.xlu0 %v685_v38, %s3914_s3 }
 0x454   :  { %706 = vrot.lane.b32.xlu1 %v686_v23, %s3914_s3  ;;  %v669_v3 = vpop.permute.xlu0 %668 }
 0x455   :  { %v671_v40 = vpop.permute.xlu1 %670  ;;  %v687_v43 = vmul.f32 %v4192_v41, %v669_v3 }
 0x456   :  { %v688_v10 = vmul.f32 %v4189_v39, %v671_v40 }
 0x457   :  { %708 = vrot.lane.b32.xlu0 %v687_v43, %s3914_s3 }
 0x458   :  { %710 = vrot.lane.b32.xlu1 %v688_v10, %s3914_s3  ;;  %v673_v45 = vpop.permute.xlu0 %672 }
 0x459   :  { %v689_v48 = vmul.f32 %v4198_v44, %v673_v45 }
 0x45b   :  { %712 = vrot.lane.b32.xlu0 %v689_v48, %s3914_s3 }
 0x4be   :  { %v699_v49 = vpop.permute.xlu1 %698 }
 0x4bf   :  { %v4204_v31 = vadd.f32 %v699_v49, %v642_v30 }
 0x4c1   :  { %3351 = vtanh.f32 %v4204_v31  ;;  %v703_v53 = vpop.permute.xlu0 %702 }
 0x4c2   :  { %v701_v36 = vpop.permute.xlu1 %700  ;;  %v4213_v55 = vadd.f32 %v703_v53, %v644_v52 }
 0x4c3   :  { %v4211_v54 = vadd.f32 %v701_v36, %v643_v50 }
 0x4c5   :  { %3353 = vtanh.f32 %v4211_v54  ;;  %v705_v59 = vpop.permute.xlu0 %704 }
 0x4c6   :  { %3355 = vtanh.f32 %v4213_v55  ;;  %v707_v51 = vpop.permute.xlu1 %706  ;;  %v4223_v57 = vadd.f32 %v705_v59, %v645_v56 }
 0x4c7   :  { %v4221_v60 = vadd.f32 %v707_v51, %v646_v46 }
 0x4c9   :  { %3357 = vtanh.f32 %v4221_v60  ;;  %v709_v58 = vpop.permute.xlu0 %708 }
 0x4ca   :  { %3359 = vtanh.f32 %v4223_v57  ;;  %v711_v6 = vpop.permute.xlu1 %710  ;;  %v4234_v12 = vadd.f32 %v709_v58, %v647_v61 }
 0x4cb   :  { %v4232_v11 = vadd.f32 %v711_v6, %v648_v63 }
 0x4cd   :  { %3361 = vtanh.f32 %v4232_v11  ;;  %v713_v13 = vpop.permute.xlu0 %712 }
 0x4ce   :  { %v3352_v62 = vpop.eup %3351  ;;  %3363 = vtanh.f32 %v4234_v12  ;;  %v4240_v15 = vadd.f32 %v713_v13, %v649_v9  ;;  %v819_v13 = vld [vmem:[#allocation4 + $0xa] sm:$0x1] }
 0x4cf   :  { %746 = vrot.lane.b32.xlu1 %v3352_v62, %s3913_s2 }
 0x4d0   :  { %3365 = vtanh.f32 %v4240_v15 }
 0x4d2   :  { %v3354_v16 = vpop.eup %3353 }
 0x4d3   :  { %v3356_v8 = vpop.eup %3355  ;;  %748 = vrot.lane.b32.xlu1 %v3354_v16, %s3913_s2 }
 0x4d4   :  { %750 = vrot.lane.b32.xlu0 %v3356_v8, %s3913_s2  ;;  %v820_v8 = vld [vmem:[#allocation4 + $0x12] sm:$0x1] }
 0x4d6   :  { %v3358_v17 = vpop.eup %3357 }
 0x4d7   :  { %v3360_v19 = vpop.eup %3359  ;;  %754 = vrot.lane.b32.xlu1 %v3358_v17, %s3913_s2 }
 0x4d8   :  { %752 = vrot.lane.b32.xlu0 %v3360_v19, %s3913_s2  ;;  %v822_v19 = vld [vmem:[#allocation4 + $0x22] sm:$0x1] }
 0x4da   :  { %v3362_v22 = vpop.eup %3361 }
 0x4db   :  { %v3364_v24 = vpop.eup %3363  ;;  %758 = vrot.lane.b32.xlu1 %v3362_v22, %s3913_s2 }
 0x4dc   :  { %756 = vrot.lane.b32.xlu0 %v3364_v24, %s3913_s2  ;;  %v821_v24 = vld [vmem:[#allocation4 + $0x1a] sm:$0x1] }
 0x4dd   :  { %v3366_v14 = vpop.eup %3365 }
 0x4e0   :  { %760 = vrot.lane.b32.xlu0 %v3366_v14, %s3913_s2 }
 0x541   :  { %v747_v27 = vpop.permute.xlu1 %746 }
 0x542   :  { %v4257_v40 = vmul.f32 %v4170_v7, %v747_v27 }
 0x545   :  { %v749_v32 = vpop.permute.xlu1 %748 }
 0x546   :  { %v751_v34 = vpop.permute.xlu0 %750  ;;  %v4251_v23 = vmul.f32 %v4174_v18, %v749_v32 }
 0x547   :  { %v4254_v38 = vmul.f32 %v4176_v21, %v751_v34 }
 0x548   :  { %v826_v3 = vrot.slane %v4251_v23, 7 }
 0x549   :  { %v755_v10 = vpop.permute.xlu1 %754  ;;  %v828_v43 = vrot.slane %v4254_v38, 6 }
 0x54a   :  { %v827_v45 = vsel %vm468_vm2, %v826_v3, %v4257_v40  ;;  %v753_v48 = vpop.permute.xlu0 %752  ;;  %v4264_v30 = vmul.f32 %v4181_v29, %v755_v10  ;;  %v823_v3 = vld [vmem:[#allocation4 + $0x2a] sm:$0x1] }
 0x54b   :  { %v4267_v18 = vmul.f32 %v4184_v33, %v753_v48  ;;  %v829_v21 = vsel %vm471_vm3, %v828_v43, %v827_v45 }
 0x54c   :  { %v832_v7 = vrot.slane %v4264_v30, 4 }
 0x54d   :  { %v830_v49 = vrot.slane %v4267_v18, 5  ;;  %v759_v50 = vpop.permute.xlu1 %758 }
 0x54e   :  { %v757_v52 = vpop.permute.xlu0 %756  ;;  %v4273_v36 = vmul.f32 %v4189_v39, %v759_v50 }
 0x54f   :  { %v831_v53 = vsel %vm474_vm4, %v830_v49, %v829_v21  ;;  %v4277_v46 = vmul.f32 %v4192_v41, %v757_v52  ;;  %v825_v21 = vld [vmem:[#allocation4 + $0x3a] sm:$0x1] }
 0x550   :  { %v833_v29 = vsel %vm477_vm5, %v832_v7, %v831_v53  ;;  %v836_v33 = vrot.slane %v4273_v36, 2 }
 0x551   :  { %v834_v56 = vrot.slane %v4277_v46, 3 }
 0x552   :  { %v761_v51 = vpop.permute.xlu0 %760 }
 0x553   :  { %v4283_v59 = vmul.f32 %v4198_v44, %v761_v51  ;;  %v835_v62 = vsel %vm480_vm6, %v834_v56, %v833_v29  ;;  %v818_v44 = vld [vmem:[#allocation4 + $0x2] sm:$0x1] }
 0x554   :  { %v837_v39 = vsel %vm483_vm7, %v836_v33, %v835_v62 }
 0x555   :  { %v838_v63 = vrot.slane %v4283_v59, 1 }
 0x557   :  { %v839_v61 = vsel %vm486_vm8, %v838_v63, %v837_v39 }
 0x558   :  { %840 = vrot.lane.b32.xlu1 %v839_v61, %s3914_s3 }
 0x5ca   :  { %v841_v41 = vpop.permute.xlu1 %840 }
 0x5cb   :  { %3168 = vmatmul.mubr.msk.f32.vlgmr.msra.gmra.mxu0 %vm78_vm1, %v841_v41 }
 0x5cc   :  { %3182 = vmatpush3.msra.mxu0 %v3978_v1  ;;  %3189 = vmatprep.mubr.msk.f32.mxu0 %vm3912_vm0, %v5286_v0 }
 0x5cd   :  { %3183 = vmatprep.subr.mxu0 %v5286_v0 }
 0x5ce   :  { %3184 = vmatpush3.msra.mxu0 %v3980_v2 }
 0x5cf   :  { %3185 = vmatprep.subr.mxu0 %v5286_v0 }
 0x5d0   :  { %3186 = vmatpush3.msra.mxu0 %v3985_v4 }
 0x5d1   :  { %3187 = vmatprep.subr.mxu0 %v5286_v0 }
 0x5d2   :  { %3188 = vmatpush3.msra.mxu0 %v3992_v5  ;;  %v824_v5 = vld [vmem:[#allocation4 + $0x32] sm:$0x1] }
 0x5d3   :  { %3203 = vmatprep.subr.mxu0 %v5286_v0 }
 0x68b   :  { %v910_v6 = vpop.f32.mrf.mxu0 }
 0x68c   :  { %v930_v1 = vadd.f32 %v910_v6, %v818_v44  ;;  %v915_v9 = vrot.slane %v910_v6, 1  ;;  %v916_v16 = vrot.slane %v910_v6, 2  ;;  %v918_v2 = vrot.slane %v910_v6, 4 }
 0x68d   :  { %v3169_v58 = vpop.f32.mrf.mxu0  ;;  %v917_v22 = vrot.slane %v910_v6, 3  ;;  %v920_v14 = vrot.slane %v910_v6, 6  ;;  %v919_v32 = vrot.slane %v910_v6, 5  ;;  %v921_v45 = vrot.slane %v910_v6, 7 }
 0x68e   :  { %3367 = vtanh.f32 %v930_v1  ;;  %v931_v17 = vadd.f32 %v915_v9, %v819_v13  ;;  %v932_v4 = vadd.f32 %v916_v16, %v820_v8  ;;  %v934_v27 = vadd.f32 %v918_v2, %v822_v19 }
 0x68f   :  { %v933_v34 = vadd.f32 %v917_v22, %v821_v24  ;;  %v936_v43 = vadd.f32 %v920_v14, %v824_v5  ;;  %v935_v48 = vadd.f32 %v919_v32, %v823_v3  ;;  %v937_v7 = vadd.f32 %v921_v45, %v825_v21 }
 0x690   :  { %3369 = vtanh.f32 %v931_v17  ;;  %v3044_v51 = vmul.f32 -1.442695, %v930_v1  ;;  %v3045_v62 = vmul.f32 -1.442695, %v931_v17  ;;  %v3046_v39 = vmul.f32 -1.442695, %v932_v4 }
 0x691   :  { %3371 = vtanh.f32 %v932_v4  ;;  %v3048_v63 = vmul.f32 -1.442695, %v934_v27  ;;  %v3047_v61 = vmul.f32 -1.442695, %v933_v34  ;;  %v3050_v44 = vmul.f32 -1.442695, %v936_v43 }
 0x692   :  { %3373 = vtanh.f32 %v934_v27  ;;  %v3049_v6 = vmul.f32 -1.442695, %v935_v48  ;;  %v3051_v9 = vmul.f32 -1.442695, %v937_v7 }
 0x693   :  { %3375 = vtanh.f32 %v933_v34 }
 0x694   :  { %3377 = vtanh.f32 %v936_v43 }
 0x695   :  { %3379 = vtanh.f32 %v935_v48 }
 0x696   :  { %3381 = vtanh.f32 %v937_v7 }
 0x697   :  { %3383 = vpow2.f32 %v3044_v51 }
 0x698   :  { %3385 = vpow2.f32 %v3045_v62 }
 0x699   :  { %3387 = vpow2.f32 %v3046_v39 }
 0x69a   :  { %3389 = vpow2.f32 %v3048_v63 }
 0x69b   :  { %v3368_v10 = vpop.eup %3367  ;;  %3391 = vpow2.f32 %v3047_v61 }
 0x69c   :  { %1010 = vrot.lane.b32.xlu0 %v3368_v10, %s3913_s2  ;;  %3393 = vpow2.f32 %v3050_v44 }
 0x69d   :  { %v3370_v49 = vpop.eup %3369  ;;  %3395 = vpow2.f32 %v3049_v6 }
 0x69e   :  { %v3372_v50 = vpop.eup %3371 }
 0x69f   :  { %1014 = vrot.lane.b32.xlu1 %v3372_v50, %s3913_s2  ;;  %v3374_v52 = vpop.eup %3373 }
 0x6a0   :  { %1012 = vrot.lane.b32.xlu0 %v3370_v49, %s3913_s2  ;;  %v3376_v53 = vpop.eup %3375 }
 0x6a1   :  { %v3378_v29 = vpop.eup %3377 }
 0x6a2   :  { %v3380_v33 = vpop.eup %3379 }
 0x6a3   :  { %1016 = vrot.lane.b32.xlu1 %v3376_v53, %s3913_s2  ;;  %v3382_v56 = vpop.eup %3381 }
 0x6a4   :  { %1018 = vrot.lane.b32.xlu0 %v3374_v52, %s3913_s2  ;;  %v3384_v41 = vpop.eup %3383 }
 0x6a5   :  { %v962_v58 = vadd.f32 1.0, %v3384_v41  ;;  %v3386_v13 = vpop.eup %3385 }
 0x6a6   :  { %v3388_v1 = vpop.eup %3387  ;;  %v963_v16 = vadd.f32 1.0, %v3386_v13 }
 0x6a7   :  { %1020 = vrot.lane.b32.xlu1 %v3380_v33, %s3913_s2  ;;  %3397 = vrcp.f32 %v962_v58  ;;  %v3390_v8 = vpop.eup %3389  ;;  %v964_v2 = vadd.f32 1.0, %v3388_v1 }
 0x6a8   :  { %1022 = vrot.lane.b32.xlu0 %v3378_v29, %s3913_s2  ;;  %3399 = vpow2.f32 %v3051_v9  ;;  %v3392_v17 = vpop.eup %3391  ;;  %v966_v19 = vadd.f32 1.0, %v3390_v8 }
 0x6a9   :  { %3401 = vrcp.f32 %v963_v16  ;;  %v3394_v22 = vpop.eup %3393  ;;  %v965_v4 = vadd.f32 1.0, %v3392_v17 }
 0x6aa   :  { %3403 = vrcp.f32 %v964_v2  ;;  %v3396_v24 = vpop.eup %3395  ;;  %v968_v27 = vadd.f32 1.0, %v3394_v22 }
 0x6ab   :  { %1024 = vrot.lane.b32.xlu1 %v3382_v56, %s3913_s2  ;;  %3405 = vrcp.f32 %v966_v19  ;;  %v967_v32 = vadd.f32 1.0, %v3396_v24 }
 0x6ac   :  { %3407 = vrcp.f32 %v965_v4 }
 0x6ad   :  { %3409 = vrcp.f32 %v968_v27 }
 0x6ae   :  { %3411 = vrcp.f32 %v967_v32 }
 0x6b4   :  { %v4309_v14 = vpop.eup %3397 }
 0x6b5   :  { %v3400_v3 = vpop.eup %3399  ;;  %v994_v9 = vmul.f32 %v4309_v14, %v4204_v31 }
 0x6b6   :  { %v969_v10 = vadd.f32 1.0, %v3400_v3  ;;  %v4313_v43 = vpop.eup %3401 }
 0x6b7   :  { %v4315_v48 = vpop.eup %3403  ;;  %v995_v16 = vmul.f32 %v4313_v43, %v4211_v54 }
 0x6b8   :  { %3413 = vrcp.f32 %v969_v10  ;;  %v4320_v50 = vpop.eup %3405  ;;  %v996_v8 = vmul.f32 %v4315_v48, %v4213_v55 }
 0x6b9   :  { %v4323_v53 = vpop.eup %3407  ;;  %v998_v31 = vmul.f32 %v4320_v50, %v4221_v60 }
 0x6ba   :  { %v4328_v51 = vpop.eup %3409  ;;  %v997_v4 = vmul.f32 %v4323_v53, %v4223_v57 }
 0x6bb   :  { %v4331_v39 = vpop.eup %3411  ;;  %v1000_v32 = vmul.f32 %v4328_v51, %v4232_v11 }
 0x6bc   :  { %v999_v60 = vmul.f32 %v4331_v39, %v4234_v12 }
 0x6c5   :  { %v4337_v44 = vpop.eup %3413 }
 0x6c6   :  { %v1001_v11 = vmul.f32 %v4337_v44, %v4240_v15 }
 0x70e   :  { %v1011_v5 = vpop.permute.xlu0 %1010 }
 0x70f   :  { %v1034_v34 = vmul.f32 %v4309_v14, %v1011_v5 }
 0x711   :  { %1050 = vrot.lane.b32.xlu0 %v1034_v34, %s3914_s3  ;;  %v1015_v21 = vpop.permute.xlu1 %1014 }
 0x712   :  { %v1013_v45 = vpop.permute.xlu0 %1012  ;;  %v1036_v49 = vmul.f32 %v4315_v48, %v1015_v21 }
 0x713   :  { %v1035_v7 = vmul.f32 %v4313_v43, %v1013_v45 }
 0x714   :  { %1054 = vrot.lane.b32.xlu1 %v1036_v49, %s3914_s3 }
 0x715   :  { %1052 = vrot.lane.b32.xlu0 %v1035_v7, %s3914_s3  ;;  %v1017_v29 = vpop.permute.xlu1 %1016 }
 0x716   :  { %v1019_v52 = vpop.permute.xlu0 %1018  ;;  %v1037_v56 = vmul.f32 %v4323_v53, %v1017_v29 }
 0x717   :  { %v1038_v33 = vmul.f32 %v4320_v50, %v1019_v52 }
 0x718   :  { %1056 = vrot.lane.b32.xlu1 %v1037_v56, %s3914_s3 }
 0x719   :  { %1058 = vrot.lane.b32.xlu0 %v1038_v33, %s3914_s3  ;;  %v1021_v63 = vpop.permute.xlu1 %1020 }
 0x71a   :  { %v1023_v62 = vpop.permute.xlu0 %1022  ;;  %v1039_v41 = vmul.f32 %v4331_v39, %v1021_v63 }
 0x71b   :  { %v1040_v61 = vmul.f32 %v4328_v51, %v1023_v62 }
 0x71c   :  { %1060 = vrot.lane.b32.xlu1 %v1039_v41, %s3914_s3 }
 0x71d   :  { %1062 = vrot.lane.b32.xlu0 %v1040_v61, %s3914_s3  ;;  %v1025_v6 = vpop.permute.xlu1 %1024 }
 0x71e   :  { %v1041_v58 = vmul.f32 %v4337_v44, %v1025_v6 }
 0x720   :  { %1064 = vrot.lane.b32.xlu1 %v1041_v58, %s3914_s3 }
 0x783   :  { %v1051_v13 = vpop.permute.xlu0 %1050 }
 0x784   :  { %v4343_v1 = vadd.f32 %v1051_v13, %v994_v9 }
 0x786   :  { %3415 = vtanh.f32 %v4343_v1  ;;  %v1055_v17 = vpop.permute.xlu1 %1054 }
 0x787   :  { %v1053_v2 = vpop.permute.xlu0 %1052  ;;  %v4352_v22 = vadd.f32 %v1055_v17, %v996_v8 }
 0x788   :  { %v4350_v19 = vadd.f32 %v1053_v2, %v995_v16 }
 0x78a   :  { %3417 = vtanh.f32 %v4350_v19  ;;  %v1057_v24 = vpop.permute.xlu1 %1056 }
 0x78b   :  { %3419 = vtanh.f32 %v4352_v22  ;;  %v1059_v54 = vpop.permute.xlu0 %1058  ;;  %v4362_v55 = vadd.f32 %v1057_v24, %v997_v4 }
 0x78c   :  { %v4360_v27 = vadd.f32 %v1059_v54, %v998_v31 }
 0x78e   :  { %3421 = vtanh.f32 %v4360_v27  ;;  %v1061_v57 = vpop.permute.xlu1 %1060 }
 0x78f   :  { %3423 = vtanh.f32 %v4362_v55  ;;  %v1063_v34 = vpop.permute.xlu0 %1062  ;;  %v4373_v10 = vadd.f32 %v1061_v57, %v999_v60 }
 0x790   :  { %v4371_v3 = vadd.f32 %v1063_v34, %v1000_v32 }
 0x792   :  { %3425 = vtanh.f32 %v4371_v3  ;;  %v1065_v45 = vpop.permute.xlu1 %1064 }
 0x793   :  { %v3416_v5 = vpop.eup %3415  ;;  %3427 = vtanh.f32 %v4373_v10  ;;  %v4379_v21 = vadd.f32 %v1065_v45, %v1001_v11 }
 0x794   :  { %1098 = vrot.lane.b32.xlu0 %v3416_v5, %s3913_s2 }
 0x795   :  { %3429 = vtanh.f32 %v4379_v21 }
 0x797   :  { %v3418_v7 = vpop.eup %3417 }
 0x798   :  { %v3420_v12 = vpop.eup %3419  ;;  %1100 = vrot.lane.b32.xlu0 %v3418_v7, %s3913_s2  ;;  %v4430_v7 = vld [vmem:[#allocation7 + $0x18] sm:$0xff] }
 0x799   :  { %1102 = vrot.lane.b32.xlu1 %v3420_v12, %s3913_s2  ;;  %v4440_v12 = vld [vmem:[#allocation7 + $0x8] sm:$0xff] }
 0x79b   :  { %v3422_v49 = vpop.eup %3421 }
 0x79c   :  { %v3424_v52 = vpop.eup %3423  ;;  %1106 = vrot.lane.b32.xlu0 %v3422_v49, %s3913_s2  ;;  %v4444_v49 = vld [vmem:[#allocation7] sm:$0xff] }
 0x79d   :  { %1104 = vrot.lane.b32.xlu1 %v3424_v52, %s3913_s2  ;;  %v1170_v52 = vld [vmem:[#allocation4 + $0x3] sm:$0x1] }
 0x79f   :  { %v3426_v29 = vpop.eup %3425 }
 0x7a0   :  { %v3428_v33 = vpop.eup %3427  ;;  %1110 = vrot.lane.b32.xlu0 %v3426_v29, %s3913_s2 }
 0x7a1   :  { %1108 = vrot.lane.b32.xlu1 %v3428_v33, %s3913_s2 }
 0x7a2   :  { %v3430_v15 = vpop.eup %3429 }
 0x7a5   :  { %1112 = vrot.lane.b32.xlu1 %v3430_v15, %s3913_s2 }
 0x806   :  { %v1099_v56 = vpop.permute.xlu0 %1098 }
 0x807   :  { %v4396_v6 = vmul.f32 %v4309_v14, %v1099_v56 }
 0x80a   :  { %v1101_v62 = vpop.permute.xlu0 %1100 }
 0x80b   :  { %v1103_v63 = vpop.permute.xlu1 %1102  ;;  %v4390_v61 = vmul.f32 %v4313_v43, %v1101_v62  ;;  %v1171_v62 = vld [vmem:[#allocation4 + $0xb] sm:$0x1] }
 0x80c   :  { %v4393_v41 = vmul.f32 %v4315_v48, %v1103_v63 }
 0x80d   :  { %v1178_v58 = vrot.slane %v4390_v61, 7 }
 0x80e   :  { %v1107_v9 = vpop.permute.xlu0 %1106  ;;  %v1180_v13 = vrot.slane %v4393_v41, 6 }
 0x80f   :  { %v1179_v16 = vsel %vm468_vm2, %v1178_v58, %v4396_v6  ;;  %v1105_v8 = vpop.permute.xlu1 %1104  ;;  %v4403_v2 = vmul.f32 %v4320_v50, %v1107_v9  ;;  %v1172_v58 = vld [vmem:[#allocation4 + $0x13] sm:$0x1] }
 0x810   :  { %v4406_v43 = vmul.f32 %v4323_v53, %v1105_v8  ;;  %v1181_v48 = vsel %vm471_vm3, %v1180_v13, %v1179_v16  ;;  %v1174_v16 = vld [vmem:[#allocation4 + $0x23] sm:$0x1] }
 0x811   :  { %v1184_v14 = vrot.slane %v4403_v2, 4 }
 0x812   :  { %v1182_v17 = vrot.slane %v4406_v43, 5  ;;  %v1111_v31 = vpop.permute.xlu0 %1110 }
 0x813   :  { %v1109_v4 = vpop.permute.xlu1 %1108  ;;  %v4412_v54 = vmul.f32 %v4328_v51, %v1111_v31 }
 0x814   :  { %v1183_v24 = vsel %vm474_vm4, %v1182_v17, %v1181_v48  ;;  %v4416_v5 = vmul.f32 %v4331_v39, %v1109_v4  ;;  %v1176_v4 = vld [vmem:[#allocation4 + $0x33] sm:$0x1] }
 0x815   :  { %v1185_v50 = vsel %vm477_vm5, %v1184_v14, %v1183_v24  ;;  %v1188_v53 = vrot.slane %v4412_v54, 2  ;;  %v1173_v14 = vld [vmem:[#allocation4 + $0x1b] sm:$0x1] }
 0x816   :  { %v1186_v32 = vrot.slane %v4416_v5, 3 }
 0x817   :  { %v1113_v60 = vpop.permute.xlu1 %1112 }
 0x818   :  { %v4422_v34 = vmul.f32 %v4337_v44, %v1113_v60  ;;  %v1187_v57 = vsel %vm480_vm6, %v1186_v32, %v1185_v50  ;;  %v4436_v44 = vld [vmem:[#allocation7 + $0x10] sm:$0xff] }
 0x819   :  { %v1189_v51 = vsel %vm483_vm7, %v1188_v53, %v1187_v57  ;;  %v1175_v53 = vld [vmem:[#allocation4 + $0x2b] sm:$0x1] }
 0x81a   :  { %v1190_v11 = vrot.slane %v4422_v34, 1 }
 0x81c   :  { %v1191_v45 = vsel %vm486_vm8, %v1190_v11, %v1189_v51  ;;  %v1177_v11 = vld [vmem:[#allocation4 + $0x3b] sm:$0x1] }
 0x81d   :  { %1192 = vrot.lane.b32.xlu0 %v1191_v45, %s3914_s3 }
 0x88f   :  { %v1193_v39 = vpop.permute.xlu0 %1192 }
 0x890   :  { %3179 = vmatmul.mubr.msk.f32.vlgmr.msra.gmra.mxu1 %vm78_vm1, %v1193_v39 }
 0x891   :  { %3193 = vmatpush3.msra.mxu1 %v4430_v7  ;;  %3200 = vmatprep.mubr.msk.f32.mxu1 %vm3912_vm0, %v5286_v0 }
 0x892   :  { %3194 = vmatprep.subr.mxu1 %v5286_v0 }
 0x893   :  { %3195 = vmatpush3.msra.mxu1 %v4436_v44 }
 0x894   :  { %3196 = vmatprep.subr.mxu1 %v5286_v0 }
 0x895   :  { %3197 = vmatpush3.msra.mxu1 %v4440_v12 }
 0x896   :  { %3198 = vmatprep.subr.mxu1 %v5286_v0 }
 0x897   :  { %3199 = vmatpush3.msra.mxu1 %v4444_v49 }
 0x898   :  { %3214 = vmatprep.subr.mxu1 %v5286_v0 }
 0x950   :  { %v1262_v29 = vpop.f32.mrf.mxu1 }
 0x951   :  { %v1282_v33 = vadd.f32 %v1262_v29, %v1170_v52  ;;  %v1267_v56 = vrot.slane %v1262_v29, 1  ;;  %v1268_v63 = vrot.slane %v1262_v29, 2  ;;  %v1270_v9 = vrot.slane %v1262_v29, 4 }
 0x952   :  { %v3180_v15 = vpop.f32.mrf.mxu1  ;;  %v1269_v8 = vrot.slane %v1262_v29, 3  ;;  %v1272_v17 = vrot.slane %v1262_v29, 6  ;;  %v1271_v24 = vrot.slane %v1262_v29, 5  ;;  %v1273_v57 = vrot.slane %v1262_v29, 7 }
 0x953   :  { %3431 = vtanh.f32 %v1282_v33  ;;  %v1283_v13 = vadd.f32 %v1267_v56, %v1171_v62  ;;  %v1284_v48 = vadd.f32 %v1268_v63, %v1172_v58  ;;  %v1286_v31 = vadd.f32 %v1270_v9, %v1174_v16 }
 0x954   :  { %v1285_v50 = vadd.f32 %v1269_v8, %v1173_v14  ;;  %v1288_v60 = vadd.f32 %v1272_v17, %v1176_v4  ;;  %v1287_v51 = vadd.f32 %v1271_v24, %v1175_v53  ;;  %v1289_v45 = vadd.f32 %v1273_v57, %v1177_v11 }
 0x955   :  { %3433 = vtanh.f32 %v1283_v13  ;;  %v3053_v58 = vmul.f32 -1.442695, %v1282_v33  ;;  %v3054_v9 = vmul.f32 -1.442695, %v1283_v13  ;;  %v3055_v16 = vmul.f32 -1.442695, %v1284_v48 }
 0x956   :  { %3435 = vtanh.f32 %v1284_v48  ;;  %v3057_v8 = vmul.f32 -1.442695, %v1286_v31  ;;  %v3056_v14 = vmul.f32 -1.442695, %v1285_v50  ;;  %v3059_v4 = vmul.f32 -1.442695, %v1288_v60 }
 0x957   :  { %3437 = vtanh.f32 %v1286_v31  ;;  %v3058_v24 = vmul.f32 -1.442695, %v1287_v51 }
 0x958   :  { %3439 = vtanh.f32 %v1285_v50 }
 0x959   :  { %3441 = vtanh.f32 %v1288_v60 }
 0x95a   :  { %3443 = vtanh.f32 %v1287_v51 }
 0x95b   :  { %3445 = vtanh.f32 %v1289_v45 }
 0x95c   :  { %3447 = vpow2.f32 %v3053_v58 }
 0x95d   :  { %3449 = vpow2.f32 %v3054_v9 }
 0x95e   :  { %3451 = vpow2.f32 %v3055_v16 }
 0x95f   :  { %3453 = vpow2.f32 %v3057_v8 }
 0x960   :  { %v3432_v32 = vpop.eup %3431  ;;  %3455 = vpow2.f32 %v3056_v14 }
 0x961   :  { %1362 = vrot.lane.b32.xlu1 %v3432_v32, %s3913_s2  ;;  %3457 = vpow2.f32 %v3059_v4  ;;  %v3060_v32 = vmul.f32 -1.442695, %v1289_v45 }
 0x962   :  { %v3434_v39 = vpop.eup %3433  ;;  %3459 = vpow2.f32 %v3058_v24 }
 0x963   :  { %v3436_v52 = vpop.eup %3435 }
 0x964   :  { %1366 = vrot.lane.b32.xlu0 %v3436_v52, %s3913_s2  ;;  %v3438_v15 = vpop.eup %3437 }
 0x965   :  { %1364 = vrot.lane.b32.xlu1 %v3434_v39, %s3913_s2  ;;  %v3440_v56 = vpop.eup %3439 }
 0x966   :  { %v3442_v29 = vpop.eup %3441 }
 0x967   :  { %v3444_v62 = vpop.eup %3443 }
 0x968   :  { %1368 = vrot.lane.b32.xlu0 %v3440_v56, %s3913_s2  ;;  %v3446_v63 = vpop.eup %3445 }
 0x969   :  { %1370 = vrot.lane.b32.xlu1 %v3438_v15, %s3913_s2  ;;  %v3448_v17 = vpop.eup %3447 }
 0x96a   :  { %v1314_v53 = vadd.f32 1.0, %v3448_v17  ;;  %v3450_v57 = vpop.eup %3449 }
 0x96b   :  { %v3452_v33 = vpop.eup %3451  ;;  %v1315_v11 = vadd.f32 1.0, %v3450_v57 }
 0x96c   :  { %1372 = vrot.lane.b32.xlu0 %v3444_v62, %s3913_s2  ;;  %3461 = vrcp.f32 %v1314_v53  ;;  %v3454_v13 = vpop.eup %3453  ;;  %v1316_v48 = vadd.f32 1.0, %v3452_v33 }
 0x96d   :  { %1374 = vrot.lane.b32.xlu1 %v3442_v29, %s3913_s2  ;;  %3463 = vpow2.f32 %v3060_v32  ;;  %v3456_v39 = vpop.eup %3455  ;;  %v1318_v31 = vadd.f32 1.0, %v3454_v13 }
 0x96e   :  { %3465 = vrcp.f32 %v1315_v11  ;;  %v3458_v50 = vpop.eup %3457  ;;  %v1317_v52 = vadd.f32 1.0, %v3456_v39 }
 0x96f   :  { %3467 = vrcp.f32 %v1316_v48  ;;  %v3460_v60 = vpop.eup %3459  ;;  %v1320_v51 = vadd.f32 1.0, %v3458_v50 }
 0x970   :  { %1376 = vrot.lane.b32.xlu0 %v3446_v63, %s3913_s2  ;;  %3469 = vrcp.f32 %v1318_v31  ;;  %v1319_v45 = vadd.f32 1.0, %v3460_v60 }
 0x971   :  { %3471 = vrcp.f32 %v1317_v52 }
 0x972   :  { %3473 = vrcp.f32 %v1320_v51 }
 0x973   :  { %3475 = vrcp.f32 %v1319_v45 }
 0x979   :  { %v4456_v15 = vpop.eup %3461 }
 0x97a   :  { %v3464_v62 = vpop.eup %3463 }
 0x97b   :  { %v1321_v63 = vadd.f32 1.0, %v3464_v62  ;;  %v4460_v58 = vpop.eup %3465 }
 0x97c   :  { %v4462_v16 = vpop.eup %3467  ;;  %v1347_v62 = vmul.f32 %v4460_v58, %v4350_v19 }
 0x97d   :  { %3477 = vrcp.f32 %v1321_v63  ;;  %v4467_v4 = vpop.eup %3469  ;;  %v1348_v63 = vmul.f32 %v4462_v16, %v4352_v22 }
 0x97e   :  { %v4470_v53 = vpop.eup %3471 }
 0x97f   :  { %v4475_v11 = vpop.eup %3473 }
 0x980   :  { %v4478_v48 = vpop.eup %3475 }
 0x98a   :  { %v4484_v52 = vpop.eup %3477 }
 0x9d3   :  { %v1363_v56 = vpop.permute.xlu1 %1362 }
 0x9d4   :  { %v1386_v29 = vmul.f32 %v4456_v15, %v1363_v56  ;;  %v1346_v56 = vmul.f32 %v4456_v15, %v4343_v1  ;;  %v1350_v1 = vmul.f32 %v4467_v4, %v4360_v27  ;;  %v1351_v27 = vmul.f32 %v4478_v48, %v4373_v10 }
 0x9d6   :  { %1402 = vrot.lane.b32.xlu1 %v1386_v29, %s3914_s3  ;;  %v1367_v8 = vpop.permute.xlu0 %1366 }
 0x9d7   :  { %v1365_v9 = vpop.permute.xlu1 %1364  ;;  %v1388_v17 = vmul.f32 %v4462_v16, %v1367_v8 }
 0x9d8   :  { %v1387_v14 = vmul.f32 %v4460_v58, %v1365_v9 }
 0x9d9   :  { %1406 = vrot.lane.b32.xlu0 %v1388_v17, %s3914_s3 }
 0x9da   :  { %1404 = vrot.lane.b32.xlu1 %v1387_v14, %s3914_s3  ;;  %v1369_v32 = vpop.permute.xlu0 %1368 }
 0x9db   :  { %v1371_v24 = vpop.permute.xlu1 %1370  ;;  %v1389_v33 = vmul.f32 %v4470_v53, %v1369_v32 }
 0x9dc   :  { %v1390_v57 = vmul.f32 %v4467_v4, %v1371_v24  ;;  %v1349_v24 = vmul.f32 %v4470_v53, %v4362_v55 }
 0x9dd   :  { %1408 = vrot.lane.b32.xlu0 %v1389_v33, %s3914_s3 }
 0x9de   :  { %1410 = vrot.lane.b32.xlu1 %v1390_v57, %s3914_s3  ;;  %v1373_v39 = vpop.permute.xlu0 %1372 }
 0x9df   :  { %v1375_v13 = vpop.permute.xlu1 %1374  ;;  %v1391_v50 = vmul.f32 %v4478_v48, %v1373_v39 }
 0x9e0   :  { %v1392_v31 = vmul.f32 %v4475_v11, %v1375_v13  ;;  %v1352_v13 = vmul.f32 %v4475_v11, %v4371_v3  ;;  %v1353_v3 = vmul.f32 %v4484_v52, %v4379_v21 }
 0x9e1   :  { %1412 = vrot.lane.b32.xlu0 %v1391_v50, %s3914_s3 }
 0x9e2   :  { %1414 = vrot.lane.b32.xlu1 %v1392_v31, %s3914_s3  ;;  %v1377_v60 = vpop.permute.xlu0 %1376 }
 0x9e3   :  { %v1393_v51 = vmul.f32 %v4484_v52, %v1377_v60 }
 0x9e5   :  { %1416 = vrot.lane.b32.xlu0 %v1393_v51, %s3914_s3 }
 0xa48   :  { %v1403_v45 = vpop.permute.xlu1 %1402 }
 0xa49   :  { %v4490_v29 = vadd.f32 %v1403_v45, %v1346_v56 }
 0xa4b   :  { %3479 = vtanh.f32 %v4490_v29  ;;  %v1407_v8 = vpop.permute.xlu0 %1406 }
 0xa4c   :  { %v1405_v9 = vpop.permute.xlu1 %1404  ;;  %v4499_v17 = vadd.f32 %v1407_v8, %v1348_v63 }
 0xa4d   :  { %v4497_v14 = vadd.f32 %v1405_v9, %v1347_v62 }
 0xa4f   :  { %3481 = vtanh.f32 %v4497_v14  ;;  %v1409_v32 = vpop.permute.xlu0 %1408 }
 0xa50   :  { %3483 = vtanh.f32 %v4499_v17  ;;  %v1411_v19 = vpop.permute.xlu1 %1410  ;;  %v4509_v22 = vadd.f32 %v1409_v32, %v1349_v24 }
 0xa51   :  { %v4507_v57 = vadd.f32 %v1411_v19, %v1350_v1 }
 0xa53   :  { %3485 = vtanh.f32 %v4507_v57  ;;  %v1413_v55 = vpop.permute.xlu0 %1412 }
 0xa54   :  { %3487 = vtanh.f32 %v4509_v22  ;;  %v1415_v39 = vpop.permute.xlu1 %1414  ;;  %v4520_v50 = vadd.f32 %v1413_v55, %v1351_v27 }
 0xa55   :  { %v4518_v31 = vadd.f32 %v1415_v39, %v1352_v13 }
 0xa57   :  { %3489 = vtanh.f32 %v4518_v31  ;;  %v1417_v60 = vpop.permute.xlu0 %1416 }
 0xa58   :  { %v3480_v33 = vpop.eup %3479  ;;  %3491 = vtanh.f32 %v4520_v50  ;;  %v4526_v51 = vadd.f32 %v1417_v60, %v1353_v3 }
 0xa59   :  { %1450 = vrot.lane.b32.xlu1 %v3480_v33, %s3913_s2 }
 0xa5a   :  { %3493 = vtanh.f32 %v4526_v51 }
 0xa5c   :  { %v3482_v56 = vpop.eup %3481 }
 0xa5d   :  { %v3484_v10 = vpop.eup %3483  ;;  %1452 = vrot.lane.b32.xlu1 %v3482_v56, %s3913_s2 }
 0xa5e   :  { %1454 = vrot.lane.b32.xlu0 %v3484_v10, %s3913_s2 }
 0xa60   :  { %v3486_v45 = vpop.eup %3485 }
 0xa61   :  { %v3488_v62 = vpop.eup %3487  ;;  %1458 = vrot.lane.b32.xlu1 %v3486_v45, %s3913_s2 }
 0xa62   :  { %1456 = vrot.lane.b32.xlu0 %v3488_v62, %s3913_s2 }
 0xa64   :  { %v3490_v63 = vpop.eup %3489 }
 0xa65   :  { %v3492_v9 = vpop.eup %3491  ;;  %1462 = vrot.lane.b32.xlu1 %v3490_v63, %s3913_s2 }
 0xa66   :  { %1460 = vrot.lane.b32.xlu0 %v3492_v9, %s3913_s2 }
 0xa67   :  { %v3494_v21 = vpop.eup %3493 }
 0xa6a   :  { %1464 = vrot.lane.b32.xlu0 %v3494_v21, %s3913_s2 }
 0xacb   :  { %v1451_v8 = vpop.permute.xlu1 %1450 }
 0xacc   :  { %v4543_v33 = vmul.f32 %v4456_v15, %v1451_v8 }
 0xacf   :  { %v1453_v1 = vpop.permute.xlu1 %1452 }
 0xad0   :  { %v1455_v24 = vpop.permute.xlu0 %1454  ;;  %v4537_v19 = vmul.f32 %v4460_v58, %v1453_v1 }
 0xad1   :  { %v4540_v32 = vmul.f32 %v4462_v16, %v1455_v24 }
 0xad2   :  { %v1530_v13 = vrot.slane %v4537_v19, 7 }
 0xad3   :  { %v1459_v27 = vpop.permute.xlu1 %1458  ;;  %v1532_v39 = vrot.slane %v4540_v32, 6 }
 0xad4   :  { %v1531_v55 = vsel %vm468_vm2, %v1530_v13, %v4543_v33  ;;  %v1457_v3 = vpop.permute.xlu0 %1456  ;;  %v4550_v60 = vmul.f32 %v4467_v4, %v1459_v27 }
 0xad5   :  { %v4553_v58 = vmul.f32 %v4470_v53, %v1457_v3  ;;  %v1533_v16 = vsel %vm471_vm3, %v1532_v39, %v1531_v55 }
 0xad6   :  { %v1536_v15 = vrot.slane %v4550_v60, 4 }
 0xad7   :  { %v1534_v56 = vrot.slane %v4553_v58, 5  ;;  %v1463_v10 = vpop.permute.xlu1 %1462 }
 0xad8   :  { %v1461_v45 = vpop.permute.xlu0 %1460  ;;  %v4559_v62 = vmul.f32 %v4475_v11, %v1463_v10  ;;  %v1524_v10 = vld [vmem:[#allocation4 + $0x14] sm:$0x1] }
 0xad9   :  { %v1535_v63 = vsel %vm474_vm4, %v1534_v56, %v1533_v16  ;;  %v4563_v9 = vmul.f32 %v4478_v48, %v1461_v45 }
 0xada   :  { %v1537_v4 = vsel %vm477_vm5, %v1536_v15, %v1535_v63  ;;  %v1540_v53 = vrot.slane %v4559_v62, 2  ;;  %v1523_v15 = vld [vmem:[#allocation4 + $0xc] sm:$0x1] }
 0xadb   :  { %5310 = vst [vmem:[#allocation21_spill] sm:$0xff] %v4563_v9  ;;  %v1538_v21 = vrot.slane %v4563_v9, 3 }
 0xadc   :  { %v1465_v8 = vpop.permute.xlu0 %1464 }
 0xadd   :  { %v4569_v1 = vmul.f32 %v4484_v52, %v1465_v8  ;;  %v1539_v24 = vsel %vm480_vm6, %v1538_v21, %v1537_v4  ;;  %v1522_v52 = vld [vmem:[#allocation4 + $0x4] sm:$0x1]  ;;  %v1525_v8 = vld [vmem:[#allocation4 + $0x1c] sm:$0x1] }
 0xade   :  { %v1541_v11 = vsel %vm483_vm7, %v1540_v53, %v1539_v24  ;;  %v1526_v4 = vld [vmem:[#allocation4 + $0x24] sm:$0x1] }
 0xadf   :  { %5311 = vst [vmem:[#allocation22_spill] sm:$0xff] %v4569_v1  ;;  %v1542_v13 = vrot.slane %v4569_v1, 1 }
 0xae1   :  { %v1543_v27 = vsel %vm486_vm8, %v1542_v13, %v1541_v11  ;;  %v1528_v13 = vld [vmem:[#allocation4 + $0x34] sm:$0x1] }
 0xae2   :  { %1544 = vrot.lane.b32.xlu1 %v1543_v27, %s3914_s3 }
 0xb54   :  { %v1545_v48 = vpop.permute.xlu1 %1544 }
 0xb55   :  { %3190 = vmatmul.mubr.msk.f32.vlgmr.msra.gmra.mxu0 %vm78_vm1, %v1545_v48 }
 0xb56   :  { %3204 = vmatpush3.msra.mxu0 %v4430_v7  ;;  %3211 = vmatprep.mubr.msk.f32.mxu0 %vm3912_vm0, %v5286_v0 }
 0xb57   :  { %3205 = vmatprep.subr.mxu0 %v5286_v0 }
 0xb58   :  { %3206 = vmatpush3.msra.mxu0 %v4436_v44 }
 0xb59   :  { %3207 = vmatprep.subr.mxu0 %v5286_v0 }
 0xb5a   :  { %3208 = vmatpush3.msra.mxu0 %v4440_v12 }
 0xb5b   :  { %3209 = vmatprep.subr.mxu0 %v5286_v0 }
 0xb5c   :  { %3210 = vmatpush3.msra.mxu0 %v4444_v49 }
 0xc15   :  { %v1614_v39 = vpop.f32.mrf.mxu0 }
 0xc16   :  { %v1634_v55 = vadd.f32 %v1614_v39, %v1522_v52  ;;  %v1619_v16 = vrot.slane %v1614_v39, 1  ;;  %v1620_v56 = vrot.slane %v1614_v39, 2  ;;  %v1622_v45 = vrot.slane %v1614_v39, 4  ;;  %v1527_v52 = vld [vmem:[#allocation4 + $0x2c] sm:$0x1] }
 0xc17   :  { %v3191_v3 = vpop.f32.mrf.mxu0  ;;  %v1621_v53 = vrot.slane %v1614_v39, 3  ;;  %v1624_v24 = vrot.slane %v1614_v39, 6  ;;  %v1623_v27 = vrot.slane %v1614_v39, 5  ;;  %v1625_v1 = vrot.slane %v1614_v39, 7 }
 0xc18   :  { %3495 = vtanh.f32 %v1634_v55  ;;  %v1635_v63 = vadd.f32 %v1619_v16, %v1523_v15  ;;  %v1636_v21 = vadd.f32 %v1620_v56, %v1524_v10  ;;  %v1638_v11 = vadd.f32 %v1622_v45, %v1526_v4  ;;  %v1529_v16 = vld [vmem:[#allocation4 + $0x3c] sm:$0x1] }
 0xc19   :  { %v1637_v48 = vadd.f32 %v1621_v53, %v1525_v8  ;;  %v1640_v0 = vadd.f32 %v1624_v24, %v1528_v13  ;;  %v1639_v9 = vadd.f32 %v1623_v27, %v1527_v52  ;;  %v1641_v15 = vadd.f32 %v1625_v1, %v1529_v16 }
 0xc1a   :  { %3497 = vtanh.f32 %v1635_v63  ;;  %v3062_v8 = vmul.f32 -1.442695, %v1634_v55  ;;  %v3063_v24 = vmul.f32 -1.442695, %v1635_v63  ;;  %v3064_v13 = vmul.f32 -1.442695, %v1636_v21 }
 0xc1b   :  { %3499 = vtanh.f32 %v1636_v21  ;;  %v3066_v27 = vmul.f32 -1.442695, %v1638_v11  ;;  %v3065_v52 = vmul.f32 -1.442695, %v1637_v48  ;;  %v3068_v16 = vmul.f32 -1.442695, %v1640_v0 }
 0xc1c   :  { %3501 = vtanh.f32 %v1638_v11 }
 0xc1d   :  { %3503 = vtanh.f32 %v1637_v48 }
 0xc1e   :  { %3505 = vtanh.f32 %v1640_v0 }
 0xc1f   :  { %3507 = vtanh.f32 %v1639_v9 }
 0xc20   :  { %3509 = vtanh.f32 %v1641_v15 }
 0xc21   :  { %3511 = vpow2.f32 %v3062_v8 }
 0xc22   :  { %3513 = vpow2.f32 %v3063_v24 }
 0xc23   :  { %3515 = vpow2.f32 %v3064_v13 }
 0xc24   :  { %3517 = vpow2.f32 %v3066_v27 }
 0xc25   :  { %v3496_v3 = vpop.eup %3495  ;;  %3519 = vpow2.f32 %v3065_v52 }
 0xc26   :  { %1714 = vrot.lane.b32.xlu0 %v3496_v3, %s3913_s2  ;;  %3521 = vpow2.f32 %v3068_v16 }
 0xc27   :  { %v3498_v56 = vpop.eup %3497 }
 0xc28   :  { %v3500_v10 = vpop.eup %3499 }
 0xc29   :  { %1718 = vrot.lane.b32.xlu1 %v3500_v10, %s3913_s2  ;;  %v3502_v45 = vpop.eup %3501 }
 0xc2a   :  { %1716 = vrot.lane.b32.xlu0 %v3498_v56, %s3913_s2  ;;  %v3504_v4 = vpop.eup %3503  ;;  %v3067_v56 = vmul.f32 -1.442695, %v1639_v9 }
 0xc2b   :  { %v3506_v39 = vpop.eup %3505 }
 0xc2c   :  { %v3508_v53 = vpop.eup %3507  ;;  %3523 = vpow2.f32 %v3067_v56 }
 0xc2d   :  { %1720 = vrot.lane.b32.xlu1 %v3504_v4, %s3913_s2  ;;  %v3510_v1 = vpop.eup %3509 }
 0xc2e   :  { %1722 = vrot.lane.b32.xlu0 %v3502_v45, %s3913_s2  ;;  %v3512_v3 = vpop.eup %3511  ;;  %v3069_v45 = vmul.f32 -1.442695, %v1641_v15 }
 0xc2f   :  { %v1666_v10 = vadd.f32 1.0, %v3512_v3  ;;  %v3514_v4 = vpop.eup %3513 }
 0xc30   :  { %v3516_v55 = vpop.eup %3515 }
 0xc31   :  { %1724 = vrot.lane.b32.xlu1 %v3508_v53, %s3913_s2  ;;  %3525 = vrcp.f32 %v1666_v10  ;;  %v3518_v63 = vpop.eup %3517  ;;  %v1668_v21 = vadd.f32 1.0, %v3516_v55 }
 0xc32   :  { %1726 = vrot.lane.b32.xlu0 %v3506_v39, %s3913_s2  ;;  %3527 = vpow2.f32 %v3069_v45  ;;  %v1667_v39 = vadd.f32 1.0, %v3514_v4  ;;  %v3520_v53 = vpop.eup %3519  ;;  %v1670_v11 = vadd.f32 1.0, %v3518_v63 }
 0xc33   :  { %v3522_v48 = vpop.eup %3521 }
 0xc34   :  { %3529 = vrcp.f32 %v1667_v39  ;;  %v1672_v9 = vadd.f32 1.0, %v3522_v48 }
 0xc35   :  { %1728 = vrot.lane.b32.xlu1 %v3510_v1, %s3913_s2  ;;  %v1669_v1 = vadd.f32 1.0, %v3520_v53  ;;  %3531 = vrcp.f32 %v1668_v21 }
 0xc36   :  { %3533 = vrcp.f32 %v1670_v11 }
 0xc37   :  { %3535 = vrcp.f32 %v1669_v1 }
 0xc38   :  { %3537 = vrcp.f32 %v1672_v9 }
 0xc39   :  { %v3524_v0 = vpop.eup %3523 }
 0xc3a   :  { %v1671_v15 = vadd.f32 1.0, %v3524_v0 }
 0xc3c   :  { %3539 = vrcp.f32 %v1671_v15 }
 0xc3e   :  { %v4594_v8 = vpop.eup %3525 }
 0xc3f   :  { %v3528_v27 = vpop.eup %3527 }
 0xc40   :  { %v1673_v52 = vadd.f32 1.0, %v3528_v27 }
 0xc41   :  { %v4598_v3 = vpop.eup %3529 }
 0xc42   :  { %3541 = vrcp.f32 %v1673_v52  ;;  %v4600_v56 = vpop.eup %3531 }
 0xc43   :  { %v4605_v55 = vpop.eup %3533 }
 0xc44   :  { %v4608_v63 = vpop.eup %3535 }
 0xc45   :  { %v4613_v48 = vpop.eup %3537 }
 0xc49   :  { %v4616_v0 = vpop.eup %3539 }
 0xc98   :  { %v1715_v24 = vpop.permute.xlu0 %1714 }
 0xc99   :  { %v1738_v13 = vmul.f32 %v4594_v8, %v1715_v24 }
 0xc9b   :  { %1754 = vrot.lane.b32.xlu0 %v1738_v13, %s3914_s3  ;;  %v1719_v10 = vpop.permute.xlu1 %1718  ;;  %v4622_v13 = vpop.eup %3541 }
 0xc9c   :  { %v1717_v16 = vpop.permute.xlu0 %1716  ;;  %v1740_v4 = vmul.f32 %v4600_v56, %v1719_v10 }
 0xc9d   :  { %v1739_v45 = vmul.f32 %v4598_v3, %v1717_v16  ;;  %v1698_v16 = vmul.f32 %v4594_v8, %v4490_v29  ;;  %v1702_v29 = vmul.f32 %v4605_v55, %v4507_v57  ;;  %v1703_v57 = vmul.f32 %v4616_v0, %v4520_v50 }
 0xc9e   :  { %1758 = vrot.lane.b32.xlu1 %v1740_v4, %s3914_s3  ;;  %v1699_v4 = vmul.f32 %v4598_v3, %v4497_v14 }
 0xc9f   :  { %1756 = vrot.lane.b32.xlu0 %v1739_v45, %s3914_s3  ;;  %v1721_v21 = vpop.permute.xlu1 %1720 }
 0xca0   :  { %v1723_v39 = vpop.permute.xlu0 %1722  ;;  %v1741_v11 = vmul.f32 %v4608_v63, %v1721_v21 }
 0xca1   :  { %v1742_v53 = vmul.f32 %v4605_v55, %v1723_v39  ;;  %v1700_v39 = vmul.f32 %v4600_v56, %v4499_v17 }
 0xca2   :  { %1760 = vrot.lane.b32.xlu1 %v1741_v11, %s3914_s3 }
 0xca3   :  { %1762 = vrot.lane.b32.xlu0 %v1742_v53, %s3914_s3  ;;  %v1725_v9 = vpop.permute.xlu1 %1724 }
 0xca4   :  { %v1727_v1 = vpop.permute.xlu0 %1726  ;;  %v1743_v15 = vmul.f32 %v4616_v0, %v1725_v9  ;;  %v1701_v9 = vmul.f32 %v4608_v63, %v4509_v22 }
 0xca5   :  { %v1744_v24 = vmul.f32 %v4613_v48, %v1727_v1 }
 0xca6   :  { %1764 = vrot.lane.b32.xlu1 %v1743_v15, %s3914_s3 }
 0xca7   :  { %1766 = vrot.lane.b32.xlu0 %v1744_v24, %s3914_s3  ;;  %v1729_v27 = vpop.permute.xlu1 %1728 }
 0xca8   :  { %v1745_v52 = vmul.f32 %v4622_v13, %v1729_v27 }
 0xcaa   :  { %1768 = vrot.lane.b32.xlu1 %v1745_v52, %s3914_s3  ;;  %v1704_v52 = vmul.f32 %v4613_v48, %v4518_v31  ;;  %v1705_v31 = vmul.f32 %v4622_v13, %v4526_v51 }
 0xd0d   :  { %v1755_v10 = vpop.permute.xlu0 %1754 }
 0xd0e   :  { %v4628_v45 = vadd.f32 %v1755_v10, %v1698_v16 }
 0xd10   :  { %3543 = vtanh.f32 %v4628_v45  ;;  %v1759_v53 = vpop.permute.xlu1 %1758 }
 0xd11   :  { %v1757_v21 = vpop.permute.xlu0 %1756  ;;  %v4637_v1 = vadd.f32 %v1759_v53, %v1700_v39 }
 0xd12   :  { %v4635_v11 = vadd.f32 %v1757_v21, %v1699_v4 }
 0xd14   :  { %3545 = vtanh.f32 %v4635_v11  ;;  %v1761_v24 = vpop.permute.xlu1 %1760 }
 0xd15   :  { %3547 = vtanh.f32 %v4637_v1  ;;  %v1763_v14 = vpop.permute.xlu0 %1762  ;;  %v4647_v17 = vadd.f32 %v1761_v24, %v1701_v9 }
 0xd16   :  { %v4645_v15 = vadd.f32 %v1763_v14, %v1702_v29 }
 0xd18   :  { %3549 = vtanh.f32 %v4645_v15  ;;  %v1765_v22 = vpop.permute.xlu1 %1764 }
 0xd19   :  { %3551 = vtanh.f32 %v4647_v17  ;;  %v1767_v16 = vpop.permute.xlu0 %1766  ;;  %v4658_v4 = vadd.f32 %v1765_v22, %v1703_v57 }
 0xd1a   :  { %v4656_v10 = vadd.f32 %v1767_v16, %v1704_v52 }
 0xd1c   :  { %3553 = vtanh.f32 %v4656_v10  ;;  %v1769_v39 = vpop.permute.xlu1 %1768 }
 0xd1d   :  { %v3544_v27 = vpop.eup %3543  ;;  %3555 = vtanh.f32 %v4658_v4  ;;  %v4664_v21 = vadd.f32 %v1769_v39, %v1705_v31 }
 0xd1e   :  { %1802 = vrot.lane.b32.xlu0 %v3544_v27, %s3913_s2 }
 0xd1f   :  { %3557 = vtanh.f32 %v4664_v21 }
 0xd21   :  { %v3546_v53 = vpop.eup %3545 }
 0xd22   :  { %v3548_v50 = vpop.eup %3547  ;;  %1804 = vrot.lane.b32.xlu0 %v3546_v53, %s3913_s2 }
 0xd23   :  { %1806 = vrot.lane.b32.xlu1 %v3548_v50, %s3913_s2 }
 0xd25   :  { %v3550_v29 = vpop.eup %3549 }
 0xd26   :  { %v3552_v9 = vpop.eup %3551  ;;  %1810 = vrot.lane.b32.xlu0 %v3550_v29, %s3913_s2 }
 0xd27   :  { %1808 = vrot.lane.b32.xlu1 %v3552_v9, %s3913_s2 }
 0xd29   :  { %v3554_v14 = vpop.eup %3553 }
 0xd2a   :  { %v3556_v24 = vpop.eup %3555  ;;  %1814 = vrot.lane.b32.xlu0 %v3554_v14, %s3913_s2 }
 0xd2b   :  { %1812 = vrot.lane.b32.xlu1 %v3556_v24, %s3913_s2 }
 0xd2c   :  { %v3558_v51 = vpop.eup %3557 }
 0xd2f   :  { %1816 = vrot.lane.b32.xlu1 %v3558_v51, %s3913_s2 }
 0xd90   :  { %v1803_v27 = vpop.permute.xlu0 %1802 }
 0xd91   :  { %v4681_v31 = vmul.f32 %v4594_v8, %v1803_v27 }
 0xd94   :  { %v1805_v52 = vpop.permute.xlu0 %1804 }
 0xd95   :  { %v1807_v57 = vpop.permute.xlu1 %1806  ;;  %v4675_v16 = vmul.f32 %v4598_v3, %v1805_v52 }
 0xd96   :  { %v4678_v22 = vmul.f32 %v4600_v56, %v1807_v57 }
 0xd97   :  { %v1882_v39 = vrot.slane %v4675_v16, 7 }
 0xd98   :  { %v1811_v53 = vpop.permute.xlu0 %1810  ;;  %v1884_v50 = vrot.slane %v4678_v22, 6 }
 0xd99   :  { %v1883_v29 = vsel %vm468_vm2, %v1882_v39, %v4681_v31  ;;  %v1809_v9 = vpop.permute.xlu1 %1808  ;;  %v4688_v14 = vmul.f32 %v4605_v55, %v1811_v53 }
 0xd9a   :  { %v4691_v3 = vmul.f32 %v4608_v63, %v1809_v9  ;;  %v1885_v56 = vsel %vm471_vm3, %v1884_v50, %v1883_v29 }
 0xd9b   :  { %5312 = vst [vmem:[#allocation23_spill] sm:$0xff] %v4688_v14  ;;  %v1888_v8 = vrot.slane %v4688_v14, 4 }
 0xd9c   :  { %5313 = vst [vmem:[#allocation24_spill] sm:$0xff] %v4691_v3  ;;  %v1886_v24 = vrot.slane %v4691_v3, 5  ;;  %v1815_v51 = vpop.permute.xlu0 %1814 }
 0xd9d   :  { %v1813_v27 = vpop.permute.xlu1 %1812  ;;  %v4697_v52 = vmul.f32 %v4613_v48, %v1815_v51 }
 0xd9e   :  { %v1887_v57 = vsel %vm474_vm4, %v1886_v24, %v1885_v56  ;;  %v4701_v39 = vmul.f32 %v4616_v0, %v1813_v27 }
 0xd9f   :  { %5314 = vst [vmem:[#allocation25_spill] sm:$0xff] %v4697_v52  ;;  %v1889_v55 = vsel %vm477_vm5, %v1888_v8, %v1887_v57  ;;  %v1892_v63 = vrot.slane %v4697_v52, 2  ;;  %v5316_v8 = vmov 0.0  }
 0xda0   :  { %v1890_v53 = vrot.slane %v4701_v39, 3 }
 0xda1   :  { %v1817_v50 = vpop.permute.xlu1 %1816 }
 0xda2   :  { %v4707_v29 = vmul.f32 %v4622_v13, %v1817_v50  ;;  %v1891_v9 = vsel %vm480_vm6, %v1890_v53, %v1889_v55  ;;  %v1874_v13 = vld [vmem:[#allocation4 + $0x5] sm:$0x1]  ;;  %v1875_v55 = vld [vmem:[#allocation4 + $0xd] sm:$0x1]  ;;  %v1876_v53 = vld [vmem:[#allocation4 + $0x15] sm:$0x1] }
 0xda3   :  { %v1893_v48 = vsel %vm483_vm7, %v1892_v63, %v1891_v9 }
 0xda4   :  { %5315 = vst [vmem:[#allocation26_spill] sm:$0xff] %v4707_v29  ;;  %v1894_v51 = vrot.slane %v4707_v29, 1 }
 0xda6   :  { %v1895_v56 = vsel %vm486_vm8, %v1894_v51, %v1893_v48 }
 0xda7   :  { %1896 = vrot.lane.b32.xlu0 %v1895_v56, %s3914_s3  ;;  %v1877_v56 = vld [vmem:[#allocation4 + $0x1d] sm:$0x1] }
 0xe19   :  { %v1897_v0 = vpop.permute.xlu0 %1896 }
 0xe1a   :  { %3201 = vmatmul.mubr.msk.f32.vlgmr.msra.gmra.mxu1 %vm78_vm1, %v1897_v0 }
 0xe1b   :  { %3215 = vmatpush3.msra.mxu1 %v4430_v7  ;;  %3222 = vmatprep.mubr.msk.f32.mxu1 %vm3912_vm0, %v5316_v8 }
 0xe1c   :  { %3216 = vmatprep.subr.mxu1 %v5316_v8 }
 0xe1d   :  { %3217 = vmatpush3.msra.mxu1 %v4436_v44  ;;  %v1878_v44 = vld [vmem:[#allocation4 + $0x25] sm:$0x1] }
 0xe1e   :  { %3218 = vmatprep.subr.mxu1 %v5316_v8 }
 0xe1f   :  { %3219 = vmatpush3.msra.mxu1 %v4440_v12 }
 0xe20   :  { %3220 = vmatprep.subr.mxu1 %v5316_v8  ;;  %v1880_v8 = vld [vmem:[#allocation4 + $0x35] sm:$0x1] }
 0xe21   :  { %3221 = vmatpush3.msra.mxu1 %v4444_v49 }
 0xeda   :  { %v1966_v24 = vpop.f32.mrf.mxu1 }
 0xedb   :  { %v1986_v27 = vadd.f32 %v1966_v24, %v1874_v13  ;;  %v1971_v7 = vrot.slane %v1966_v24, 1  ;;  %v1972_v63 = vrot.slane %v1966_v24, 2  ;;  %v1974_v50 = vrot.slane %v1966_v24, 4  ;;  %v1879_v13 = vld [vmem:[#allocation4 + $0x2d] sm:$0x1] }
 0xedc   :  { %v3202_v57 = vpop.f32.mrf.mxu1  ;;  %v1973_v48 = vrot.slane %v1966_v24, 3  ;;  %v1976_v12 = vrot.slane %v1966_v24, 6  ;;  %v1975_v49 = vrot.slane %v1966_v24, 5  ;;  %v1977_v29 = vrot.slane %v1966_v24, 7 }
 0xedd   :  { %3559 = vtanh.f32 %v1986_v27  ;;  %v1987_v9 = vadd.f32 %v1971_v7, %v1875_v55  ;;  %v1988_v51 = vadd.f32 %v1972_v63, %v1876_v53  ;;  %v1990_v0 = vadd.f32 %v1974_v50, %v1878_v44  ;;  %v1881_v7 = vld [vmem:[#allocation4 + $0x3d] sm:$0x1] }
 0xede   :  { %v1989_v52 = vadd.f32 %v1973_v48, %v1877_v56  ;;  %v1992_v14 = vadd.f32 %v1976_v12, %v1880_v8  ;;  %v1991_v3 = vadd.f32 %v1975_v49, %v1879_v13  ;;  %v1993_v55 = vadd.f32 %v1977_v29, %v1881_v7 }
 0xedf   :  { %3561 = vtanh.f32 %v1987_v9  ;;  %v3071_v56 = vmul.f32 -1.442695, %v1986_v27  ;;  %v3072_v12 = vmul.f32 -1.442695, %v1987_v9  ;;  %v3073_v8 = vmul.f32 -1.442695, %v1988_v51 }
 0xee0   :  { %3563 = vtanh.f32 %v1988_v51  ;;  %v3075_v49 = vmul.f32 -1.442695, %v1990_v0  ;;  %v3074_v13 = vmul.f32 -1.442695, %v1989_v52  ;;  %v3077_v7 = vmul.f32 -1.442695, %v1992_v14 }
 0xee1   :  { %3565 = vtanh.f32 %v1990_v0 }
 0xee2   :  { %3567 = vtanh.f32 %v1989_v52 }
 0xee3   :  { %3569 = vtanh.f32 %v1992_v14 }
 0xee4   :  { %3571 = vtanh.f32 %v1991_v3 }
 0xee5   :  { %3573 = vtanh.f32 %v1993_v55 }
 0xee6   :  { %3575 = vpow2.f32 %v3071_v56 }
 0xee7   :  { %3577 = vpow2.f32 %v3072_v12 }
 0xee8   :  { %3579 = vpow2.f32 %v3073_v8 }
 0xee9   :  { %3581 = vpow2.f32 %v3075_v49 }
 0xeea   :  { %v3560_v57 = vpop.eup %3559  ;;  %3583 = vpow2.f32 %v3074_v13 }
 0xeeb   :  { %2066 = vrot.lane.b32.xlu1 %v3560_v57, %s3913_s2  ;;  %3585 = vpow2.f32 %v3077_v7 }
 0xeec   :  { %v3562_v63 = vpop.eup %3561 }
 0xeed   :  { %v3564_v53 = vpop.eup %3563 }
 0xeee   :  { %2070 = vrot.lane.b32.xlu0 %v3564_v53, %s3913_s2  ;;  %v3566_v50 = vpop.eup %3565 }
 0xeef   :  { %2068 = vrot.lane.b32.xlu1 %v3562_v63, %s3913_s2  ;;  %v3568_v44 = vpop.eup %3567  ;;  %v3076_v63 = vmul.f32 -1.442695, %v1991_v3 }
 0xef0   :  { %v3570_v24 = vpop.eup %3569 }
 0xef1   :  { %v3572_v48 = vpop.eup %3571  ;;  %3587 = vpow2.f32 %v3076_v63 }
 0xef2   :  { %2072 = vrot.lane.b32.xlu0 %v3568_v44, %s3913_s2  ;;  %v3574_v29 = vpop.eup %3573 }
 0xef3   :  { %2074 = vrot.lane.b32.xlu1 %v3566_v50, %s3913_s2  ;;  %v3576_v57 = vpop.eup %3575  ;;  %v3078_v50 = vmul.f32 -1.442695, %v1993_v55 }
 0xef4   :  { %v2018_v53 = vadd.f32 1.0, %v3576_v57  ;;  %v3578_v44 = vpop.eup %3577 }
 0xef5   :  { %v3580_v27 = vpop.eup %3579 }
 0xef6   :  { %2076 = vrot.lane.b32.xlu0 %v3572_v48, %s3913_s2  ;;  %3589 = vrcp.f32 %v2018_v53  ;;  %v3582_v9 = vpop.eup %3581  ;;  %v2020_v51 = vadd.f32 1.0, %v3580_v27 }
 0xef7   :  { %2078 = vrot.lane.b32.xlu1 %v3570_v24, %s3913_s2  ;;  %3591 = vpow2.f32 %v3078_v50  ;;  %v2019_v24 = vadd.f32 1.0, %v3578_v44  ;;  %v3584_v48 = vpop.eup %3583  ;;  %v2022_v0 = vadd.f32 1.0, %v3582_v9 }
 0xef8   :  { %v3586_v52 = vpop.eup %3585 }
 0xef9   :  { %3593 = vrcp.f32 %v2019_v24  ;;  %v2024_v3 = vadd.f32 1.0, %v3586_v52 }
 0xefa   :  { %2080 = vrot.lane.b32.xlu0 %v3574_v29, %s3913_s2  ;;  %v2021_v29 = vadd.f32 1.0, %v3584_v48  ;;  %3595 = vrcp.f32 %v2020_v51 }
 0xefb   :  { %3597 = vrcp.f32 %v2022_v0 }
 0xefc   :  { %3599 = vrcp.f32 %v2021_v29 }
 0xefd   :  { %3601 = vrcp.f32 %v2024_v3 }
 0xefe   :  { %v3588_v14 = vpop.eup %3587 }
 0xeff   :  { %v2023_v55 = vadd.f32 1.0, %v3588_v14 }
 0xf01   :  { %3603 = vrcp.f32 %v2023_v55 }
 0xf03   :  { %v4732_v56 = vpop.eup %3589 }
 0xf04   :  { %v3592_v49 = vpop.eup %3591 }
 0xf05   :  { %v2025_v13 = vadd.f32 1.0, %v3592_v49 }
 0xf06   :  { %v4736_v57 = vpop.eup %3593 }
 0xf07   :  { %3605 = vrcp.f32 %v2025_v13  ;;  %v4738_v63 = vpop.eup %3595 }
 0xf08   :  { %v4743_v27 = vpop.eup %3597 }
 0xf09   :  { %v4746_v9 = vpop.eup %3599 }
 0xf0a   :  { %v4751_v52 = vpop.eup %3601 }
 0xf0e   :  { %v4754_v14 = vpop.eup %3603 }
 0xf5d   :  { %v2067_v12 = vpop.permute.xlu1 %2066 }
 0xf5e   :  { %v2090_v8 = vmul.f32 %v4732_v56, %v2067_v12 }
 0xf60   :  { %2106 = vrot.lane.b32.xlu1 %v2090_v8, %s3914_s3  ;;  %v2071_v53 = vpop.permute.xlu0 %2070  ;;  %v4760_v8 = vpop.eup %3605 }
 0xf61   :  { %v2069_v7 = vpop.permute.xlu1 %2068  ;;  %v2092_v44 = vmul.f32 %v4738_v63, %v2071_v53 }
 0xf62   :  { %v2091_v50 = vmul.f32 %v4736_v57, %v2069_v7  ;;  %v2050_v7 = vmul.f32 %v4732_v56, %v4628_v45  ;;  %v2054_v45 = vmul.f32 %v4743_v27, %v4645_v15  ;;  %v2055_v15 = vmul.f32 %v4754_v14, %v4658_v4 }
 0xf63   :  { %2110 = vrot.lane.b32.xlu0 %v2092_v44, %s3914_s3  ;;  %v2051_v44 = vmul.f32 %v4736_v57, %v4635_v11 }
 0xf64   :  { %2108 = vrot.lane.b32.xlu1 %v2091_v50, %s3914_s3  ;;  %v2073_v51 = vpop.permute.xlu0 %2072 }
 0xf65   :  { %v2075_v24 = vpop.permute.xlu1 %2074  ;;  %v2093_v0 = vmul.f32 %v4746_v9, %v2073_v51 }
 0xf66   :  { %v2094_v48 = vmul.f32 %v4743_v27, %v2075_v24  ;;  %v2052_v24 = vmul.f32 %v4738_v63, %v4637_v1 }
 0xf67   :  { %2112 = vrot.lane.b32.xlu0 %v2093_v0, %s3914_s3 }
 0xf68   :  { %2114 = vrot.lane.b32.xlu1 %v2094_v48, %s3914_s3  ;;  %v2077_v3 = vpop.permute.xlu0 %2076 }
 0xf69   :  { %v2079_v29 = vpop.permute.xlu1 %2078  ;;  %v2095_v55 = vmul.f32 %v4754_v14, %v2077_v3  ;;  %v2053_v3 = vmul.f32 %v4746_v9, %v4647_v17 }
 0xf6a   :  { %v2096_v12 = vmul.f32 %v4751_v52, %v2079_v29 }
 0xf6b   :  { %2116 = vrot.lane.b32.xlu0 %v2095_v55, %s3914_s3 }
 0xf6c   :  { %2118 = vrot.lane.b32.xlu1 %v2096_v12, %s3914_s3  ;;  %v2081_v49 = vpop.permute.xlu0 %2080 }
 0xf6d   :  { %v2097_v13 = vmul.f32 %v4760_v8, %v2081_v49 }
 0xf6f   :  { %2120 = vrot.lane.b32.xlu0 %v2097_v13, %s3914_s3  ;;  %v2056_v13 = vmul.f32 %v4751_v52, %v4656_v10  ;;  %v2057_v10 = vmul.f32 %v4760_v8, %v4664_v21 }
 0xfd2   :  { %v2107_v53 = vpop.permute.xlu1 %2106 }
 0xfd3   :  { %v4766_v50 = vadd.f32 %v2107_v53, %v2050_v7 }
 0xfd5   :  { %3607 = vtanh.f32 %v4766_v50  ;;  %v2111_v48 = vpop.permute.xlu0 %2110 }
 0xfd6   :  { %v2109_v51 = vpop.permute.xlu1 %2108  ;;  %v4775_v29 = vadd.f32 %v2111_v48, %v2052_v24 }
 0xfd7   :  { %v4773_v0 = vadd.f32 %v2109_v51, %v2051_v44 }
 0xfd9   :  { %3609 = vtanh.f32 %v4773_v0  ;;  %v2113_v12 = vpop.permute.xlu0 %2112 }
 0xfda   :  { %3611 = vtanh.f32 %v4775_v29  ;;  %v2115_v11 = vpop.permute.xlu1 %2114  ;;  %v4785_v1 = vadd.f32 %v2113_v12, %v2053_v3 }
 0xfdb   :  { %v4783_v55 = vadd.f32 %v2115_v11, %v2054_v45 }
 0xfdd   :  { %3613 = vtanh.f32 %v4783_v55  ;;  %v2117_v17 = vpop.permute.xlu0 %2116 }
 0xfde   :  { %3615 = vtanh.f32 %v4785_v1  ;;  %v2119_v7 = vpop.permute.xlu1 %2118  ;;  %v4796_v44 = vadd.f32 %v2117_v17, %v2055_v15 }
 0xfdf   :  { %v4794_v53 = vadd.f32 %v2119_v7, %v2056_v13 }
 0xfe1   :  { %3617 = vtanh.f32 %v4794_v53  ;;  %v2121_v24 = vpop.permute.xlu0 %2120 }
 0xfe2   :  { %v3608_v49 = vpop.eup %3607  ;;  %3619 = vtanh.f32 %v4796_v44  ;;  %v4802_v51 = vadd.f32 %v2121_v24, %v2057_v10 }
 0xfe3   :  { %2154 = vrot.lane.b32.xlu1 %v3608_v49, %s3913_s2 }
 0xfe4   :  { %3621 = vtanh.f32 %v4802_v51 }
 0xfe6   :  { %v3610_v48 = vpop.eup %3609 }
 0xfe7   :  { %v3612_v4 = vpop.eup %3611  ;;  %2156 = vrot.lane.b32.xlu1 %v3610_v48, %s3913_s2 }
 0xfe8   :  { %2158 = vrot.lane.b32.xlu0 %v3612_v4, %s3913_s2 }
 0xfea   :  { %v3614_v45 = vpop.eup %3613 }
 0xfeb   :  { %v3616_v3 = vpop.eup %3615  ;;  %2162 = vrot.lane.b32.xlu1 %v3614_v45, %s3913_s2 }
 0xfec   :  { %2160 = vrot.lane.b32.xlu0 %v3616_v3, %s3913_s2 }
 0xfee   :  { %v3618_v11 = vpop.eup %3617 }
 0xfef   :  { %v3620_v12 = vpop.eup %3619  ;;  %2166 = vrot.lane.b32.xlu1 %v3618_v11, %s3913_s2 }
 0xff0   :  { %2164 = vrot.lane.b32.xlu0 %v3620_v12, %s3913_s2 }
 0xff1   :  { %v3622_v21 = vpop.eup %3621 }
 0xff4   :  { %2168 = vrot.lane.b32.xlu0 %v3622_v21, %s3913_s2 }
0x1055   :  { %v2155_v49 = vpop.permute.xlu1 %2154 }
0x1056   :  { %v4819_v10 = vmul.f32 %v4732_v56, %v2155_v49 }
0x1058   :  { %5319 = vst [vmem:[#allocation29_spill] sm:$0xff] %v4819_v10 }
0x1059   :  { %v2157_v13 = vpop.permute.xlu1 %2156 }
0x105a   :  { %v2159_v15 = vpop.permute.xlu0 %2158  ;;  %v4813_v7 = vmul.f32 %v4736_v57, %v2157_v13 }
0x105b   :  { %v4816_v17 = vmul.f32 %v4738_v63, %v2159_v15 }
0x105c   :  { %5317 = vst [vmem:[#allocation27_spill] sm:$0xff] %v4813_v7  ;;  %v2234_v24 = vrot.slane %v4813_v7, 7 }
0x105d   :  { %5318 = vst [vmem:[#allocation28_spill] sm:$0xff] %v4816_v17  ;;  %v2163_v48 = vpop.permute.xlu1 %2162  ;;  %v2236_v4 = vrot.slane %v4816_v17, 6  ;;  %v2232_v17 = vld [vmem:[#allocation4 + $0x36] sm:$0x1] }
0x105e   :  { %v2235_v45 = vsel %vm468_vm2, %v2234_v24, %v4819_v10  ;;  %v2161_v3 = vpop.permute.xlu0 %2160  ;;  %v4826_v11 = vmul.f32 %v4743_v27, %v2163_v48 }
0x105f   :  { %v4829_v57 = vmul.f32 %v4746_v9, %v2161_v3  ;;  %v2237_v63 = vsel %vm471_vm3, %v2236_v4, %v2235_v45 }
0x1060   :  { %5320 = vst [vmem:[#allocation30_spill] sm:$0xff] %v4826_v11  ;;  %v2240_v56 = vrot.slane %v4826_v11, 4 }
0x1061   :  { %5321 = vst [vmem:[#allocation31_spill] sm:$0xff] %v4829_v57  ;;  %v2238_v12 = vrot.slane %v4829_v57, 5  ;;  %v2167_v21 = vpop.permute.xlu1 %2166 }
0x1062   :  { %v2165_v49 = vpop.permute.xlu0 %2164  ;;  %v4835_v13 = vmul.f32 %v4751_v52, %v2167_v21 }
0x1063   :  { %v2239_v15 = vsel %vm474_vm4, %v2238_v12, %v2237_v63  ;;  %v4839_v24 = vmul.f32 %v4754_v14, %v2165_v49 }
0x1064   :  { %5322 = vst [vmem:[#allocation32_spill] sm:$0xff] %v4835_v13  ;;  %v2241_v27 = vsel %vm477_vm5, %v2240_v56, %v2239_v15  ;;  %v2244_v9 = vrot.slane %v4835_v13, 2  ;;  %v2226_v56 = vld [vmem:[#allocation4 + $0x6] sm:$0x1] }
0x1065   :  { %5323 = vst [vmem:[#allocation33_spill] sm:$0xff] %v4839_v24  ;;  %v2242_v48 = vrot.slane %v4839_v24, 3 }
0x1066   :  { %v2169_v4 = vpop.permute.xlu0 %2168 }
0x1067   :  { %v4845_v45 = vmul.f32 %v4760_v8, %v2169_v4  ;;  %v2243_v3 = vsel %vm480_vm6, %v2242_v48, %v2241_v27  ;;  %v2227_v4 = vld [vmem:[#allocation4 + $0xe] sm:$0x1]  ;;  %v2228_v27 = vld [vmem:[#allocation4 + $0x16] sm:$0x1] }
0x1068   :  { %v2245_v52 = vsel %vm483_vm7, %v2244_v9, %v2243_v3  ;;  %v2230_v3 = vld [vmem:[#allocation4 + $0x26] sm:$0x1] }
0x1069   :  { %5324 = vst [vmem:[#allocation34_spill] sm:$0xff] %v4845_v45  ;;  %v2246_v21 = vrot.slane %v4845_v45, 1 }
0x106b   :  { %v2247_v63 = vsel %vm486_vm8, %v2246_v21, %v2245_v52  ;;  %v2229_v52 = vld [vmem:[#allocation4 + $0x1e] sm:$0x1] }
0x106c   :  { %2248 = vrot.lane.b32.xlu1 %v2247_v63, %s3914_s3 }
0x10de   :  { %v2249_v14 = vpop.permute.xlu1 %2248 }
0x10df   :  { %3212 = vmatmul.mubr.msk.f32.vlgmr.msra.gmra.mxu0 %vm78_vm1, %v2249_v14 }
0x119f   :  { %v2318_v12 = vpop.f32.mrf.mxu0 }
0x11a0   :  { %v2338_v49 = vadd.f32 %v2318_v12, %v2226_v56  ;;  %v2323_v8 = vrot.slane %v2318_v12, 1  ;;  %v2324_v13 = vrot.slane %v2318_v12, 2  ;;  %v2326_v48 = vrot.slane %v2318_v12, 4  ;;  %v2231_v56 = vld [vmem:[#allocation4 + $0x2e] sm:$0x1] }
0x11a1   :  { %v3213_v15 = vpop.f32.mrf.mxu0  ;;  %v2325_v11 = vrot.slane %v2318_v12, 3  ;;  %v2328_v21 = vrot.slane %v2318_v12, 6  ;;  %v2327_v14 = vrot.slane %v2318_v12, 5  ;;  %v2329_v57 = vrot.slane %v2318_v12, 7 }
0x11a2   :  { %3623 = vtanh.f32 %v2338_v49  ;;  %v2339_v9 = vadd.f32 %v2323_v8, %v2227_v4  ;;  %v2340_v45 = vadd.f32 %v2324_v13, %v2228_v27  ;;  %v2342_v63 = vadd.f32 %v2326_v48, %v2230_v3  ;;  %v2233_v8 = vld [vmem:[#allocation4 + $0x3e] sm:$0x1] }
0x11a3   :  { %v2341_v24 = vadd.f32 %v2325_v11, %v2229_v52  ;;  %v2344_v10 = vadd.f32 %v2328_v21, %v2232_v17  ;;  %v2343_v7 = vadd.f32 %v2327_v14, %v2231_v56  ;;  %v2345_v13 = vadd.f32 %v2329_v57, %v2233_v8 }
0x11a4   :  { %3625 = vtanh.f32 %v2339_v9  ;;  %v3080_v3 = vmul.f32 -1.442695, %v2338_v49  ;;  %v3081_v52 = vmul.f32 -1.442695, %v2339_v9  ;;  %v3082_v21 = vmul.f32 -1.442695, %v2340_v45 }
0x11a5   :  { %3627 = vtanh.f32 %v2340_v45  ;;  %v3084_v14 = vmul.f32 -1.442695, %v2342_v63  ;;  %v3083_v56 = vmul.f32 -1.442695, %v2341_v24  ;;  %v3086_v8 = vmul.f32 -1.442695, %v2344_v10 }
0x11a6   :  { %3629 = vtanh.f32 %v2342_v63 }
0x11a7   :  { %3631 = vtanh.f32 %v2341_v24 }
0x11a8   :  { %3633 = vtanh.f32 %v2344_v10 }
0x11a9   :  { %3635 = vtanh.f32 %v2343_v7 }
0x11aa   :  { %3637 = vtanh.f32 %v2345_v13 }
0x11ab   :  { %3639 = vpow2.f32 %v3080_v3 }
0x11ac   :  { %3641 = vpow2.f32 %v3081_v52 }
0x11ad   :  { %3643 = vpow2.f32 %v3082_v21 }
0x11ae   :  { %3645 = vpow2.f32 %v3084_v14 }
0x11af   :  { %v3624_v15 = vpop.eup %3623  ;;  %3647 = vpow2.f32 %v3083_v56 }
0x11b0   :  { %2418 = vrot.lane.b32.xlu0 %v3624_v15, %s3913_s2  ;;  %3649 = vpow2.f32 %v3086_v8 }
0x11b1   :  { %v3626_v4 = vpop.eup %3625 }
0x11b2   :  { %v3628_v27 = vpop.eup %3627 }
0x11b3   :  { %2422 = vrot.lane.b32.xlu1 %v3628_v27, %s3913_s2  ;;  %v3630_v11 = vpop.eup %3629 }
0x11b4   :  { %2420 = vrot.lane.b32.xlu0 %v3626_v4, %s3913_s2  ;;  %v3632_v48 = vpop.eup %3631  ;;  %v3085_v4 = vmul.f32 -1.442695, %v2343_v7 }
0x11b5   :  { %v3634_v17 = vpop.eup %3633 }
0x11b6   :  { %v3636_v12 = vpop.eup %3635  ;;  %3651 = vpow2.f32 %v3085_v4 }
0x11b7   :  { %2424 = vrot.lane.b32.xlu1 %v3632_v48, %s3913_s2  ;;  %v3638_v57 = vpop.eup %3637 }
0x11b8   :  { %2426 = vrot.lane.b32.xlu0 %v3630_v11, %s3913_s2  ;;  %v3640_v15 = vpop.eup %3639  ;;  %v3087_v11 = vmul.f32 -1.442695, %v2345_v13 }
0x11b9   :  { %v2370_v27 = vadd.f32 1.0, %v3640_v15  ;;  %v3642_v48 = vpop.eup %3641 }
0x11ba   :  { %v3644_v49 = vpop.eup %3643 }
0x11bb   :  { %2428 = vrot.lane.b32.xlu1 %v3636_v12, %s3913_s2  ;;  %3653 = vrcp.f32 %v2370_v27  ;;  %v3646_v9 = vpop.eup %3645  ;;  %v2372_v45 = vadd.f32 1.0, %v3644_v49 }
0x11bc   :  { %2430 = vrot.lane.b32.xlu0 %v3634_v17, %s3913_s2  ;;  %3655 = vpow2.f32 %v3087_v11  ;;  %v2371_v17 = vadd.f32 1.0, %v3642_v48  ;;  %v3648_v12 = vpop.eup %3647  ;;  %v2374_v63 = vadd.f32 1.0, %v3646_v9 }
0x11bd   :  { %v3650_v24 = vpop.eup %3649 }
0x11be   :  { %3657 = vrcp.f32 %v2371_v17  ;;  %v2376_v7 = vadd.f32 1.0, %v3650_v24 }
0x11bf   :  { %2432 = vrot.lane.b32.xlu1 %v3638_v57, %s3913_s2  ;;  %v2373_v57 = vadd.f32 1.0, %v3648_v12  ;;  %3659 = vrcp.f32 %v2372_v45 }
0x11c0   :  { %3661 = vrcp.f32 %v2374_v63 }
0x11c1   :  { %3663 = vrcp.f32 %v2373_v57 }
0x11c2   :  { %3665 = vrcp.f32 %v2376_v7 }
0x11c3   :  { %v3652_v10 = vpop.eup %3651 }
0x11c4   :  { %v2375_v13 = vadd.f32 1.0, %v3652_v10 }
0x11c6   :  { %3667 = vrcp.f32 %v2375_v13 }
0x11c8   :  { %v4861_v3 = vpop.eup %3653 }
0x11c9   :  { %v3656_v14 = vpop.eup %3655 }
0x11ca   :  { %v2377_v56 = vadd.f32 1.0, %v3656_v14 }
0x11cb   :  { %v4865_v15 = vpop.eup %3657 }
0x11cc   :  { %3669 = vrcp.f32 %v2377_v56  ;;  %v4867_v4 = vpop.eup %3659 }
0x11cd   :  { %v4872_v49 = vpop.eup %3661 }
0x11ce   :  { %v4875_v9 = vpop.eup %3663 }
0x11cf   :  { %v4880_v24 = vpop.eup %3665 }
0x11d3   :  { %v4883_v10 = vpop.eup %3667 }
0x1222   :  { %v2419_v52 = vpop.permute.xlu0 %2418 }
0x1223   :  { %v2442_v21 = vmul.f32 %v4861_v3, %v2419_v52 }
0x1225   :  { %2458 = vrot.lane.b32.xlu0 %v2442_v21, %s3914_s3  ;;  %v2423_v27 = vpop.permute.xlu1 %2422  ;;  %v4889_v21 = vpop.eup %3669 }
0x1226   :  { %v2421_v8 = vpop.permute.xlu0 %2420  ;;  %v2444_v48 = vmul.f32 %v4867_v4, %v2423_v27 }
0x1227   :  { %v2443_v11 = vmul.f32 %v4865_v15, %v2421_v8  ;;  %v2402_v8 = vmul.f32 %v4861_v3, %v4766_v50  ;;  %v2406_v50 = vmul.f32 %v4872_v49, %v4783_v55  ;;  %v2407_v55 = vmul.f32 %v4883_v10, %v4796_v44 }
0x1228   :  { %2462 = vrot.lane.b32.xlu1 %v2444_v48, %s3914_s3  ;;  %v2403_v48 = vmul.f32 %v4865_v15, %v4773_v0 }
0x1229   :  { %2460 = vrot.lane.b32.xlu0 %v2443_v11, %s3914_s3  ;;  %v2425_v45 = vpop.permute.xlu1 %2424 }
0x122a   :  { %v2427_v17 = vpop.permute.xlu0 %2426  ;;  %v2445_v63 = vmul.f32 %v4875_v9, %v2425_v45 }
0x122b   :  { %v2446_v12 = vmul.f32 %v4872_v49, %v2427_v17  ;;  %v2404_v17 = vmul.f32 %v4867_v4, %v4775_v29 }
0x122c   :  { %2464 = vrot.lane.b32.xlu1 %v2445_v63, %s3914_s3 }
0x122d   :  { %2466 = vrot.lane.b32.xlu0 %v2446_v12, %s3914_s3  ;;  %v2429_v7 = vpop.permute.xlu1 %2428 }
0x122e   :  { %v2431_v57 = vpop.permute.xlu0 %2430  ;;  %v2447_v13 = vmul.f32 %v4883_v10, %v2429_v7  ;;  %v2405_v7 = vmul.f32 %v4875_v9, %v4785_v1 }
0x122f   :  { %v2448_v52 = vmul.f32 %v4880_v24, %v2431_v57 }
0x1230   :  { %2468 = vrot.lane.b32.xlu1 %v2447_v13, %s3914_s3 }
0x1231   :  { %2470 = vrot.lane.b32.xlu0 %v2448_v52, %s3914_s3  ;;  %v2433_v14 = vpop.permute.xlu1 %2432 }
0x1232   :  { %v2449_v56 = vmul.f32 %v4889_v21, %v2433_v14 }
0x1234   :  { %2472 = vrot.lane.b32.xlu1 %v2449_v56, %s3914_s3  ;;  %v2408_v56 = vmul.f32 %v4880_v24, %v4794_v53  ;;  %v2409_v53 = vmul.f32 %v4889_v21, %v4802_v51 }
0x1297   :  { %v2459_v27 = vpop.permute.xlu0 %2458 }
0x1298   :  { %v4895_v11 = vadd.f32 %v2459_v27, %v2402_v8 }
0x129a   :  { %3671 = vtanh.f32 %v4895_v11  ;;  %v2463_v12 = vpop.permute.xlu1 %2462 }
0x129b   :  { %v2461_v45 = vpop.permute.xlu0 %2460  ;;  %v4904_v57 = vadd.f32 %v2463_v12, %v2404_v17 }
0x129c   :  { %v4902_v63 = vadd.f32 %v2461_v45, %v2403_v48 }
0x129e   :  { %3673 = vtanh.f32 %v4902_v63  ;;  %v2465_v52 = vpop.permute.xlu1 %2464 }
0x129f   :  { %3675 = vtanh.f32 %v4904_v57  ;;  %v2467_v0 = vpop.permute.xlu0 %2466  ;;  %v4914_v29 = vadd.f32 %v2465_v52, %v2405_v7 }
0x12a0   :  { %v4912_v13 = vadd.f32 %v2467_v0, %v2406_v50 }
0x12a2   :  { %3677 = vtanh.f32 %v4912_v13  ;;  %v2469_v1 = vpop.permute.xlu1 %2468 }
0x12a3   :  { %3679 = vtanh.f32 %v4914_v29  ;;  %v2471_v8 = vpop.permute.xlu0 %2470  ;;  %v4925_v48 = vadd.f32 %v2469_v1, %v2407_v55 }
0x12a4   :  { %v4923_v27 = vadd.f32 %v2471_v8, %v2408_v56 }
0x12a6   :  { %3681 = vtanh.f32 %v4923_v27  ;;  %v2473_v17 = vpop.permute.xlu1 %2472 }
0x12a7   :  { %v3672_v14 = vpop.eup %3671  ;;  %3683 = vtanh.f32 %v4925_v48  ;;  %v4931_v45 = vadd.f32 %v2473_v17, %v2409_v53 }
0x12a8   :  { %2506 = vrot.lane.b32.xlu0 %v3672_v14, %s3913_s2 }
0x12a9   :  { %3685 = vtanh.f32 %v4931_v45 }
0x12ab   :  { %v3674_v12 = vpop.eup %3673 }
0x12ac   :  { %v3676_v44 = vpop.eup %3675  ;;  %2508 = vrot.lane.b32.xlu0 %v3674_v12, %s3913_s2 }
0x12ad   :  { %2510 = vrot.lane.b32.xlu1 %v3676_v44, %s3913_s2 }
0x12af   :  { %v3678_v50 = vpop.eup %3677 }
0x12b0   :  { %v3680_v7 = vpop.eup %3679  ;;  %2514 = vrot.lane.b32.xlu0 %v3678_v50, %s3913_s2 }
0x12b1   :  { %2512 = vrot.lane.b32.xlu1 %v3680_v7, %s3913_s2 }
0x12b3   :  { %v3682_v0 = vpop.eup %3681 }
0x12b4   :  { %v3684_v52 = vpop.eup %3683  ;;  %2518 = vrot.lane.b32.xlu0 %v3682_v0, %s3913_s2 }
0x12b5   :  { %2516 = vrot.lane.b32.xlu1 %v3684_v52, %s3913_s2 }
0x12b6   :  { %v3686_v51 = vpop.eup %3685 }
0x12b9   :  { %2520 = vrot.lane.b32.xlu1 %v3686_v51, %s3913_s2 }
0x131a   :  { %v2507_v14 = vpop.permute.xlu0 %2506 }
0x131b   :  { %v4948_v53 = vmul.f32 %v4861_v3, %v2507_v14 }
0x131d   :  { %5327 = vst [vmem:[#allocation37_spill] sm:$0xff] %v4948_v53 }
0x131e   :  { %v2509_v56 = vpop.permute.xlu0 %2508 }
0x131f   :  { %v2511_v55 = vpop.permute.xlu1 %2510  ;;  %v4942_v8 = vmul.f32 %v4865_v15, %v2509_v56 }
0x1320   :  { %v4945_v1 = vmul.f32 %v4867_v4, %v2511_v55 }
0x1321   :  { %5325 = vst [vmem:[#allocation35_spill] sm:$0xff] %v4942_v8  ;;  %v2586_v17 = vrot.slane %v4942_v8, 7 }
0x1322   :  { %5326 = vst [vmem:[#allocation36_spill] sm:$0xff] %v4945_v1  ;;  %v2515_v12 = vpop.permute.xlu0 %2514  ;;  %v2588_v44 = vrot.slane %v4945_v1, 6  ;;  %v2584_v1 = vld [vmem:[#allocation4 + $0x37] sm:$0x1] }
0x1323   :  { %v2587_v50 = vsel %vm468_vm2, %v2586_v17, %v4948_v53  ;;  %v2513_v7 = vpop.permute.xlu1 %2512  ;;  %v4955_v0 = vmul.f32 %v4872_v49, %v2515_v12 }
0x1324   :  { %v4958_v15 = vmul.f32 %v4875_v9, %v2513_v7  ;;  %v2589_v4 = vsel %vm471_vm3, %v2588_v44, %v2587_v50 }
0x1325   :  { %5328 = vst [vmem:[#allocation38_spill] sm:$0xff] %v4955_v0  ;;  %v2592_v3 = vrot.slane %v4955_v0, 4 }
0x1326   :  { %5329 = vst [vmem:[#allocation39_spill] sm:$0xff] %v4958_v15  ;;  %v2590_v52 = vrot.slane %v4958_v15, 5  ;;  %v2519_v51 = vpop.permute.xlu0 %2518 }
0x1327   :  { %v2517_v14 = vpop.permute.xlu1 %2516  ;;  %v4964_v56 = vmul.f32 %v4880_v24, %v2519_v51 }
0x1328   :  { %v2591_v55 = vsel %vm474_vm4, %v2590_v52, %v2589_v4  ;;  %v4968_v17 = vmul.f32 %v4883_v10, %v2517_v14 }
0x1329   :  { %5330 = vst [vmem:[#allocation40_spill] sm:$0xff] %v4964_v56  ;;  %v2593_v49 = vsel %vm477_vm5, %v2592_v3, %v2591_v55  ;;  %v2596_v9 = vrot.slane %v4964_v56, 2  ;;  %v2578_v3 = vld [vmem:[#allocation4 + $0x7] sm:$0x1] }
0x132a   :  { %5331 = vst [vmem:[#allocation41_spill] sm:$0xff] %v4968_v17  ;;  %v2594_v12 = vrot.slane %v4968_v17, 3 }
0x132b   :  { %v2521_v44 = vpop.permute.xlu1 %2520 }
0x132c   :  { %v2595_v50 = vsel %vm480_vm6, %v2594_v12, %v2593_v49  ;;  %v4975_v7 = vmul.f32 %v4889_v21, %v2521_v44  ;;  %v2579_v12 = vld [vmem:[#allocation4 + $0xf] sm:$0x1]  ;;  %v2580_v44 = vld [vmem:[#allocation4 + $0x17] sm:$0x1] }
0x132d   :  { %v2597_v24 = vsel %vm483_vm7, %v2596_v9, %v2595_v50  ;;  %v2582_v50 = vld [vmem:[#allocation4 + $0x27] sm:$0x1] }
0x132e   :  { %5332 = vst [vmem:[#allocation42_spill] sm:$0xff] %v4975_v7  ;;  %v2598_v51 = vrot.slane %v4975_v7, 1 }
0x1330   :  { %v2599_v4 = vsel %vm486_vm8, %v2598_v51, %v2597_v24  ;;  %v2581_v24 = vld [vmem:[#allocation4 + $0x1f] sm:$0x1] }
0x1331   :  { %2600 = vrot.lane.b32.xlu0 %v2599_v4, %s3914_s3 }
0x13a3   :  { %v2601_v10 = vpop.permute.xlu0 %2600 }
0x13a4   :  { %3223 = vmatmul.mubr.msk.f32.vlgmr.msra.gmra.mxu1 %vm78_vm1, %v2601_v10 }
0x1464   :  { %v2670_v52 = vpop.f32.mrf.mxu1 }
0x1465   :  { %v2690_v14 = vadd.f32 %v2670_v52, %v2578_v3  ;;  %v2675_v49 = vrot.slane %v2670_v52, 1  ;;  %v2676_v21 = vrot.slane %v2670_v52, 2  ;;  %v2678_v56 = vrot.slane %v2670_v52, 4  ;;  %v2583_v3 = vld [vmem:[#allocation4 + $0x2f] sm:$0x1] }
0x1466   :  { %v3224_v55 = vpop.f32.mrf.mxu1  ;;  %v2677_v0 = vrot.slane %v2670_v52, 3  ;;  %v2680_v51 = vrot.slane %v2670_v52, 6  ;;  %v2679_v10 = vrot.slane %v2670_v52, 5  ;;  %v2681_v15 = vrot.slane %v2670_v52, 7 }
0x1467   :  { %3687 = vtanh.f32 %v2690_v14  ;;  %v2691_v9 = vadd.f32 %v2675_v49, %v2579_v12  ;;  %v2692_v7 = vadd.f32 %v2676_v21, %v2580_v44  ;;  %v2694_v4 = vadd.f32 %v2678_v56, %v2582_v50  ;;  %v2585_v49 = vld [vmem:[#allocation4 + $0x3f] sm:$0x1] }
0x1468   :  { %v2693_v17 = vadd.f32 %v2677_v0, %v2581_v24  ;;  %v2696_v53 = vadd.f32 %v2680_v51, %v2584_v1  ;;  %v2695_v8 = vadd.f32 %v2679_v10, %v2583_v3  ;;  %v2697_v12 = vadd.f32 %v2681_v15, %v2585_v49 }
0x1469   :  { %3689 = vtanh.f32 %v2691_v9  ;;  %v3089_v50 = vmul.f32 -1.442695, %v2690_v14  ;;  %v3090_v24 = vmul.f32 -1.442695, %v2691_v9  ;;  %v3091_v51 = vmul.f32 -1.442695, %v2692_v7 }
0x146a   :  { %3691 = vtanh.f32 %v2692_v7  ;;  %v3093_v10 = vmul.f32 -1.442695, %v2694_v4  ;;  %v3092_v3 = vmul.f32 -1.442695, %v2693_v17  ;;  %v3094_v49 = vmul.f32 -1.442695, %v2695_v8 }
0x146b   :  { %3693 = vtanh.f32 %v2694_v4 }
0x146c   :  { %3695 = vtanh.f32 %v2693_v17 }
0x146d   :  { %3697 = vtanh.f32 %v2696_v53 }
0x146e   :  { %3699 = vtanh.f32 %v2695_v8 }
0x146f   :  { %3701 = vtanh.f32 %v2697_v12 }
0x1470   :  { %3703 = vpow2.f32 %v3089_v50 }
0x1471   :  { %3705 = vpow2.f32 %v3090_v24 }
0x1472   :  { %3707 = vpow2.f32 %v3091_v51 }
0x1473   :  { %3709 = vpow2.f32 %v3093_v10 }
0x1474   :  { %v3688_v55 = vpop.eup %3687  ;;  %3711 = vpow2.f32 %v3092_v3 }
0x1475   :  { %2770 = vrot.lane.b32.xlu1 %v3688_v55, %s3913_s2  ;;  %v3095_v55 = vmul.f32 -1.442695, %v2696_v53 }
0x1476   :  { %v3690_v21 = vpop.eup %3689 }
0x1477   :  { %v3692_v56 = vpop.eup %3691  ;;  %3713 = vpow2.f32 %v3095_v55 }
0x1478   :  { %2774 = vrot.lane.b32.xlu0 %v3692_v56, %s3913_s2  ;;  %v3694_v0 = vpop.eup %3693  ;;  %3715 = vpow2.f32 %v3094_v49 }
0x1479   :  { %2772 = vrot.lane.b32.xlu1 %v3690_v21, %s3913_s2  ;;  %v3696_v44 = vpop.eup %3695 }
0x147a   :  { %v3698_v1 = vpop.eup %3697 }
0x147b   :  { %v3700_v52 = vpop.eup %3699 }
0x147c   :  { %2776 = vrot.lane.b32.xlu0 %v3696_v44, %s3913_s2  ;;  %v3702_v15 = vpop.eup %3701 }
0x147d   :  { %2778 = vrot.lane.b32.xlu1 %v3694_v0, %s3913_s2 }
0x1480   :  { %2780 = vrot.lane.b32.xlu0 %v3700_v52, %s3913_s2 }
0x1481   :  { %2782 = vrot.lane.b32.xlu1 %v3698_v1, %s3913_s2 }
0x1484   :  { %2784 = vrot.lane.b32.xlu0 %v3702_v15, %s3913_s2 }
0x1485   :  { %426 = vrot.lane.b32.xlu1 %v4120_v35, %s3914_s3  ;;  %v3704_v35 = vpop.eup %3703 }
0x1486   :  { %v3706_v21 = vpop.eup %3705 }
0x1487   :  { %v2723_v14 = vadd.f32 1.0, %v3706_v21 }
0x1488   :  { %428 = vrot.lane.b32.xlu0 %v4112_v25, %s3914_s3  ;;  %v3096_v25 = vmul.f32 -1.442695, %v2697_v12 }
0x1489   :  { %430 = vrot.lane.b32.xlu1 %v4115_v28, %s3914_s3  ;;  %v2722_v28 = vadd.f32 1.0, %v3704_v35 }
0x148b   :  { %3717 = vrcp.f32 %v2722_v28 }
0x148c   :  { %432 = vrot.lane.b32.xlu0 %v4123_v37, %s3914_s3  ;;  %3719 = vpow2.f32 %v3096_v25  ;;  %v3708_v37 = vpop.eup %3707 }
0x148d   :  { %v3710_v9 = vpop.eup %3709  ;;  %v2724_v7 = vadd.f32 1.0, %v3708_v37  ;;  %3721 = vrcp.f32 %v2723_v14 }
0x148e   :  { %v3712_v56 = vpop.eup %3711  ;;  %v2726_v4 = vadd.f32 1.0, %v3710_v9 }
0x148f   :  { %v3714_v17 = vpop.eup %3713  ;;  %v2725_v0 = vadd.f32 1.0, %v3712_v56  ;;  %3723 = vrcp.f32 %v2724_v7 }
0x1490   :  { %v3716_v53 = vpop.eup %3715  ;;  %v2728_v8 = vadd.f32 1.0, %v3714_v17  ;;  %3725 = vrcp.f32 %v2726_v4 }
0x1491   :  { %v2727_v12 = vadd.f32 1.0, %v3716_v53  ;;  %3727 = vrcp.f32 %v2725_v0 }
0x1492   :  { %3729 = vrcp.f32 %v2728_v8 }
0x1493   :  { %3731 = vrcp.f32 %v2727_v12 }
0x1498   :  { %v4998_v44 = vpop.eup %3717 }
0x1499   :  { %v3720_v15 = vpop.eup %3719 }
0x149a   :  { %v2729_v50 = vadd.f32 1.0, %v3720_v15  ;;  %v5002_v24 = vpop.eup %3721 }
0x149c   :  { %3733 = vrcp.f32 %v2729_v50  ;;  %v5004_v10 = vpop.eup %3723 }
0x149d   :  { %v5009_v49 = vpop.eup %3725 }
0x149e   :  { %v5012_v25 = vpop.eup %3727 }
0x149f   :  { %v5017_v9 = vpop.eup %3729 }
0x14a0   :  { %v5020_v56 = vpop.eup %3731 }
0x14a9   :  { %v5026_v8 = vpop.eup %3733 }
0x14e7   :  { %v2771_v1 = vpop.permute.xlu1 %2770 }
0x14e8   :  { %v2794_v52 = vmul.f32 %v4998_v44, %v2771_v1 }
0x14ea   :  { %2810 = vrot.lane.b32.xlu1 %v2794_v52, %s3914_s3  ;;  %v2775_v3 = vpop.permute.xlu0 %2774 }
0x14eb   :  { %v2773_v51 = vpop.permute.xlu1 %2772  ;;  %v2796_v55 = vmul.f32 %v5004_v10, %v2775_v3 }
0x14ec   :  { %v2795_v35 = vmul.f32 %v5002_v24, %v2773_v51 }
0x14ed   :  { %2814 = vrot.lane.b32.xlu0 %v2796_v55, %s3914_s3 }
0x14ee   :  { %2812 = vrot.lane.b32.xlu1 %v2795_v35, %s3914_s3  ;;  %v2777_v21 = vpop.permute.xlu0 %2776 }
0x14ef   :  { %v2779_v28 = vpop.permute.xlu1 %2778  ;;  %v2797_v14 = vmul.f32 %v5012_v25, %v2777_v21 }
0x14f0   :  { %v2798_v37 = vmul.f32 %v5009_v49, %v2779_v28 }
0x14f1   :  { %2816 = vrot.lane.b32.xlu0 %v2797_v14, %s3914_s3 }
0x14f2   :  { %2818 = vrot.lane.b32.xlu1 %v2798_v37, %s3914_s3  ;;  %v2781_v4 = vpop.permute.xlu0 %2780 }
0x14f3   :  { %v2783_v7 = vpop.permute.xlu1 %2782  ;;  %v2799_v0 = vmul.f32 %v5020_v56, %v2781_v4 }
0x14f4   :  { %v2800_v17 = vmul.f32 %v5017_v9, %v2783_v7 }
0x14f5   :  { %2820 = vrot.lane.b32.xlu0 %v2799_v0, %s3914_s3 }
0x14f6   :  { %2822 = vrot.lane.b32.xlu1 %v2800_v17, %s3914_s3  ;;  %v2785_v1 = vpop.permute.xlu0 %2784 }
0x14f7   :  { %v427_v53 = vpop.permute.xlu1 %426  ;;  %v2801_v12 = vmul.f32 %v5026_v8, %v2785_v1 }
0x14f8   :  { %451 = vst.msk [vmem:[#allocation12] sm:$0x1] %vm450_vm9, %v427_v53 }
0x14f9   :  { %2824 = vrot.lane.b32.xlu0 %v2801_v12, %s3914_s3 }
0x14fa   :  { %434 = vrot.lane.b32.xlu1 %v4126_v20, %s3914_s3  ;;  %v429_v15 = vpop.permute.xlu0 %428  ;;  %v5333_v20 = vld [vmem:[#allocation21_spill] sm:$0xff] }
0x14fb   :  { %v431_v52 = vpop.permute.xlu1 %430  ;;  %452 = vst.msk [vmem:[#allocation12 + $0x8] sm:$0x1] %vm450_vm9, %v429_v15 }
0x14fc   :  { %453 = vst.msk [vmem:[#allocation12 + $0x10] sm:$0x1] %vm450_vm9, %v431_v52 }
0x14fd   :  { %436 = vrot.lane.b32.xlu0 %v4134_v42, %s3914_s3  ;;  %v5334_v42 = vld [vmem:[#allocation22_spill] sm:$0xff] }
0x14fe   :  { %438 = vrot.lane.b32.xlu1 %v4138_v26, %s3914_s3  ;;  %v433_v50 = vpop.permute.xlu0 %432  ;;  %v2754_v26 = vmul.f32 %v4998_v44, %v4895_v11 }
0x14ff   :  { %454 = vst.msk [vmem:[#allocation12 + $0x18] sm:$0x1] %vm450_vm9, %v433_v50 }
0x1501   :  { %440 = vrot.lane.b32.xlu0 %v4143_v47, %s3914_s3 }
0x1502   :  { %786 = vrot.lane.b32.xlu1 %v4257_v40, %s3914_s3  ;;  %v2756_v40 = vmul.f32 %v5004_v10, %v4904_v57 }
0x1505   :  { %788 = vrot.lane.b32.xlu0 %v4251_v23, %s3914_s3 }
0x1506   :  { %790 = vrot.lane.b32.xlu1 %v4254_v38, %s3914_s3  ;;  %v2755_v38 = vmul.f32 %v5002_v24, %v4902_v63 }
0x1509   :  { %792 = vrot.lane.b32.xlu0 %v4267_v18, %s3914_s3 }
0x150a   :  { %794 = vrot.lane.b32.xlu1 %v4264_v30, %s3914_s3 }
0x150d   :  { %796 = vrot.lane.b32.xlu0 %v4277_v46, %s3914_s3 }
0x150e   :  { %798 = vrot.lane.b32.xlu1 %v4273_v36, %s3914_s3 }
0x1511   :  { %800 = vrot.lane.b32.xlu0 %v4283_v59, %s3914_s3 }
0x1512   :  { %1138 = vrot.lane.b32.xlu1 %v4396_v6, %s3914_s3  ;;  %v2757_v6 = vmul.f32 %v5012_v25, %v4914_v29 }
0x1515   :  { %1140 = vrot.lane.b32.xlu0 %v4390_v61, %s3914_s3  ;;  %v2758_v61 = vmul.f32 %v5009_v49, %v4912_v13 }
0x1516   :  { %1142 = vrot.lane.b32.xlu1 %v4393_v41, %s3914_s3 }
0x1519   :  { %1144 = vrot.lane.b32.xlu0 %v4406_v43, %s3914_s3 }
0x151a   :  { %1146 = vrot.lane.b32.xlu1 %v4403_v2, %s3914_s3 }
0x151d   :  { %1148 = vrot.lane.b32.xlu0 %v4416_v5, %s3914_s3 }
0x151e   :  { %1150 = vrot.lane.b32.xlu1 %v4412_v54, %s3914_s3 }
0x1521   :  { %1152 = vrot.lane.b32.xlu0 %v4422_v34, %s3914_s3 }
0x1522   :  { %1490 = vrot.lane.b32.xlu1 %v4543_v33, %s3914_s3 }
0x1525   :  { %1492 = vrot.lane.b32.xlu0 %v4537_v19, %s3914_s3 }
0x1526   :  { %1494 = vrot.lane.b32.xlu1 %v4540_v32, %s3914_s3 }
0x1529   :  { %1496 = vrot.lane.b32.xlu0 %v4553_v58, %s3914_s3 }
0x152a   :  { %1498 = vrot.lane.b32.xlu1 %v4550_v60, %s3914_s3  ;;  %v2760_v60 = vmul.f32 %v5017_v9, %v4923_v27  ;;  %v2761_v27 = vmul.f32 %v5026_v8, %v4931_v45 }
0x152d   :  { %1500 = vrot.lane.b32.xlu0 %v5333_v20, %s3914_s3 }
0x152e   :  { %1502 = vrot.lane.b32.xlu1 %v4559_v62, %s3914_s3  ;;  %v2759_v62 = vmul.f32 %v5020_v56, %v4925_v48 }
0x1531   :  { %1504 = vrot.lane.b32.xlu0 %v5334_v42, %s3914_s3 }
0x155c   :  { %v2811_v47 = vpop.permute.xlu1 %2810 }
0x155d   :  { %v2834_v23 = vadd.f32 %v2811_v47, %v2754_v26 }
0x155f   :  { %3735 = vtanh.f32 %v2834_v23  ;;  %v2815_v18 = vpop.permute.xlu0 %2814 }
0x1560   :  { %v2813_v30 = vpop.permute.xlu1 %2812  ;;  %v2836_v46 = vadd.f32 %v2815_v18, %v2756_v40 }
0x1561   :  { %v2835_v36 = vadd.f32 %v2813_v30, %v2755_v38 }
0x1562   :  { %v2958_v41 = vrot.slane %v2836_v46, 6 }
0x1563   :  { %3737 = vtanh.f32 %v2835_v36  ;;  %v2956_v59 = vrot.slane %v2835_v36, 7  ;;  %v2817_v54 = vpop.permute.xlu0 %2816 }
0x1564   :  { %3739 = vtanh.f32 %v2836_v46  ;;  %v2819_v2 = vpop.permute.xlu1 %2818  ;;  %v2837_v34 = vadd.f32 %v2817_v54, %v2757_v6  ;;  %v5337_v46 = vld [vmem:[#allocation23_spill] sm:$0xff]  ;;  %v5341_v54 = vld [vmem:[#allocation29_spill] sm:$0xff] }
0x1565   :  { %v2957_v43 = vsel %vm468_vm2, %v2956_v59, %v2834_v23  ;;  %v2838_v5 = vadd.f32 %v2819_v2, %v2758_v61 }
0x1566   :  { %v2959_v19 = vsel %vm471_vm3, %v2958_v41, %v2957_v43  ;;  %v2960_v58 = vrot.slane %v2837_v34, 5  ;;  %v5339_v41 = vld [vmem:[#allocation25_spill] sm:$0xff]  ;;  %v5340_v43 = vld [vmem:[#allocation31_spill] sm:$0xff] }
0x1567   :  { %3741 = vtanh.f32 %v2838_v5  ;;  %v2962_v33 = vrot.slane %v2838_v5, 4  ;;  %v2821_v63 = vpop.permute.xlu0 %2820 }
0x1568   :  { %3743 = vtanh.f32 %v2837_v34  ;;  %v2823_v11 = vpop.permute.xlu1 %2822  ;;  %v2961_v13 = vsel %vm474_vm4, %v2960_v58, %v2959_v19  ;;  %v2839_v29 = vadd.f32 %v2821_v63, %v2759_v62  ;;  %v5342_v19 = vld [vmem:[#allocation33_spill] sm:$0xff]  ;;  %v5344_v58 = vld [vmem:[#allocation34_spill] sm:$0xff] }
0x1569   :  { %v2840_v57 = vadd.f32 %v2823_v11, %v2760_v60  ;;  %v2963_v51 = vsel %vm477_vm5, %v2962_v33, %v2961_v13  ;;  %v5345_v62 = vld [vmem:[#allocation30_spill] sm:$0xff]  ;;  %v5347_v13 = vld [vmem:[#allocation32_spill] sm:$0xff] }
0x156a   :  { %v2964_v35 = vrot.slane %v2839_v29, 3 }
0x156b   :  { %3745 = vtanh.f32 %v2840_v57  ;;  %v2966_v3 = vrot.slane %v2840_v57, 2  ;;  %v2825_v28 = vpop.permute.xlu0 %2824  ;;  %v5346_v57 = vld [vmem:[#allocation35_spill] sm:$0xff] }
0x156c   :  { %v3736_v32 = vpop.eup %3735  ;;  %3747 = vtanh.f32 %v2839_v29  ;;  %v435_v55 = vpop.permute.xlu1 %434  ;;  %v2965_v48 = vsel %vm480_vm6, %v2964_v35, %v2963_v51  ;;  %v2841_v21 = vadd.f32 %v2825_v28, %v2761_v27  ;;  %v5349_v35 = vld [vmem:[#allocation37_spill] sm:$0xff]  ;;  %v5351_v28 = vld [vmem:[#allocation36_spill] sm:$0xff] }
0x156d   :  { %2858 = vrot.lane.b32.xlu1 %v3736_v32, %s3913_s2  ;;  %455 = vst.msk [vmem:[#allocation12 + $0x20] sm:$0x1] %vm450_vm9, %v435_v55  ;;  %v2967_v37 = vsel %vm483_vm7, %v2966_v3, %v2965_v48  ;;  %v5343_v32 = vld [vmem:[#allocation28_spill] sm:$0xff]  ;;  %v5348_v3 = vld [vmem:[#allocation39_spill] sm:$0xff]  ;;  %v5350_v55 = vld [vmem:[#allocation41_spill] sm:$0xff] }
0x156e   :  { %v2968_v7 = vrot.slane %v2841_v21, 1  ;;  %3749 = vtanh.f32 %v2841_v21  ;;  %v5352_v48 = vld [vmem:[#allocation42_spill] sm:$0xff] }
0x156f   :  { %v437_v0 = vpop.permute.xlu0 %436  ;;  %v5353_v21 = vld [vmem:[#allocation38_spill] sm:$0xff] }
0x1570   :  { %v3738_v14 = vpop.eup %3737  ;;  %v439_v4 = vpop.permute.xlu1 %438  ;;  %456 = vst.msk [vmem:[#allocation12 + $0x28] sm:$0x1] %vm450_vm9, %v437_v0  ;;  %v5119_v45 = vsel %vm486_vm8, %v2968_v7, %v2967_v37  ;;  %v5354_v37 = vld [vmem:[#allocation40_spill] sm:$0xff] }
0x1571   :  { %v3740_v17 = vpop.eup %3739  ;;  %457 = vst.msk [vmem:[#allocation12 + $0x30] sm:$0x1] %vm450_vm9, %v439_v4  ;;  %2860 = vrot.lane.b32.xlu1 %v3738_v14, %s3913_s2 }
0x1572   :  { %2862 = vrot.lane.b32.xlu0 %v3740_v17, %s3913_s2 }
0x1573   :  { %v441_v52 = vpop.permute.xlu0 %440 }
0x1574   :  { %v3742_v53 = vpop.eup %3741  ;;  %v787_v1 = vpop.permute.xlu1 %786  ;;  %458 = vst.msk [vmem:[#allocation12 + $0x38] sm:$0x1] %vm450_vm9, %v441_v52 }
0x1575   :  { %v3744_v12 = vpop.eup %3743  ;;  %810 = vst.msk [vmem:[#allocation12 + $0x1] sm:$0x1] %vm450_vm9, %v787_v1  ;;  %2866 = vrot.lane.b32.xlu1 %v3742_v53, %s3913_s2 }
0x1576   :  { %2864 = vrot.lane.b32.xlu0 %v3744_v12, %s3913_s2 }
0x1577   :  { %v789_v42 = vpop.permute.xlu0 %788 }
0x1578   :  { %v3746_v15 = vpop.eup %3745  ;;  %v791_v50 = vpop.permute.xlu1 %790  ;;  %811 = vst.msk [vmem:[#allocation12 + $0x9] sm:$0x1] %vm450_vm9, %v789_v42 }
0x1579   :  { %v3748_v20 = vpop.eup %3747  ;;  %812 = vst.msk [vmem:[#allocation12 + $0x11] sm:$0x1] %vm450_vm9, %v791_v50  ;;  %2870 = vrot.lane.b32.xlu1 %v3746_v15, %s3913_s2 }
0x157a   :  { %2868 = vrot.lane.b32.xlu0 %v3748_v20, %s3913_s2 }
0x157b   :  { %v793_v47 = vpop.permute.xlu0 %792  ;;  %v3750_v38 = vpop.eup %3749 }
0x157c   :  { %v795_v26 = vpop.permute.xlu1 %794  ;;  %813 = vst.msk [vmem:[#allocation12 + $0x19] sm:$0x1] %vm450_vm9, %v793_v47 }
0x157d   :  { %814 = vst.msk [vmem:[#allocation12 + $0x21] sm:$0x1] %vm450_vm9, %v795_v26  ;;  %1842 = vrot.lane.b32.xlu1 %v4681_v31, %s3914_s3 }
0x157e   :  { %1844 = vrot.lane.b32.xlu0 %v4675_v16, %s3914_s3  ;;  %v5335_v16 = vld [vmem:[#allocation24_spill] sm:$0xff] }
0x157f   :  { %v797_v40 = vpop.permute.xlu0 %796 }
0x1580   :  { %v799_v23 = vpop.permute.xlu1 %798  ;;  %815 = vst.msk [vmem:[#allocation12 + $0x29] sm:$0x1] %vm450_vm9, %v797_v40 }
0x1581   :  { %816 = vst.msk [vmem:[#allocation12 + $0x31] sm:$0x1] %vm450_vm9, %v799_v23  ;;  %1846 = vrot.lane.b32.xlu1 %v4678_v22, %s3914_s3  ;;  %v5336_v22 = vld [vmem:[#allocation26_spill] sm:$0xff] }
0x1582   :  { %2872 = vrot.lane.b32.xlu0 %v3750_v38, %s3913_s2 }
0x1583   :  { %v801_v18 = vpop.permute.xlu0 %800 }
0x1584   :  { %v1139_v30 = vpop.permute.xlu1 %1138  ;;  %817 = vst.msk [vmem:[#allocation12 + $0x39] sm:$0x1] %vm450_vm9, %v801_v18 }
0x1585   :  { %1162 = vst.msk [vmem:[#allocation12 + $0x2] sm:$0x1] %vm450_vm9, %v1139_v30  ;;  %1852 = vrot.lane.b32.xlu1 %v4701_v39, %s3914_s3  ;;  %v5338_v39 = vld [vmem:[#allocation27_spill] sm:$0xff] }
0x1586   :  { %1848 = vrot.lane.b32.xlu0 %v5335_v16, %s3914_s3 }
0x1587   :  { %v1141_v36 = vpop.permute.xlu0 %1140 }
0x1588   :  { %v1143_v31 = vpop.permute.xlu1 %1142  ;;  %1163 = vst.msk [vmem:[#allocation12 + $0xa] sm:$0x1] %vm450_vm9, %v1141_v36 }
0x1589   :  { %1164 = vst.msk [vmem:[#allocation12 + $0x12] sm:$0x1] %vm450_vm9, %v1143_v31  ;;  %1856 = vrot.lane.b32.xlu1 %v5336_v22, %s3914_s3 }
0x158a   :  { %1850 = vrot.lane.b32.xlu0 %v5337_v46, %s3914_s3 }
0x158b   :  { %v1145_v61 = vpop.permute.xlu0 %1144 }
0x158c   :  { %v1147_v59 = vpop.permute.xlu1 %1146  ;;  %1165 = vst.msk [vmem:[#allocation12 + $0x1a] sm:$0x1] %vm450_vm9, %v1145_v61 }
0x158d   :  { %1166 = vst.msk [vmem:[#allocation12 + $0x22] sm:$0x1] %vm450_vm9, %v1147_v59  ;;  %2196 = vrot.lane.b32.xlu1 %v5338_v39, %s3914_s3 }
0x158e   :  { %1854 = vrot.lane.b32.xlu0 %v5339_v41, %s3914_s3 }
0x158f   :  { %v1149_v2 = vpop.permute.xlu0 %1148 }
0x1590   :  { %v1151_v6 = vpop.permute.xlu1 %1150  ;;  %1167 = vst.msk [vmem:[#allocation12 + $0x2a] sm:$0x1] %vm450_vm9, %v1149_v2 }
0x1591   :  { %1168 = vst.msk [vmem:[#allocation12 + $0x32] sm:$0x1] %vm450_vm9, %v1151_v6  ;;  %2200 = vrot.lane.b32.xlu1 %v5340_v43, %s3914_s3 }
0x1592   :  { %2194 = vrot.lane.b32.xlu0 %v5341_v54, %s3914_s3 }
0x1593   :  { %v1153_v34 = vpop.permute.xlu0 %1152 }
0x1594   :  { %v1491_v5 = vpop.permute.xlu1 %1490  ;;  %1169 = vst.msk [vmem:[#allocation12 + $0x3a] sm:$0x1] %vm450_vm9, %v1153_v34 }
0x1595   :  { %1514 = vst.msk [vmem:[#allocation12 + $0x3] sm:$0x1] %vm450_vm9, %v1491_v5  ;;  %2204 = vrot.lane.b32.xlu1 %v5342_v19, %s3914_s3 }
0x1596   :  { %2198 = vrot.lane.b32.xlu0 %v5343_v32, %s3914_s3 }
0x1597   :  { %v1493_v60 = vpop.permute.xlu0 %1492 }
0x1598   :  { %v1495_v33 = vpop.permute.xlu1 %1494  ;;  %1515 = vst.msk [vmem:[#allocation12 + $0xb] sm:$0x1] %vm450_vm9, %v1493_v60 }
0x1599   :  { %1516 = vst.msk [vmem:[#allocation12 + $0x13] sm:$0x1] %vm450_vm9, %v1495_v33  ;;  %2208 = vrot.lane.b32.xlu1 %v5344_v58, %s3914_s3 }
0x159a   :  { %2202 = vrot.lane.b32.xlu0 %v5345_v62, %s3914_s3 }
0x159b   :  { %v1497_v63 = vpop.permute.xlu0 %1496 }
0x159c   :  { %v1499_v11 = vpop.permute.xlu1 %1498  ;;  %1517 = vst.msk [vmem:[#allocation12 + $0x1b] sm:$0x1] %vm450_vm9, %v1497_v63 }
0x159d   :  { %1518 = vst.msk [vmem:[#allocation12 + $0x23] sm:$0x1] %vm450_vm9, %v1499_v11  ;;  %2548 = vrot.lane.b32.xlu1 %v5346_v57, %s3914_s3 }
0x159e   :  { %2206 = vrot.lane.b32.xlu0 %v5347_v13, %s3914_s3 }
0x159f   :  { %v1501_v51 = vpop.permute.xlu0 %1500 }
0x15a0   :  { %v1503_v29 = vpop.permute.xlu1 %1502  ;;  %1519 = vst.msk [vmem:[#allocation12 + $0x2b] sm:$0x1] %vm450_vm9, %v1501_v51 }
0x15a1   :  { %1520 = vst.msk [vmem:[#allocation12 + $0x33] sm:$0x1] %vm450_vm9, %v1503_v29  ;;  %2552 = vrot.lane.b32.xlu1 %v5348_v3, %s3914_s3 }
0x15a2   :  { %2546 = vrot.lane.b32.xlu0 %v5349_v35, %s3914_s3 }
0x15a3   :  { %v1505_v27 = vpop.permute.xlu0 %1504 }
0x15a4   :  { %1521 = vst.msk [vmem:[#allocation12 + $0x3b] sm:$0x1] %vm450_vm9, %v1505_v27 }
0x15a5   :  { %2556 = vrot.lane.b32.xlu1 %v5350_v55, %s3914_s3 }
0x15a6   :  { %2550 = vrot.lane.b32.xlu0 %v5351_v28, %s3914_s3 }
0x15a9   :  { %2560 = vrot.lane.b32.xlu1 %v5352_v48, %s3914_s3 }
0x15aa   :  { %2554 = vrot.lane.b32.xlu0 %v5353_v21, %s3914_s3 }
0x15ae   :  { %2558 = vrot.lane.b32.xlu0 %v5354_v37, %s3914_s3 }
0x15df   :  { %v2859_v14 = vpop.permute.xlu1 %2858 }
0x15e0   :  { %v2882_v7 = vmul.f32 %v4998_v44, %v2859_v14 }
0x15e2   :  { %2898 = vrot.lane.b32.xlu0 %v2882_v7, %s3914_s3 }
0x15e3   :  { %v2861_v4 = vpop.permute.xlu1 %2860 }
0x15e4   :  { %v2863_v17 = vpop.permute.xlu0 %2862  ;;  %v2883_v0 = vmul.f32 %v5002_v24, %v2861_v4 }
0x15e5   :  { %v2884_v53 = vmul.f32 %v5004_v10, %v2863_v17 }
0x15e6   :  { %v2930_v1 = vrot.slane %v2883_v0, 7  ;;  %2900 = vrot.lane.b32.xlu1 %v2883_v0, %s3914_s3 }
0x15e7   :  { %2902 = vrot.lane.b32.xlu0 %v2884_v53, %s3914_s3  ;;  %v2867_v12 = vpop.permute.xlu1 %2866  ;;  %v2932_v20 = vrot.slane %v2884_v53, 6 }
0x15e8   :  { %v2865_v52 = vpop.permute.xlu0 %2864  ;;  %v2886_v15 = vmul.f32 %v5009_v49, %v2867_v12  ;;  %v2931_v50 = vsel %vm468_vm2, %v2930_v1, %v2882_v7 }
0x15e9   :  { %v2885_v44 = vmul.f32 %v5012_v25, %v2865_v52  ;;  %v2933_v10 = vsel %vm471_vm3, %v2932_v20, %v2931_v50 }
0x15ea   :  { %v2936_v38 = vrot.slane %v2886_v15, 4 }
0x15eb   :  { %v2934_v42 = vrot.slane %v2885_v44, 5  ;;  %2904 = vrot.lane.b32.xlu1 %v2885_v44, %s3914_s3  ;;  %2906 = vrot.lane.b32.xlu0 %v2886_v15, %s3914_s3  ;;  %v2871_v24 = vpop.permute.xlu1 %2870 }
0x15ec   :  { %v2869_v26 = vpop.permute.xlu0 %2868  ;;  %v2888_v47 = vmul.f32 %v5017_v9, %v2871_v24 }
0x15ed   :  { %v2887_v23 = vmul.f32 %v5020_v56, %v2869_v26  ;;  %v2935_v49 = vsel %vm474_vm4, %v2934_v42, %v2933_v10 }
0x15ee   :  { %v2937_v18 = vsel %vm477_vm5, %v2936_v38, %v2935_v49  ;;  %v2940_v56 = vrot.slane %v2888_v47, 2 }
0x15ef   :  { %2908 = vrot.lane.b32.xlu1 %v2887_v23, %s3914_s3  ;;  %2910 = vrot.lane.b32.xlu0 %v2888_v47, %s3914_s3  ;;  %v1843_v25 = vpop.permute.xlu1 %1842  ;;  %v2938_v30 = vrot.slane %v2887_v23, 3 }
0x15f0   :  { %v1845_v40 = vpop.permute.xlu0 %1844  ;;  %1866 = vst.msk [vmem:[#allocation12 + $0x4] sm:$0x1] %vm450_vm9, %v1843_v25 }
0x15f1   :  { %1867 = vst.msk [vmem:[#allocation12 + $0xc] sm:$0x1] %vm450_vm9, %v1845_v40  ;;  %v2939_v31 = vsel %vm480_vm6, %v2938_v30, %v2937_v18 }
0x15f2   :  { %v2941_v61 = vsel %vm483_vm7, %v2940_v56, %v2939_v31 }
0x15f3   :  { %2970 = vrot.lane.b32.xlu0 %v5119_v45, %s3915_s17  ;;  %v1847_v9 = vpop.permute.xlu1 %1846 }
0x15f4   :  { %v2873_v16 = vpop.permute.xlu0 %2872  ;;  %1868 = vst.msk [vmem:[#allocation12 + $0x14] sm:$0x1] %vm450_vm9, %v1847_v9 }
0x15f5   :  { %v2889_v36 = vmul.f32 %v5026_v8, %v2873_v16 }
0x15f7   :  { %v2942_v22 = vrot.slane %v2889_v36, 1  ;;  %v1853_v46 = vpop.permute.xlu1 %1852 }
0x15f8   :  { %v1849_v59 = vpop.permute.xlu0 %1848  ;;  %1871 = vst.msk [vmem:[#allocation12 + $0x2c] sm:$0x1] %vm450_vm9, %v1853_v46 }
0x15f9   :  { %1869 = vst.msk [vmem:[#allocation12 + $0x1c] sm:$0x1] %vm450_vm9, %v1849_v59  ;;  %v2943_v45 = vsel %vm486_vm8, %v2942_v22, %v2941_v61 }
0x15fa   :  { %2944 = vrot.lane.b32.xlu1 %v2943_v45, %s3914_s3 }
0x15fb   :  { %v1857_v39 = vpop.permute.xlu1 %1856 }
0x15fc   :  { %v1851_v41 = vpop.permute.xlu0 %1850  ;;  %1873 = vst.msk [vmem:[#allocation12 + $0x3c] sm:$0x1] %vm450_vm9, %v1857_v39 }
0x15fd   :  { %1870 = vst.msk [vmem:[#allocation12 + $0x24] sm:$0x1] %vm450_vm9, %v1851_v41 }
0x15fe   :  { %2912 = vrot.lane.b32.xlu1 %v2889_v36, %s3914_s3 }
0x15ff   :  { %v2197_v8 = vpop.permute.xlu1 %2196 }
0x1600   :  { %v1855_v6 = vpop.permute.xlu0 %1854  ;;  %2219 = vst.msk [vmem:[#allocation12 + $0xd] sm:$0x1] %vm450_vm9, %v2197_v8 }
0x1601   :  { %1872 = vst.msk [vmem:[#allocation12 + $0x34] sm:$0x1] %vm450_vm9, %v1855_v6 }
0x1603   :  { %v2201_v2 = vpop.permute.xlu1 %2200 }
0x1604   :  { %v2195_v43 = vpop.permute.xlu0 %2194  ;;  %2221 = vst.msk [vmem:[#allocation12 + $0x1d] sm:$0x1] %vm450_vm9, %v2201_v2 }
0x1605   :  { %2218 = vst.msk [vmem:[#allocation12 + $0x5] sm:$0x1] %vm450_vm9, %v2195_v43 }
0x1607   :  { %v2205_v54 = vpop.permute.xlu1 %2204 }
0x1608   :  { %v2199_v5 = vpop.permute.xlu0 %2198  ;;  %2223 = vst.msk [vmem:[#allocation12 + $0x2d] sm:$0x1] %vm450_vm9, %v2205_v54 }
0x1609   :  { %2220 = vst.msk [vmem:[#allocation12 + $0x15] sm:$0x1] %vm450_vm9, %v2199_v5 }
0x160b   :  { %v2209_v34 = vpop.permute.xlu1 %2208 }
0x160c   :  { %v2203_v19 = vpop.permute.xlu0 %2202  ;;  %2225 = vst.msk [vmem:[#allocation12 + $0x3d] sm:$0x1] %vm450_vm9, %v2209_v34 }
0x160d   :  { %2222 = vst.msk [vmem:[#allocation12 + $0x25] sm:$0x1] %vm450_vm9, %v2203_v19 }
0x160f   :  { %v2549_v32 = vpop.permute.xlu1 %2548 }
0x1610   :  { %v2207_v33 = vpop.permute.xlu0 %2206  ;;  %2571 = vst.msk [vmem:[#allocation12 + $0xe] sm:$0x1] %vm450_vm9, %v2549_v32 }
0x1611   :  { %2224 = vst.msk [vmem:[#allocation12 + $0x35] sm:$0x1] %vm450_vm9, %v2207_v33 }
0x1613   :  { %v2553_v60 = vpop.permute.xlu1 %2552 }
0x1614   :  { %v2547_v58 = vpop.permute.xlu0 %2546  ;;  %2573 = vst.msk [vmem:[#allocation12 + $0x1e] sm:$0x1] %vm450_vm9, %v2553_v60 }
0x1615   :  { %2570 = vst.msk [vmem:[#allocation12 + $0x6] sm:$0x1] %vm450_vm9, %v2547_v58 }
0x1617   :  { %v2557_v62 = vpop.permute.xlu1 %2556 }
0x1618   :  { %v2551_v11 = vpop.permute.xlu0 %2550  ;;  %2575 = vst.msk [vmem:[#allocation12 + $0x2e] sm:$0x1] %vm450_vm9, %v2557_v62 }
0x1619   :  { %2572 = vst.msk [vmem:[#allocation12 + $0x16] sm:$0x1] %vm450_vm9, %v2551_v11 }
0x161b   :  { %v2561_v63 = vpop.permute.xlu1 %2560 }
0x161c   :  { %v2555_v57 = vpop.permute.xlu0 %2554  ;;  %2577 = vst.msk [vmem:[#allocation12 + $0x3e] sm:$0x1] %vm450_vm9, %v2561_v63 }
0x161d   :  { %2574 = vst.msk [vmem:[#allocation12 + $0x26] sm:$0x1] %vm450_vm9, %v2555_v57 }
0x1620   :  { %v2559_v13 = vpop.permute.xlu0 %2558 }
0x1621   :  { %2576 = vst.msk [vmem:[#allocation12 + $0x36] sm:$0x1] %vm450_vm9, %v2559_v13 }
0x1654   :  { %v2899_v29 = vpop.permute.xlu0 %2898 }
0x1655   :  { %2922 = vst.msk [vmem:[#allocation12 + $0x7] sm:$0x1] %vm450_vm9, %v2899_v29 }
0x1658   :  { %v2901_v51 = vpop.permute.xlu1 %2900 }
0x1659   :  { %v2903_v3 = vpop.permute.xlu0 %2902  ;;  %2923 = vst.msk [vmem:[#allocation12 + $0xf] sm:$0x1] %vm450_vm9, %v2901_v51 }
0x165a   :  { %2924 = vst.msk [vmem:[#allocation12 + $0x17] sm:$0x1] %vm450_vm9, %v2903_v3 }
0x165d   :  { %v2907_v35 = vpop.permute.xlu0 %2906  ;;  %v2905_v27 = vpop.permute.xlu1 %2904 }
0x165e   :  { %2926 = vst.msk [vmem:[#allocation12 + $0x27] sm:$0x1] %vm450_vm9, %v2907_v35  ;;  %2925 = vst.msk [vmem:[#allocation12 + $0x1f] sm:$0x1] %vm450_vm9, %v2905_v27 }
0x1661   :  { %v2911_v55 = vpop.permute.xlu0 %2910  ;;  %v2909_v28 = vpop.permute.xlu1 %2908 }
0x1662   :  { %2928 = vst.msk [vmem:[#allocation12 + $0x37] sm:$0x1] %vm450_vm9, %v2911_v55  ;;  %2927 = vst.msk [vmem:[#allocation12 + $0x2f] sm:$0x1] %vm450_vm9, %v2909_v28 }
0x1665   :  { %v2971_v48 = vpop.permute.xlu0 %2970 }
0x1666   :  { %2973 = vst.msk [vmem:[#allocation3] sm:$0xff] %vm78_vm1, %v2971_v48  ;;  %2978 = vst.msk [vmem:[#allocation15] sm:$0xff] %vm78_vm1, %v2971_v48 }
0x166c   :  { %v2945_v21 = vpop.permute.xlu1 %2944 }
0x166d   :  { %2947 = vst.msk [vmem:[#allocation2] sm:$0xff] %vm78_vm1, %v2945_v21  ;;  %2977 = vst.msk [vmem:[#allocation13] sm:$0xff] %vm78_vm1, %v2945_v21 }
0x166e   :  { %3846 = shalt.err (!%p3843_p10)
}
0x166f   :  { %3000 = dma.vmem_to_hbm [thread:$0]  %s2998_s19, 128, %s5284_s5, [#allocation14]  }
0x1670   :  { %s3855_s29 = scalar_lea.vmem %s3008_s21, 128  ;;  %p3860_p12 = scmp.lt.s32.totalorder %s3008_s21, %s3008_s21 }
0x1671   :  { %p3856_p11 = scmp.ne.s32.totalorder %s3008_s21, %s3855_s29  ;;  %p3861_p13 = scmp.lt.s32.totalorder %s3855_s29, %s3855_s29 }
0x1673   :  { %p3862_p0 = por %p3861_p13, %p3860_p12 }
0x1675   :  { %p3863_p1 = pnand %p3862_p0, %p3856_p11 }
0x1677   :  { %3866 = shalt.err (!%p3863_p1)
}
0x1678   :  { %3010 = dma.vmem_to_hbm [thread:$0]  %s3008_s21, 128, %s5285_s6, [#allocation14]   ;;  %v2913_v37 = vpop.permute.xlu1 %2912 }
0x1679   :  { %2929 = vst.msk [vmem:[#allocation12 + $0x3f] sm:$0x1] %vm450_vm9, %v2913_v37  ;;  %s3875_s8 = scalar_lea.vmem %s5259_s23, 1024  ;;  %p3880_p3 = scmp.lt.s32.totalorder %s5259_s23, %s5259_s23 }
0x167a   :  { %p3876_p2 = scmp.ne.s32.totalorder %s5259_s23, %s3875_s8  ;;  %p3881_p4 = scmp.lt.s32.totalorder %s3875_s8, %s3875_s8 }
0x167c   :  { %p3882_p5 = por %p3881_p4, %p3880_p3 }
0x167e   :  { %p3883_p6 = pnand %p3882_p5, %p3876_p2 }
0x1680   :  { %3886 = shalt.err (!%p3883_p6)
}
0x1681   :  { %2990 = dma.vmem_to_hbm [thread:$0]  %s5259_s23, 1024, %s5283_s4, [#allocation6], %s3907_s26, %s3907_s26, %s3908_s27  }
0x1682   :  { %3901 = dma.done.wait [#allocation6], 1024  }
0x1683   :  { %3902 = vsyncadd [#allocation6], 4294966272 }
0x1684   :  { %3903 = dma.done.wait [#allocation14], 256  }
0x1685   :  { %3904 = vsyncadd [#allocation14], 4294967040 }
0x1686   :  { %3020 = vsyncpa [#allocation5], 1 }
0x1687   :  { %3021 = vsyncpa [#allocation8], 1 }
0x1688   :  { %3022 = vsyncpa [#allocation11], 1 }
0x1689   :  { %3023 = vsyncpa [#allocation6], 1 }
0x168a   :  { %3024 = vsyncpa [#allocation14], 1 }

</bundles_post_ra>
